<compile_context>
chip_gen: v7x
topology: tpu7x:2x2x1
jax: 0.10.0
libtpu: 0.0.40
codegen_flags: <defaults>
</compile_context>

<pallas_src>
import functools

import numpy as np

import jax
import jax.numpy as jnp
from jax.experimental import pallas as pl
from jax.experimental.pallas import tpu as pltpu


# --------------------------------------------------------------------------------------
# Kernel
# --------------------------------------------------------------------------------------
def _pos_embed_kernel(emb_ref, const_ref, out_ref, *, exact_cos):
    # emb_ref:   (2, T)      f32 -- row 0 = y_embed, row 1 = x_embed (already normalized)
    # const_ref: (npf, 2)    f32 -- col 0 = 1/dim_t, col 1 = phase (0.0 even / pi/2 odd)
    # out_ref:   (2*npf, T)  out_dtype -- rows [0, npf) = pos_y, [npf, 2*npf) = pos_x
    npf = const_ref.shape[0]

    consts = const_ref[...]            # (npf, 2)
    inv = consts[:, 0:1]               # (npf, 1)  1 / dim_t
    phase = consts[:, 1:2]             # (npf, 1)  0 (even -> sin) or pi/2 (odd -> cos)

    emb = emb_ref[...]                 # (2, T)
    y = emb[0:1, :]                    # (1, T)
    x = emb[1:2, :]                    # (1, T)

    ay = y * inv                       # (npf, T)
    ax = x * inv                       # (npf, T)

    if exact_cos:
        # Exact PyTorch semantics: sin on even channels, cos on odd channels.
        is_even = phase == 0.0         # (npf, 1) bool
        pos_y = jnp.where(is_even, jnp.sin(ay), jnp.cos(ay))
        pos_x = jnp.where(is_even, jnp.sin(ax), jnp.cos(ax))
    else:
        # Single-transcendental variant: cos(a) == sin(a + pi/2).  Slightly lossy for
        # large unnormalized arguments; use only if a v7x profile shows EUP-bound.
        pos_y = jnp.sin(ay + phase)
        pos_x = jnp.sin(ax + phase)

    # Two direct slab stores into disjoint row ranges (no concatenate).
    out_ref[0:npf, :] = pos_y.astype(out_ref.dtype)
    out_ref[npf:, :] = pos_x.astype(out_ref.dtype)


# --------------------------------------------------------------------------------------
# Tiling helpers
# --------------------------------------------------------------------------------------
def _round_up(x, m):
    return ((x + m - 1) // m) * m


def _cdiv(a, b):
    return -(-a // b)


def _choose_tile(hw, batch, max_tile=8192, min_steps=8):
    """Pick the lane-tile width (a multiple of 128).

    Prefers the largest 128-multiple divisor of round_up(hw, 128) up to max_tile; if
    that divisor is small, falls back to a large non-dividing tile whose forced padding
    stays under ~12.5% of the output bytes.  Finally shrinks the tile if the grid would
    otherwise have too few steps to occupy both v7x TensorCores.
    """
    hw128 = _round_up(hw, 128)
    limit = min(hw128, max_tile)

    # Largest 128-multiple divisor of hw128 that is <= limit.
    tile = 128
    for t in range(128, limit + 1, 128):
        if hw128 % t == 0:
            tile = t

    # Non-dividing fallback for awkward hw: biggest tile with bounded padding waste.
    t = limit
    while t > tile:
        pad = _round_up(hw128, t) - hw128
        if pad * 8 <= hw128:          # <= ~12.5% extra writes
            tile = t
            break
        t -= 128

    # Megacore: prefer >= min_steps grid steps when the problem allows it.
    while tile > 128 and batch * _cdiv(hw, tile) < min_steps:
        tile = _round_up(max(128, tile // 2), 128)

    return tile


# --------------------------------------------------------------------------------------
# Wrapper (forward pass of PositionEmbeddingSine)
# --------------------------------------------------------------------------------------
def position_embedding_sine(x, mask=None, *, num_pos_feats=64, temperature=10000,
                            normalize=False, scale=None, out_dtype=jnp.float32,
                            exact_cos=True):
    """JAX/Pallas equivalent of PositionEmbeddingSine.forward.

    x:    (B, C, H, W)  -- only its shape is used.
    mask: optional bool (B, H, W); None means no masking.
    Returns (B, 2*num_pos_feats, H, W) in `out_dtype` (f32 by default, matching PyTorch).
    """
    if scale is not None and normalize is False:
        raise ValueError('normalize should be True if scale is passed')
    if scale is None:
        scale = 2 * np.pi

    B, _, H, W = x.shape
    HW = H * W
    npf = num_pos_feats
    eps = 1e-06

    # ---- y/x embeddings (tiny, left to XLA as recommended) --------------------------
    if mask is None:
        # Batch-invariant: build one (1, 2, HW) table shared across the batch.
        y_row = jnp.arange(1, H + 1, dtype=jnp.float32)
        x_col = jnp.arange(1, W + 1, dtype=jnp.float32)
        if normalize:
            y_row = y_row / (H + eps) * scale
            x_col = x_col / (W + eps) * scale
        y_flat = jnp.repeat(y_row, W)           # (HW,)  row index (+1), row-major flatten
        x_flat = jnp.tile(x_col, H)             # (HW,)  col index (+1)
        emb = jnp.stack([y_flat, x_flat], axis=0)[None]        # (1, 2, HW)
    else:
        mask = jnp.asarray(mask, dtype=bool)
        not_mask = (~mask).astype(jnp.float32)
        y_embed = jnp.cumsum(not_mask, axis=1)
        x_embed = jnp.cumsum(not_mask, axis=2)
        if normalize:
            y_embed = y_embed / (y_embed[:, -1:, :] + eps) * scale
            x_embed = x_embed / (x_embed[:, :, -1:] + eps) * scale
        emb = jnp.stack([y_embed.reshape(B, HW), x_embed.reshape(B, HW)], axis=1)  # (B,2,HW)
    emb = emb.astype(jnp.float32)
    emb_batched = emb.shape[0] != 1

    # ---- hoisted per-channel constants: (npf, 2) = [1/dim_t, phase] -----------------
    i = jnp.arange(npf, dtype=jnp.float32)
    dim_t = jnp.asarray(temperature, jnp.float32) ** (2.0 * jnp.floor(i / 2.0) / npf)
    inv_dim_t = 1.0 / dim_t
    phase = jnp.where((jnp.arange(npf) % 2) == 0, 0.0, np.pi / 2.0).astype(jnp.float32)
    consts = jnp.stack([inv_dim_t, phase], axis=1).astype(jnp.float32)   # (npf, 2)

    # ---- tiling: lane-dense, bounded VMEM, enough steps for megacore ----------------
    tile = _choose_tile(HW, B)
    hw_pad = _round_up(HW, tile)
    if hw_pad != HW:
        emb = jnp.pad(emb, ((0, 0), (0, 0), (0, hw_pad - HW)))
    num_tiles = hw_pad // tile
    grid = (B, num_tiles)

    emb_map = (lambda b, t: (b, 0, t)) if emb_batched else (lambda b, t: (0, 0, t))

    n_out = B * 2 * npf * hw_pad
    out_itemsize = jnp.dtype(out_dtype).itemsize
    cost = pl.CostEstimate(
        flops=int(3 * n_out),
        transcendentals=int((2 if exact_cos else 1) * n_out),
        bytes_accessed=int(n_out * out_itemsize + B * num_tiles * (2 * tile + 2 * npf) * 4),
    )

    out_flat = pl.pallas_call(
        functools.partial(_pos_embed_kernel, exact_cos=exact_cos),
        out_shape=jax.ShapeDtypeStruct((B, 2 * npf, hw_pad), out_dtype),
        grid_spec=pltpu.PrefetchScalarGridSpec(
            num_scalar_prefetch=0,
            grid=grid,
            in_specs=[
                pl.BlockSpec((None, 2, tile), emb_map),
                pl.BlockSpec((npf, 2), lambda b, t: (0, 0)),
            ],
            out_specs=pl.BlockSpec((None, 2 * npf, tile), lambda b, t: (b, 0, t)),
        ),
        compiler_params=pltpu.CompilerParams(
            dimension_semantics=("parallel", "parallel")),
        cost_estimate=cost,
    )(emb, consts)

    if hw_pad != HW:
        out_flat = out_flat[:, :, :HW]
    # Free reshape (no transpose): (B, 2*npf, H*W) -> (B, 2*npf, H, W).
    return out_flat.reshape(B, 2 * npf, H, W)


# --------------------------------------------------------------------------------------
# Pure-JAX reference (mirror of the PyTorch forward) for correctness checks
# --------------------------------------------------------------------------------------
def _reference(x, mask=None, num_pos_feats=64, temperature=10000, normalize=False, scale=None):
    if scale is None:
        scale = 2 * np.pi
    B, _, H, W = x.shape
    if mask is None:
        mask = jnp.zeros((B, H, W), dtype=bool)
    not_mask = (~mask).astype(jnp.float32)
    y_embed = jnp.cumsum(not_mask, axis=1)
    x_embed = jnp.cumsum(not_mask, axis=2)
    if normalize:
        eps = 1e-06
        y_embed = y_embed / (y_embed[:, -1:, :] + eps) * scale
        x_embed = x_embed / (x_embed[:, :, -1:] + eps) * scale
    i = jnp.arange(num_pos_feats, dtype=jnp.float32)
    dim_t = jnp.asarray(temperature, jnp.float32) ** (2.0 * jnp.floor(i / 2.0) / num_pos_feats)
    pos_x = x_embed[:, :, :, None] / dim_t
    pos_y = y_embed[:, :, :, None] / dim_t
    pos_x = jnp.stack((jnp.sin(pos_x[..., 0::2]), jnp.cos(pos_x[..., 1::2])),
                      axis=4).reshape(B, H, W, -1)
    pos_y = jnp.stack((jnp.sin(pos_y[..., 0::2]), jnp.cos(pos_y[..., 1::2])),
                      axis=4).reshape(B, H, W, -1)
    return jnp.transpose(jnp.concatenate((pos_y, pos_x), axis=3), (0, 3, 1, 2))


if __name__ == "__main__":
    key = jax.random.PRNGKey(0)
    kx, km = jax.random.split(key)

    B, C, H, W = 2, 4, 16, 16
    x = jax.random.normal(kx, (B, C, H, W), dtype=jnp.float32)

    # Case 1: defaults (mask=None, normalize=False) -- shared (1, 2, HW) embed path.
    pos = jax.block_until_ready(position_embedding_sine(x))
    assert pos.shape == (B, 128, H, W), pos.shape
    ref = _reference(x)
    np.testing.assert_allclose(np.asarray(pos), np.asarray(ref), atol=2e-5, rtol=1e-5)

    # Case 2: non-trivial mask + normalize=True -- batched cumsum embed path.
    mask = jax.random.bernoulli(km, 0.25, (B, H, W))
    pos2 = jax.block_until_ready(position_embedding_sine(x, mask=mask, normalize=True))
    ref2 = _reference(x, mask=mask, normalize=True)
    np.testing.assert_allclose(np.asarray(pos2), np.asarray(ref2), atol=2e-5, rtol=1e-5)

    # Case 3: H*W not a multiple of 128 (exercises lane padding + output slice) + scale.
    x3 = jax.random.normal(kx, (2, 4, 7, 9), dtype=jnp.float32)
    pos3 = jax.block_until_ready(
        position_embedding_sine(x3, num_pos_feats=32, normalize=True, scale=4.0))
    assert pos3.shape == (2, 64, 7, 9), pos3.shape
    ref3 = _reference(x3, num_pos_feats=32, normalize=True, scale=4.0)
    np.testing.assert_allclose(np.asarray(pos3), np.asarray(ref3), atol=2e-5, rtol=1e-5)

    # Case 4: optional bf16 output (halves HBM write bytes) -- smoke test only.
    pos4 = jax.block_until_ready(position_embedding_sine(x, out_dtype=jnp.bfloat16))
    assert pos4.dtype == jnp.bfloat16 and pos4.shape == (B, 128, H, W)

    print("KERNEL_OK")
</pallas_src>

<mosaic_0001>
module attributes {stable_mosaic.version = 11 : i64} {
  func.func @_pos_embed_kernel(%arg0: i32, %arg1: i32, %arg2: memref<1x2x128xf32, #tpu.memory_space<vmem>>, %arg3: memref<64x2xf32, #tpu.memory_space<vmem>>, %arg4: memref<1x128x128xf32, #tpu.memory_space<vmem>>) attributes {dimension_semantics = [#tpu.dimension_semantics<parallel>, #tpu.dimension_semantics<parallel>], iteration_bounds = array<i64: 2, 2>, scalar_prefetch = 0 : i64, scratch_operands = 0 : i64, tpu.core_type = #tpu.core_type<tc>, window_params = [{transform_indices = @transform_0, window_bounds = array<i64: 1, 2, 128>}, {pipeline_mode = #tpu.pipeline_mode<synchronous>, transform_indices = @transform_1, window_bounds = array<i64: 64, 2>}, {transform_indices = @transform_2, window_bounds = array<i64: 1, 128, 128>}]} {
    %c0 = arith.constant 0 : index
    %c0_0 = arith.constant 0 : index
    %0 = vector.load %arg3[%c0, %c0_0] : memref<64x2xf32, #tpu.memory_space<vmem>>, vector<64x2xf32>
    %1 = vector.extract_strided_slice %0 {offsets = [0, 0], sizes = [64, 1], strides = [1, 1]} : vector<64x2xf32> to vector<64x1xf32>
    %2 = vector.extract_strided_slice %0 {offsets = [0, 1], sizes = [64, 1], strides = [1, 1]} : vector<64x2xf32> to vector<64x1xf32>
    %c0_1 = arith.constant 0 : index
    %c0_2 = arith.constant 0 : index
    %c0_3 = arith.constant 0 : index
    %3 = vector.load %arg2[%c0_1, %c0_2, %c0_3] : memref<1x2x128xf32, #tpu.memory_space<vmem>>, vector<1x2x128xf32>
    %4 = vector.shape_cast %3 : vector<1x2x128xf32> to vector<2x128xf32>
    %5 = vector.extract_strided_slice %4 {offsets = [0, 0], sizes = [1, 128], strides = [1, 1]} : vector<2x128xf32> to vector<1x128xf32>
    %6 = vector.extract_strided_slice %4 {offsets = [1, 0], sizes = [1, 128], strides = [1, 1]} : vector<2x128xf32> to vector<1x128xf32>
    %7 = vector.broadcast %5 : vector<1x128xf32> to vector<64x128xf32>
    %8 = vector.broadcast %1 : vector<64x1xf32> to vector<64x128xf32>
    %9 = arith.mulf %7, %8 : vector<64x128xf32>
    %10 = vector.broadcast %6 : vector<1x128xf32> to vector<64x128xf32>
    %11 = vector.broadcast %1 : vector<64x1xf32> to vector<64x128xf32>
    %12 = arith.mulf %10, %11 : vector<64x128xf32>
    %cst = arith.constant 0.000000e+00 : f32
    %13 = vector.broadcast %cst : f32 to vector<64x1xf32>
    %14 = arith.cmpf oeq, %2, %13 : vector<64x1xf32>
    %15 = math.sin %9 : vector<64x128xf32>
    %16 = math.cos %9 : vector<64x128xf32>
    %17 = vector.shape_cast %14 : vector<64x1xi1> to vector<64x1xi1>
    %18 = vector.broadcast %17 : vector<64x1xi1> to vector<64x128xi1>
    %19 = arith.select %18, %15, %16 : vector<64x128xi1>, vector<64x128xf32>
    %20 = math.sin %12 : vector<64x128xf32>
    %21 = math.cos %12 : vector<64x128xf32>
    %22 = vector.shape_cast %14 : vector<64x1xi1> to vector<64x1xi1>
    %23 = vector.broadcast %22 : vector<64x1xi1> to vector<64x128xi1>
    %24 = arith.select %23, %20, %21 : vector<64x128xi1>, vector<64x128xf32>
    %c0_4 = arith.constant 0 : index
    %c0_5 = arith.constant 0 : index
    %c0_6 = arith.constant 0 : index
    %25 = vector.load %arg4[%c0_4, %c0_5, %c0_6] : memref<1x128x128xf32, #tpu.memory_space<vmem>>, vector<1x64x128xf32>
    %26 = vector.shape_cast %25 : vector<1x64x128xf32> to vector<64x128xf32>
    %27 = vector.shape_cast %19 : vector<64x128xf32> to vector<1x64x128xf32>
    tpu.vector_store %arg4[%c0_4, %c0_5, %c0_6], %27 {strides = array<i32>} : memref<1x128x128xf32, #tpu.memory_space<vmem>>, vector<1x64x128xf32>,
    %c0_7 = arith.constant 0 : index
    %c64 = arith.constant 64 : index
    %c0_8 = arith.constant 0 : index
    %28 = vector.load %arg4[%c0_7, %c64, %c0_8] : memref<1x128x128xf32, #tpu.memory_space<vmem>>, vector<1x64x128xf32>
    %29 = vector.shape_cast %28 : vector<1x64x128xf32> to vector<64x128xf32>
    %30 = vector.shape_cast %24 : vector<64x128xf32> to vector<1x64x128xf32>
    tpu.vector_store %arg4[%c0_7, %c64, %c0_8], %30 {strides = array<i32>} : memref<1x128x128xf32, #tpu.memory_space<vmem>>, vector<1x64x128xf32>,
    return
  }
  func.func @transform_0(%arg0: i32, %arg1: i32) -> (i32, i32, i32) {
    %c0_i32 = arith.constant 0 : i32
    %c0_i32_0 = arith.constant 0 : i32
    %c0_i32_1 = arith.constant 0 : i32
    return %c0_i32, %c0_i32_0, %arg1 : i32, i32, i32
  }
  func.func @transform_1(%arg0: i32, %arg1: i32) -> (i32, i32) {
    %c0_i32 = arith.constant 0 : i32
    %c0_i32_0 = arith.constant 0 : i32
    %c0_i32_1 = arith.constant 0 : i32
    return %c0_i32, %c0_i32_0 : i32, i32
  }
  func.func @transform_2(%arg0: i32, %arg1: i32) -> (i32, i32, i32) {
    %c0_i32 = arith.constant 0 : i32
    %c0_i32_0 = arith.constant 0 : i32
    return %arg0, %c0_i32, %arg1 : i32, i32, i32
  }
}

</mosaic_0001>

<bundles_post_ra>
// kernel: tpu_custom_call.1
= control target key start
LH: loop header
LB: loop body
LE: loop exit
PB: predicated region body
PF: predicated region fallthrough
CT: control target
= control target key end

     0   :  { %7 = vsyncpa [#allocation3], 0  ;;  %s5876_s0 = inlined_call_operand.vmem [shape: f32[1,2,256], index: 0, kind: input, shape index: {}]   ;;  %s5877_s1 = inlined_call_operand.vmem [shape: f32[64,2], index: 1, kind: input, shape index: {}]   ;;  %s5878_s2 = inlined_call_operand.hbm [shape: f32[2,128,256], index: 2, kind: output, shape index: {}]  }
   0x1   :  { %9 = vsyncpa [#allocation3 + $0x1], 0  ;;  %s4185_s9 = smov 0   ;;  %s4187_s10 = smov 0  }
   0x2   :  { %s4189_s11 = smov 0   ;;  %s4191_s12 = smov 0  }
   0x3   :  { %s4193_s13 = smov 0   ;;  %s4195_s14 = smov 0  }
   0x4   :  { %s4197_s15 = smov 0   ;;  %s4199_s16 = smov 0  }
   0x5 LB: > { %s3708_s17 = sadd.s32 4294967295, %s4156_s16   ;;  %s3709_s18 = sadd.s32 4294967294, %s4156_s16   ;;  %s4156_s16 = sphi %s4199_s16, %s15_s16   ;;  %s4152_s15 = sphi %s4197_s15, %s6127_s15   ;;  %s4148_s14 = sphi %s4195_s14, %s6126_s14   ;;  %s4144_s13 = sphi %s4193_s13, %s6125_s13   ;;  %s4140_s12 = sphi %s4191_s12, %s6124_s12   ;;  %s4136_s11 = sphi %s4189_s11, %s6123_s11   ;;  %s4132_s10 = sphi %s4187_s10, %s6122_s10   ;;  %s4128_s9 = sphi %s4185_s9, %s6121_s9  }
   0x6   : > { %s24_s19 = sadd.s32 1, %s4148_s14  ;;  %s27_s20 = sadd.s32 1, %s4152_s15 }
   0x7   : > { %p25_p0 = scmp.ge.s32.totalorder %s24_s19, 2  ;;  %p93_p1 = scmp.ne.s32.totalorder %s4136_s11, %s4132_s10 }
   0x8   : > { %p94_p2 = scmp.eq.s32.totalorder %s3708_s17, 3  ;;  %p99_p5 = scmp.ne.s32.totalorder %s4132_s10, %s4128_s9 }
   0x9   : > { %s6129_s19 = smov (%p25_p0, %s24_s19), 0  ;;  %s6131_s20 = smov (!%p25_p0, %s27_s20), %s4152_s15 }
   0xa   : > { %s79_s21 = ssub.s32 %s4148_s14, %s6129_s19  ;;  %p4236_p3 = por %p94_p2, %p93_p1 }
   0xb   : > { %p29_p4 = scmp.ge.s32.totalorder %s6131_s20, 2  ;;  %p100_p6 = scmp.eq.s32.totalorder %s3709_s18, 3 }
   0xc   : > { %p3712_p7 = scmp.ge.s32.totalorder %s4156_s16, 1  ;;  %p128_p9 = scmp.lt.s32.totalorder %s4156_s16, 5 }
   0xd   : > { %s6133_s20 = smov (%p29_p4, %s6131_s20), 0  ;;  %p4245_p8 = por %p100_p6, %p99_p5 }
   0xe   : > { %s78_s24 = ssub.s32 %s4152_s15, %s6133_s20  ;;  %s83_s25 = sadd.s32 1, %s4136_s11 }
   0xf   : > { %s80_s26 = sor.u32 %s79_s21, %s78_s24  ;;  %p129_p10 = pnand %p3712_p7, %p128_p9 }
  0x10   : > { %p81_p11 = scmp.eq.s32.totalorder %s80_s26, 0 }
  0x11   : > { %132 = sbr.rel (%p129_p10) target bundleno = 622 (0x26e), region = 28 }
  0x12   : > { %s4254_s27 = scalar_select %p81_p11, %s4136_s11, %s83_s25  }
  0x18   : > { %v155_v0 = vld [vmem:[%s5877_s1 + $0x10] sm:$0xff]  ;;  %v153_v1 = vld [vmem:[%s5877_s1] sm:$0xff]  ;;  %v4158_v2 = vmov 0   ;;  %v156_v3 = vld [vmem:[%s5877_s1 + $0x18] sm:$0xff]  ;;  %v4159_v11 = vmov 1   ;;  %p149_p12 = scmp.lt.s32.totalorder %s4140_s12, 1  ;;  %v162_v18 = vlaneseq }
  0x19   : > { %3995 = vset.pattern.permute.xlu1 %v4158_v2  ;;  %3994 = vset.pattern.permute.xlu0 %v4158_v2  ;;  %v154_v4 = vld [vmem:[%s5877_s1 + $0x8] sm:$0xff]  ;;  %v157_v6 = vld [vmem:[%s5877_s1 + $0x20] sm:$0xff]  ;;  %v160_v7 = vld [vmem:[%s5877_s1 + $0x38] sm:$0xff]  ;;  %vm226_vm0 = vcmp.eq.f32.partialorder %v153_v1, 0.0  ;;  %vm228_vm2 = vcmp.eq.f32.partialorder %v155_v0, 0.0  ;;  %vm229_vm3 = vcmp.eq.f32.partialorder %v156_v3, 0.0 }
  0x1a   : > { %178 = vperm.xlu1 %3995, %v155_v0   ;;  %168 = vperm.xlu0 %3994, %v153_v1   ;;  %v158_v5 = vld [vmem:[%s5877_s1 + $0x28] sm:$0xff]  ;;  %v159_v8 = vld [vmem:[%s5877_s1 + $0x30] sm:$0xff]  ;;  %vm227_vm1 = vcmp.eq.f32.partialorder %v154_v4, 0.0  ;;  %v1890_v10 = vsel %vm226_vm0, 1, %v4158_v2  ;;  %v1892_v12 = vsel %vm228_vm2, 1, %v4158_v2  ;;  %v1893_v13 = vsel %vm229_vm3, 1, %v4158_v2 }
  0x1b   : > { %v1891_v9 = vsel %vm227_vm1, 1, %v4158_v2  ;;  %vm230_vm4 = vcmp.eq.f32.partialorder %v157_v6, 0.0  ;;  %vm231_vm5 = vcmp.eq.f32.partialorder %v158_v5, 0.0  ;;  %vm232_vm6 = vcmp.eq.f32.partialorder %v159_v8, 0.0  ;;  %s150_s29 = scalar_select %p149_p12, %s4140_s12, 1 }
  0x1c   : > { %v1894_v14 = vsel %vm230_vm4, 1, %v4158_v2  ;;  %v1895_v15 = vsel %vm231_vm5, 1, %v4158_v2  ;;  %vm233_vm7 = vcmp.eq.f32.partialorder %v160_v7, 0.0  ;;  %v1896_v16 = vsel %vm232_vm6, 1, %v4158_v2  ;;  %s146_s6 = sand.u32 1, %s4132_s10   ;;  %s3844_s17 = sshll.u32 %s4144_s13, 5 }
  0x1d   : > { %v1897_v17 = vsel %vm233_vm7, 1, %v4158_v2  ;;  %s3714_s30 = sshll.u32 %s150_s29, 1  ;;  %v163_v19 = vshrl.u32 %v162_v18, 7  ;;  %v5884_v63 = vmov 683565275   ;;  %s3713_s7 = sshll.u32 %s146_s6, 7 }
  0x1e   : > { %183 = vperm.xlu1 %3995, %v156_v3   ;;  %173 = vperm.xlu0 %3994, %v154_v4   ;;  %s152_s5 = scalar_lea.vmem %s5876_s0, %s3714_s30  ;;  %v5882_v1 = vmov 2475754826   ;;  %v5886_v4 = vmov 2131351028   ;;  %s5463_s8 = scalar_lea.vmem [#allocation2], %s3713_s7 }
  0x1f   : > { %v164_v20 = vsub.s32 0, %v163_v19  ;;  %v216_v21 = vsub.s32 1, %v163_v19  ;;  %v161_v22 = vld [vmem:[%s152_s5] sm:$0x3]  ;;  %s3630_s18 = sadd.s32 %s4140_s12, %s3844_s17  ;;  %s3633_s13 = sshll.u32 %s5463_s8, 4  ;;  %s5812_s13 = int_to_ptr.vmem [resolvable:$true] %s3633_s13 }
  0x20   : > { %s3845_s21 = sshll.u32 %s3630_s18, 7  ;;  %s5824_s26 = scalar_lea.sflag [#allocation3], %s146_s6 }
  0x21   : > { %v4285_v23 = vrot.slane %v161_v22, %v164_v20  ;;  %v4287_v24 = vrot.slane %v161_v22, %v216_v21  ;;  %s5818_s25 = scalar_lea.hbm %s5878_s2, %s3845_s21  ;;  %s4062_s28 = scalar_lea.vmem %s5812_s13, 2048 }
  0x22   : > { %193 = vperm.xlu1 %3995, %v158_v5   ;;  %188 = vperm.xlu0 %3994, %v157_v6   ;;  %v5888_v6 = vmov 2102212464   ;;  %p4063_p13 = scmp.ne.s32.totalorder %s5812_s13, %s4062_s28  ;;  %s4166_s29 = smov [#allocation2]  }
  0x23   : > { %s4066_s30 = sshll.u32 %s4166_s29, 4  ;;  %s4067_s30 = int_to_ptr.vmem [resolvable:$false] %s4066_s30 }
  0x24   : > { %p4064_p0 = pnand %p4063_p13, %p4236_p3  ;;  %s4068_s3 = scalar_lea.vmem %s4067_s30, 4096 }
  0x25   : > { %p4069_p2 = scmp.lt.s32.totalorder %s5812_s13, %s4067_s30  ;;  %p4070_p4 = scmp.lt.s32.totalorder %s4068_s3, %s4062_s28 }
  0x26   : > { %203 = vperm.xlu1 %3995, %v160_v7   ;;  %198 = vperm.xlu0 %3994, %v159_v8   ;;  %v5902_v8 = vmov 920167782   ;;  %p4065_p1 = pneg %p4064_p0 }
  0x27   : > { %p4071_p5 = por %p4070_p4, %p4069_p2 }
  0x29   : > { %p4072_p6 = pnand %p4071_p5, %p4065_p1 }
  0x2a   : > { %3997 = vset.pattern.permute.xlu1 %v4159_v11  ;;  %3996 = vset.pattern.permute.xlu0 %v4159_v11 }
  0x2b   : > { %1902 = vperm.xlu1 %3997, %v1891_v9   ;;  %1899 = vperm.xlu0 %3996, %v1890_v10  }
  0x2f   : > { %1905 = vperm.xlu1 %3997, %v1892_v12   ;;  %1908 = vperm.xlu0 %3996, %v1893_v13  }
  0x33   : > { %1911 = vperm.xlu1 %3997, %v1894_v14   ;;  %1914 = vperm.xlu0 %3996, %v1895_v15   ;;  %v5892_v15 = vmov 1326507024  }
  0x37   : > { %1917 = vperm.xlu1 %3997, %v1896_v16   ;;  %1920 = vperm.xlu0 %3996, %v1897_v17  }
  0x99   : > { %v179_v25 = vpop.permute.xlu1 %178  ;;  %v169_v26 = vpop.permute.xlu0 %168 }
  0x9a   : > { %v4290_v27 = vmul.f32 %v179_v25, %v4285_v23  ;;  %v4293_v28 = vmul.f32 %v4287_v24, %v179_v25  ;;  %v4296_v29 = vmul.f32 %v169_v26, %v4285_v23  ;;  %v4308_v39 = vmul.f32 %v4287_v24, %v169_v26 }
  0x9c   : > { %5973 = vst [vmem:[#allocation5_spill] sm:$0xff] %v4290_v27  ;;  %5974 = vst [vmem:[#allocation6_spill] sm:$0xff] %v4293_v28  ;;  %v442_v30 = vand.u32 2147483647, %v4290_v27  ;;  %v445_v31 = vand.u32 2139095040, %v4290_v27  ;;  %v2149_v33 = vand.u32 2139095040, %v4293_v28 }
  0x9d   : > { %v2146_v32 = vand.u32 2147483647, %v4293_v28  ;;  %v237_v36 = vand.u32 2139095040, %v4296_v29  ;;  %v234_v40 = vand.u32 2147483647, %v4296_v29  ;;  %v1941_v50 = vand.u32 2139095040, %v4308_v39 }
  0x9e   : > { %v446_v34 = vshrl.u32 %v445_v31, 23  ;;  %v449_v35 = vand.u32 8388607, %v442_v30  ;;  %v2150_v37 = vshrl.u32 %v2149_v33, 23 }
  0x9f   : > { %v2153_v38 = vand.u32 8388607, %v2146_v32  ;;  %v238_v42 = vshrl.u32 %v237_v36, 23  ;;  %v4313_v49 = vand.u32 8388607, %v234_v40  ;;  %v4323_v61 = vshrl.u32 %v1941_v50, 23 }
  0xa0   : > { %v3723_v41 = vadd.s32 4294967169, %v446_v34  ;;  %v450_v43 = vor.u32 8388608, %v449_v35  ;;  %v3787_v44 = vadd.s32 4294967169, %v2150_v37 }
  0xa1   : > { %v2154_v45 = vor.u32 8388608, %v2153_v38  ;;  %v3715_v47 = vadd.s32 4294967169, %v238_v42  ;;  %v242_v60 = vor.u32 8388608, %v4313_v49 }
  0xa2   : > { %v452_v46 = vadd.s32 1, %v3723_v41  ;;  %v2156_v48 = vadd.s32 1, %v3787_v44  ;;  %v4316_v53 = vshll.u32 %v450_v43, 8 }
  0xa3   : > { %v244_v51 = vadd.s32 1, %v3715_v47  ;;  %v4318_v54 = vshll.u32 %v2154_v45, 8 }
  0xa4   : > { %vm453_vm8 = vcmp.gt.s32.totalorder %v452_v46, 0  ;;  %vm2157_vm9 = vcmp.gt.s32.totalorder %v2156_v48, 0 }
  0xa5   : > { %v454_v52 = vsel %vm453_vm8, %v452_v46, 0  ;;  %v2158_v57 = vsel %vm2157_vm9, %v2156_v48, 0  ;;  %vm245_vm10 = vcmp.gt.s32.totalorder %v244_v51, 0 }
  0xa6   : > { %v455_v55 = vshrl.u32 %v454_v52, 5  ;;  %v456_v56 = vand.u32 31, %v454_v52  ;;  %v4320_v58 = vshrl.u32 %v2158_v57, 5  ;;  %v2160_v59 = vand.u32 31, %v2158_v57 }
  0xa7   : > { %v4327_v3 = vsel %vm245_vm10, %v244_v51, 0 }
  0xa8   : > { %v457_v62 = vsub.s32 32, %v456_v56  ;;  %v459_v0 = vshll.u32 %v5884_v63, %v456_v56  ;;  %v462_v2 = vshll.u32 %v5882_v1, %v456_v56  ;;  %v465_v5 = vshll.u32 %v5886_v4, %v456_v56 }
  0xa9   : > { %v468_v7 = vshll.u32 %v5888_v6, %v456_v56  ;;  %v471_v9 = vshll.u32 %v5902_v8, %v456_v56  ;;  %vm474_vm11 = vcmp.lt.s32.totalorder %v455_v55, 1  ;;  %vm475_vm12 = vcmp.lt.s32.totalorder %v455_v55, 2 }
  0xaa   : > { %v460_v10 = vshrl.u32 %v5882_v1, %v457_v62  ;;  %v463_v11 = vshrl.u32 %v5886_v4, %v457_v62  ;;  %v466_v12 = vshrl.u32 %v5888_v6, %v457_v62  ;;  %v458_v13 = vshrl.u32 %v5884_v63, %v457_v62 }
  0xab   : > { %v469_v14 = vshrl.u32 %v5902_v8, %v457_v62  ;;  %v472_v16 = vshrl.u32 %v5892_v15, %v457_v62  ;;  %vm476_vm13 = vcmp.lt.s32.totalorder %v455_v55, 3  ;;  %v2161_v20 = vsub.s32 32, %v2160_v59 }
  0xac   : > { %v461_v17 = vor.u32 %v460_v10, %v459_v0  ;;  %v464_v18 = vor.u32 %v463_v11, %v462_v2  ;;  %v467_v19 = vor.u32 %v466_v12, %v465_v5  ;;  %vm477_vm14 = vcmp.lt.s32.totalorder %v455_v55, 4 }
  0xad   : > { %v470_v21 = vor.u32 %v469_v14, %v468_v7  ;;  %v473_v22 = vor.u32 %v472_v16, %v471_v9  ;;  %v2163_v25 = vshll.u32 %v5884_v63, %v2160_v59  ;;  %v2166_v38 = vshll.u32 %v5882_v1, %v2160_v59 }
  0xae   : > { %v478_v26 = vsel %vm474_vm11, %v458_v13, %v461_v17  ;;  %v479_v31 = vsel %vm477_vm14, %v467_v19, 2102212464  ;;  %v482_v33 = vsel %vm474_vm11, %v461_v17, %v464_v18  ;;  %v486_v34 = vsel %vm474_vm11, %v464_v18, %v467_v19 }
  0xaf   : > { %v480_v35 = vsel %vm476_vm13, %v464_v18, %v479_v31  ;;  %v483_v36 = vsel %vm477_vm14, %v470_v21, 920167782  ;;  %v487_v37 = vsel %vm477_vm14, %v473_v22, 1326507024  ;;  %v2162_v43 = vshrl.u32 %v5884_v63, %v2161_v20 }
  0xb0   : > { %v484_v41 = vsel %vm476_vm13, %v467_v19, %v483_v36  ;;  %v488_v42 = vsel %vm476_vm13, %v470_v21, %v487_v37  ;;  %v2164_v44 = vshrl.u32 %v5882_v1, %v2161_v20  ;;  %v481_v45 = vsel %vm475_vm12, %v478_v26, %v480_v35 }
  0xb1   : > { %v485_v46 = vsel %vm475_vm12, %v482_v33, %v484_v41  ;;  %v489_v47 = vsel %vm475_vm12, %v486_v34, %v488_v42  ;;  %v2167_v48 = vshrl.u32 %v5886_v4, %v2161_v20  ;;  %v2169_v0 = vshll.u32 %v5886_v4, %v2160_v59 }
  0xb2   : > { %v4353_v50 = vmul.u32.u64.low %v4316_v53, %v489_v47  ;;  %v4354_v51 = vmul.u32.u64.high %v4316_v53, %v489_v47, %v4353_v50  ;;  %v4357_v52 = vmul.u32.u64.low %v4316_v53, %v485_v46  ;;  %v4358_v56 = vmul.u32.u64.high %v4316_v53, %v485_v46, %v4357_v52 }
  0xb3   : > { %v2165_v57 = vor.u32 %v2164_v44, %v2163_v25  ;;  %v2168_v62 = vor.u32 %v2167_v48, %v2166_v38  ;;  %v2170_v2 = vshrl.u32 %v5888_v6, %v2161_v20  ;;  %v497_v55 = vmul.u32 %v4316_v53, %v481_v45 }
  0xb4   : > { %v2172_v5 = vshll.u32 %v5888_v6, %v2160_v59  ;;  %v2173_v7 = vshrl.u32 %v5902_v8, %v2161_v20  ;;  %v2176_v9 = vshrl.u32 %v5892_v15, %v2161_v20  ;;  %v2175_v11 = vshll.u32 %v5902_v8, %v2160_v59 }
  0xb5   : > { %v2171_v10 = vor.u32 %v2170_v2, %v2169_v0  ;;  %vm2178_vm15 = vcmp.lt.s32.totalorder %v4320_v58, 1  ;;  %vm2179_vm0 = vcmp.lt.s32.totalorder %v4320_v58, 2  ;;  %vm499_vm1 = vc.u32 %v4354_v51, %v4357_v52 }
  0xb6   : > { %v500_v12 = vadd.s32 1, %v4358_v56  ;;  %v2174_v13 = vor.u32 %v2173_v7, %v2172_v5  ;;  %vm2180_vm2 = vcmp.lt.s32.totalorder %v4320_v58, 3  ;;  %v2177_v53 = vor.u32 %v2176_v9, %v2175_v11 }
  0xb7   : > { %vm2181_vm3 = vcmp.lt.s32.totalorder %v4320_v58, 4  ;;  %v2182_v14 = vsel %vm2178_vm15, %v2162_v43, %v2165_v57  ;;  %v2186_v16 = vsel %vm2178_vm15, %v2165_v57, %v2168_v62  ;;  %v2190_v19 = vsel %vm2178_vm15, %v2168_v62, %v2171_v10 }
  0xb8   : > { %v501_v17 = vsel %vm499_vm1, %v500_v12, %v4358_v56  ;;  %v2183_v59 = vsel %vm2181_vm3, %v2171_v10, 2102212464  ;;  %v2187_v18 = vsel %vm2181_vm3, %v2174_v13, 920167782  ;;  %v2191_v25 = vsel %vm2181_vm3, %v2177_v53, 1326507024 }
  0xb9   : > { %v502_v20 = vadd.s32 %v501_v17, %v497_v55  ;;  %v2184_v21 = vsel %vm2180_vm2, %v2168_v62, %v2183_v59  ;;  %v2188_v22 = vsel %vm2180_vm2, %v2171_v10, %v2187_v18  ;;  %v2192_v33 = vsel %vm2180_vm2, %v2174_v13, %v2191_v25 }
  0xba   : > { %v2185_v26 = vsel %vm2179_vm0, %v2182_v14, %v2184_v21  ;;  %v2189_v31 = vsel %vm2179_vm0, %v2186_v16, %v2188_v22  ;;  %v4381_v34 = vshrl.u32 %v4327_v3, 5  ;;  %v2193_v36 = vsel %vm2179_vm0, %v2190_v19, %v2192_v33 }
  0xbb   : > { %v503_v35 = vadd.s32 536870912, %v502_v20  ;;  %v4386_v37 = vmul.u32.u64.low %v4318_v54, %v2189_v31  ;;  %v4387_v38 = vmul.u32.u64.high %v4318_v54, %v2189_v31, %v4386_v37  ;;  %v248_v43 = vand.u32 31, %v4327_v3 }
  0xbc   : > { %v4391_v41 = vmul.u32.u64.low %v4318_v54, %v2193_v36  ;;  %v4392_v42 = vmul.u32.u64.high %v4318_v54, %v2193_v36, %v4391_v41  ;;  %v4399_v45 = vshll.u32 %v242_v60, 8  ;;  %v1938_v58 = vand.u32 2147483647, %v4308_v39 }
  0xbd   : > { %v4395_v44 = vshrl.u32 %v503_v35, 30  ;;  %v3779_v46 = vadd.s32 4294967169, %v4323_v61  ;;  %v2201_v47 = vmul.u32 %v4318_v54, %v2185_v26  ;;  %v249_v48 = vsub.s32 32, %v248_v43 }
  0xbe   : > { %v251_v50 = vshll.u32 %v5884_v63, %v248_v43  ;;  %vm266_vm4 = vcmp.lt.s32.totalorder %v4381_v34, 1  ;;  %v2204_v3 = vadd.s32 1, %v4387_v38  ;;  %v254_v57 = vshll.u32 %v5882_v1, %v248_v43 }
  0xbf   : > { %5975 = vst [vmem:[#allocation7_spill] sm:$0xff] %v4395_v44  ;;  %v505_v56 = vshll.u32 %v4395_v44, 30  ;;  %v257_v49 = vshll.u32 %v5886_v4, %v248_v43  ;;  %vm2203_vm5 = vc.u32 %v4392_v42, %v4386_v37  ;;  %v252_v60 = vshrl.u32 %v5882_v1, %v249_v48 }
  0xc0   : > { %v260_v54 = vshll.u32 %v5888_v6, %v248_v43  ;;  %v263_v61 = vshll.u32 %v5902_v8, %v248_v43  ;;  %v2205_v0 = vsel %vm2203_vm5, %v2204_v3, %v4387_v38  ;;  %v255_v2 = vshrl.u32 %v5886_v4, %v249_v48 }
  0xc1   : > { %v4415_v62 = vsub.s32 %v502_v20, %v505_v56  ;;  %v258_v55 = vshrl.u32 %v5888_v6, %v249_v48  ;;  %v2206_v5 = vadd.s32 %v2205_v0, %v2201_v47  ;;  %v253_v7 = vor.u32 %v252_v60, %v251_v50 }
  0xc2   : > { %v261_v9 = vshrl.u32 %v5902_v8, %v249_v48  ;;  %v264_v10 = vshrl.u32 %v5892_v15, %v249_v48  ;;  %v256_v12 = vor.u32 %v255_v2, %v254_v57  ;;  %vm268_vm6 = vcmp.lt.s32.totalorder %v4381_v34, 3 }
  0xc3   : > { %v508_v11 = vsub.s32 0, %v4415_v62  ;;  %v259_v13 = vor.u32 %v258_v55, %v257_v49  ;;  %v2207_v53 = vadd.s32 536870912, %v2206_v5  ;;  %vm269_vm7 = vcmp.lt.s32.totalorder %v4381_v34, 4 }
  0xc4   : > { %v262_v14 = vor.u32 %v261_v9, %v260_v54  ;;  %v265_v16 = vor.u32 %v264_v10, %v263_v61  ;;  %v274_v18 = vsel %vm266_vm4, %v253_v7, %v256_v12  ;;  %v250_v21 = vshrl.u32 %v5884_v63, %v249_v48 }
  0xc5   : > { %v3724_v17 = vmin.u32 %v508_v11, %v4415_v62  ;;  %v271_v59 = vsel %vm269_vm7, %v259_v13, 2102212464  ;;  %v278_v19 = vsel %vm266_vm4, %v256_v12, %v259_v13  ;;  %v4430_v20 = vshrl.u32 %v2207_v53, 30 }
  0xc6   : > { %v275_v22 = vsel %vm269_vm7, %v262_v14, 920167782  ;;  %v279_v25 = vsel %vm269_vm7, %v265_v16, 1326507024  ;;  %vm267_vm8 = vcmp.lt.s32.totalorder %v4381_v34, 2  ;;  %v270_v36 = vsel %vm266_vm4, %v250_v21, %v253_v7 }
  0xc7   : > { %5976 = vst [vmem:[#allocation8_spill] sm:$0xff] %v4430_v20  ;;  %v510_v26 = vclz %v3724_v17  ;;  %v276_v31 = vsel %vm268_vm6, %v259_v13, %v275_v22  ;;  %v280_v33 = vsel %vm268_vm6, %v262_v14, %v279_v25  ;;  %v2209_v35 = vshll.u32 %v4430_v20, 30  ;;  %v4471_v14 = vpop.permute.xlu1 %183 }
  0xc8   : > { %v277_v38 = vsel %vm267_vm8, %v274_v18, %v276_v31  ;;  %v281_v41 = vsel %vm267_vm8, %v278_v19, %v280_v33  ;;  %v272_v47 = vsel %vm268_vm6, %v256_v12, %v271_v59  ;;  %v1948_v49 = vadd.s32 1, %v3779_v46 }
  0xc9   : > { %v3725_v43 = vadd.s32 4294967294, %v510_v26  ;;  %v4448_v48 = vmul.u32.u64.low %v4399_v45, %v281_v41  ;;  %v4449_v50 = vmul.u32.u64.high %v4399_v45, %v281_v41, %v4448_v48  ;;  %v4451_v56 = vsub.s32 %v2206_v5, %v2209_v35 }
  0xca   : > { %v4454_v3 = vmul.u32.u64.low %v4399_v45, %v277_v38  ;;  %v4455_v57 = vmul.u32.u64.high %v4399_v45, %v277_v38, %v4454_v3  ;;  %v1945_v60 = vand.u32 8388607, %v1938_v58  ;;  %v273_v0 = vsel %vm267_vm8, %v270_v36, %v272_v47 }
  0xcb   : > { %vm3726_vm9 = vcmp.lt.s32.totalorder %v3725_v43, 0  ;;  %v2212_v61 = vsub.s32 0, %v4451_v56  ;;  %vm1949_vm10 = vcmp.gt.s32.totalorder %v1948_v49, 0  ;;  %v289_v10 = vmul.u32 %v4399_v45, %v273_v0 }
  0xcc   : > { %v513_v54 = vsel %vm3726_vm9, 0, %v3725_v43  ;;  %vm291_vm11 = vc.u32 %v4449_v50, %v4454_v3  ;;  %v292_v46 = vadd.s32 1, %v4455_v57  ;;  %v1950_v7 = vsel %vm1949_vm10, %v1948_v49, 0 }
  0xcd   : > { %v514_v2 = vsub.s32 32, %v513_v54  ;;  %v518_v55 = vsub.s32 4294967266, %v513_v54  ;;  %v3788_v5 = vmin.u32 %v2212_v61, %v4451_v56  ;;  %v1946_v11 = vor.u32 8388608, %v1945_v60 }
  0xce   : > { %v1952_v12 = vand.u32 31, %v1950_v7  ;;  %v498_v34 = vadd.s32 %v4357_v52, %v4354_v51  ;;  %v293_v53 = vsel %vm291_vm11, %v292_v46, %v4455_v57  ;;  %v2202_v21 = vadd.s32 %v4386_v37, %v4392_v42 }
  0xcf   : > { %v519_v9 = vadd.s32 127, %v518_v55  ;;  %v2214_v13 = vclz %v3788_v5  ;;  %v294_v17 = vadd.s32 %v293_v53, %v289_v10  ;;  %v4475_v45 = vshll.u32 %v1946_v11, 8 }
  0xd0   : > { %v1953_v59 = vsub.s32 32, %v1952_v12  ;;  %v516_v18 = vshrl.u32 %v498_v34, %v514_v2  ;;  %v4479_v25 = vmul.f32 %v4471_v14, %v4285_v23  ;;  %v515_v51 = vshll.u32 %v4415_v62, %v513_v54 }
  0xd1   : > { %v520_v16 = vshll.u32 %v519_v9, 23  ;;  %v3789_v19 = vadd.s32 4294967294, %v2214_v13  ;;  %v295_v22 = vadd.s32 536870912, %v294_v17  ;;  %v1951_v26 = vshrl.u32 %v1950_v7, 5 }
  0xd2   : > { %5977 = vst [vmem:[#allocation9_spill] sm:$0xff] %v4479_v25  ;;  %v1956_v35 = vshrl.u32 %v5882_v1, %v1953_v59  ;;  %v1962_v36 = vshrl.u32 %v5888_v6, %v1953_v59  ;;  %v517_v37 = vor.u32 %v516_v18, %v515_v51  ;;  %v1959_v41 = vshrl.u32 %v5886_v4, %v1953_v59 }
  0xd3   : > { %v521_v52 = vor.u32 4788187, %v520_v16  ;;  %vm3790_vm12 = vcmp.lt.s32.totalorder %v3789_v19, 0  ;;  %v4482_v33 = vshrl.u32 %v295_v22, 30  ;;  %v1955_v47 = vshll.u32 %v5884_v63, %v1952_v12 }
  0xd4   : > { %v2217_v31 = vsel %vm3790_vm12, 0, %v3789_v19  ;;  %v1958_v62 = vshll.u32 %v5882_v1, %v1952_v12  ;;  %v1961_v48 = vshll.u32 %v5886_v4, %v1952_v12  ;;  %v1964_v60 = vshll.u32 %v5888_v6, %v1952_v12 }
  0xd5   : > { %v2218_v42 = vsub.s32 32, %v2217_v31  ;;  %v2222_v38 = vsub.s32 4294967266, %v2217_v31  ;;  %v297_v43 = vshll.u32 %v4482_v33, 30  ;;  %v522_v57 = vand.u32 2147483647, %v521_v52 }
  0xd6   : > { %v1965_v54 = vshrl.u32 %v5902_v8, %v1953_v59  ;;  %v1957_v0 = vor.u32 %v1956_v35, %v1955_v47  ;;  %v1963_v2 = vor.u32 %v1962_v36, %v1961_v48  ;;  %v1968_v55 = vshrl.u32 %v5892_v15, %v1953_v59 }
  0xd7   : > { %v2223_v49 = vadd.s32 127, %v2222_v38  ;;  %v4493_v61 = vsub.s32 %v294_v17, %v297_v43  ;;  %v2220_v5 = vshrl.u32 %v2202_v21, %v2218_v42  ;;  %v1960_v7 = vor.u32 %v1959_v41, %v1958_v62 }
  0xd8   : > { %v1967_v9 = vshll.u32 %v5902_v8, %v1952_v12  ;;  %v524_v10 = vcvt.s32.f32 %v517_v37  ;;  %v1966_v34 = vor.u32 %v1965_v54, %v1964_v60  ;;  %v549_v13 = vand.u32 2139095040, %v4479_v25 }
  0xd9   : > { %v2224_v46 = vshll.u32 %v2223_v49, 23  ;;  %v300_v11 = vsub.s32 0, %v4493_v61  ;;  %v2219_v53 = vshll.u32 %v4451_v56, %v2217_v31  ;;  %v1954_v16 = vshrl.u32 %v5884_v63, %v1953_v59 }
  0xda   : > { %v1969_v17 = vor.u32 %v1968_v55, %v1967_v9  ;;  %vm1973_vm13 = vcmp.lt.s32.totalorder %v1951_v26, 4  ;;  %v525_v18 = vmul.f32 %v524_v10, %v522_v57  ;;  %vm1970_vm14 = vcmp.lt.s32.totalorder %v1951_v26, 1 }
  0xdb   : > { %v3716_v19 = vmin.u32 %v300_v11, %v4493_v61  ;;  %v1975_v21 = vsel %vm1973_vm13, %v1963_v2, 2102212464  ;;  %v2221_v22 = vor.u32 %v2220_v5, %v2219_v53  ;;  %v2225_v12 = vor.u32 4788187, %v2224_v46 }
  0xdc   : > { %vm1971_vm15 = vcmp.lt.s32.totalorder %v1951_v26, 2  ;;  %v1978_v51 = vsel %vm1970_vm14, %v1957_v0, %v1960_v7  ;;  %vm1972_vm0 = vcmp.lt.s32.totalorder %v1951_v26, 3  ;;  %v1979_v35 = vsel %vm1973_vm13, %v1966_v34, 920167782 }
  0xdd   : > { %v302_v52 = vclz %v3716_v19  ;;  %v1982_v36 = vsel %vm1970_vm14, %v1960_v7, %v1963_v2  ;;  %v1974_v56 = vsel %vm1970_vm14, %v1954_v16, %v1957_v0  ;;  %v1976_v31 = vsel %vm1972_vm0, %v1960_v7, %v1975_v21 }
  0xde   : > { %v1980_v59 = vsel %vm1972_vm0, %v1963_v2, %v1979_v35  ;;  %v1983_v37 = vsel %vm1973_vm13, %v1969_v17, 1326507024  ;;  %v550_v43 = vshrl.u32 %v549_v13, 23  ;;  %v2226_v47 = vand.u32 2147483647, %v2225_v12 }
  0xdf   : > { %v3717_v42 = vadd.s32 4294967294, %v302_v52  ;;  %v1981_v38 = vsel %vm1971_vm15, %v1978_v51, %v1980_v59  ;;  %v1984_v41 = vsel %vm1972_vm0, %v1966_v34, %v1983_v37  ;;  %v1977_v2 = vsel %vm1971_vm15, %v1974_v56, %v1976_v31 }
  0xe0   : > { %v1985_v62 = vsel %vm1971_vm15, %v1982_v36, %v1984_v41  ;;  %v4508_v48 = vmul.u32.u64.low %v4475_v45, %v1981_v38  ;;  %v4509_v57 = vmul.u32.u64.high %v4475_v45, %v1981_v38, %v4508_v48  ;;  %v3727_v54 = vadd.s32 4294967169, %v550_v43 }
  0xe1   : > { %vm3718_vm1 = vcmp.lt.s32.totalorder %v3717_v42, 0  ;;  %v4513_v49 = vmul.u32.u64.low %v4475_v45, %v1985_v62  ;;  %v4514_v60 = vmul.u32.u64.high %v4475_v45, %v1985_v62, %v4513_v49  ;;  %v546_v55 = vand.u32 2147483647, %v4479_v25 }
  0xe2   : > { %v305_v0 = vsel %vm3718_vm1, 0, %v3717_v42  ;;  %v2228_v5 = vcvt.s32.f32 %v2221_v22  ;;  %v290_v9 = vadd.s32 %v4454_v3, %v4449_v50  ;;  %v1996_v10 = vadd.s32 1, %v4509_v57 }
  0xe3   : > { %v306_v46 = vsub.s32 32, %v305_v0  ;;  %v310_v7 = vsub.s32 4294967266, %v305_v0  ;;  %v556_v11 = vadd.s32 1, %v3727_v54  ;;  %v526_v34 = vxor.u32 2147483648, %v525_v18 }
  0xe4   : > { %v4521_v13 = vmul.f32 %v2228_v5, %v2226_v47  ;;  %v1993_v53 = vmul.u32 %v4475_v45, %v1977_v2  ;;  %v4526_v26 = vmul.f32 %v4287_v24, %v4471_v14  ;;  %vm1995_vm2 = vc.u32 %v4514_v60, %v4508_v48 }
  0xe5   : > { %v308_v16 = vshrl.u32 %v290_v9, %v306_v46  ;;  %v553_v17 = vand.u32 8388607, %v546_v55  ;;  %vm557_vm3 = vcmp.gt.s32.totalorder %v556_v11, 0  ;;  %v311_v50 = vadd.s32 127, %v310_v7 }
  0xe6   : > { %5978 = vst [vmem:[#allocation10_spill] sm:$0xff] %v4526_v26  ;;  %v1997_v3 = vsel %vm1995_vm2, %v1996_v10, %v4509_v57  ;;  %v558_v19 = vsel %vm557_vm3, %v556_v11, 0  ;;  %vm5915_vm4 = vcmp.lt.s32.totalorder %v4290_v27, 0  ;;  %v307_v45 = vshll.u32 %v4493_v61, %v305_v0 }
  0xe7   : > { %v1998_v21 = vadd.s32 %v1997_v3, %v1993_v53  ;;  %v560_v22 = vand.u32 31, %v558_v19  ;;  %v527_v14 = vsel %vm5915_vm4, %v526_v34, %v525_v18  ;;  %v2230_v12 = vxor.u32 2147483648, %v4521_v13 }
  0xe8   : > { %v5880_v51 = vand.u32 2147483647, %v4526_v26  ;;  %v309_v52 = vor.u32 %v308_v16, %v307_v45  ;;  %v554_v36 = vor.u32 8388608, %v553_v17  ;;  %v312_v31 = vshll.u32 %v311_v50, 23 }
  0xe9   : > { %v1999_v35 = vadd.s32 536870912, %v1998_v21  ;;  %v561_v56 = vsub.s32 32, %v560_v22  ;;  %v559_v59 = vshrl.u32 %v558_v19, 5  ;;  %v563_v37 = vshll.u32 %v5884_v63, %v560_v22 }
  0xea   : > { %v566_v42 = vshll.u32 %v5882_v1, %v560_v22  ;;  %v569_v41 = vshll.u32 %v5886_v4, %v560_v22  ;;  %vm4548_vm5 = vcmp.le.f32.partialorder %v442_v30, 0.7853982  ;;  %v5979_v43 = vmov 0 }
  0xeb   : > { %v4541_v61 = vshrl.u32 %v1999_v35, 30  ;;  %v564_v38 = vshrl.u32 %v5882_v1, %v561_v56  ;;  %v567_v18 = vshrl.u32 %v5886_v4, %v561_v56  ;;  %v5980_v43 = vsel %vm4548_vm5, 4294967295, %v5979_v43 }
  0xec   : > { %5981 = vst [vmem:[#allocation11_spill] sm:$0xff] %v5980_v43  ;;  %v570_v47 = vshrl.u32 %v5888_v6, %v561_v56  ;;  %v572_v62 = vshll.u32 %v5888_v6, %v560_v22  ;;  %v573_v57 = vshrl.u32 %v5902_v8, %v561_v56  ;;  %v576_v49 = vshrl.u32 %v5892_v15, %v561_v56 }
  0xed   : > { %vm5914_vm6 = vcmp.lt.s32.totalorder %v4293_v28, 0  ;;  %v2001_v54 = vshll.u32 %v4541_v61, 30  ;;  %v565_v0 = vor.u32 %v564_v38, %v563_v37  ;;  %v568_v2 = vor.u32 %v567_v18, %v566_v42 }
  0xee   : > { %v575_v5 = vshll.u32 %v5902_v8, %v560_v22  ;;  %v313_v30 = vor.u32 4788187, %v312_v31  ;;  %v571_v46 = vor.u32 %v570_v47, %v569_v41  ;;  %v574_v7 = vor.u32 %v573_v57, %v572_v62  ;;  %v174_v57 = vpop.permute.xlu0 %173 }
  0xef   : > { %v594_v9 = vshll.u32 %v554_v36, 8  ;;  %v316_v10 = vcvt.s32.f32 %v309_v52  ;;  %v4559_v11 = vsub.s32 %v1998_v21, %v2001_v54  ;;  %vm578_vm7 = vcmp.lt.s32.totalorder %v559_v59, 1 }
  0xf0   : > { %v577_v34 = vor.u32 %v576_v49, %v575_v5  ;;  %v562_v53 = vshrl.u32 %v5884_v63, %v561_v56  ;;  %vm581_vm8 = vcmp.lt.s32.totalorder %v559_v59, 4  ;;  %v586_v16 = vsel %vm578_vm7, %v565_v0, %v568_v2 }
  0xf1   : > { %v2253_v17 = vand.u32 2139095040, %v4526_v26  ;;  %v2004_v50 = vsub.s32 0, %v4559_v11  ;;  %vm580_vm9 = vcmp.lt.s32.totalorder %v559_v59, 3  ;;  %v583_v3 = vsel %vm581_vm8, %v571_v46, 2102212464 }
  0xf2   : > { %v587_v19 = vsel %vm581_vm8, %v574_v7, 920167782  ;;  %v314_v45 = vand.u32 2147483647, %v313_v30  ;;  %vm579_vm10 = vcmp.lt.s32.totalorder %v559_v59, 2  ;;  %v590_v35 = vsel %vm578_vm7, %v568_v2, %v571_v46 }
  0xf3   : > { %v588_v22 = vsel %vm580_vm9, %v571_v46, %v587_v19  ;;  %v3780_v21 = vmin.u32 %v2004_v50, %v4559_v11  ;;  %v582_v52 = vsel %vm578_vm7, %v562_v53, %v565_v0  ;;  %v591_v31 = vsel %vm581_vm8, %v577_v34, 1326507024 }
  0xf4   : > { %v589_v36 = vsel %vm579_vm10, %v586_v16, %v588_v22  ;;  %v584_v56 = vsel %vm580_vm9, %v568_v2, %v583_v3  ;;  %v592_v37 = vsel %vm580_vm9, %v574_v7, %v591_v31  ;;  %v530_v18 = vsel %vm4548_vm5, %v4290_v27, %v527_v14 }
  0xf5   : > { %v4566_v42 = vmul.u32.u64.low %v594_v9, %v589_v36  ;;  %v4567_v38 = vmul.u32.u64.high %v594_v9, %v589_v36, %v4566_v42  ;;  %vm5938_vm11 = vcmp.lt.s32.totalorder %v4296_v29, 0  ;;  %v2006_v41 = vclz %v3780_v21 }
  0xf6   : > { %v593_v47 = vsel %vm579_vm10, %v590_v35, %v592_v37  ;;  %v2254_v62 = vshrl.u32 %v2253_v17, 23  ;;  %v2231_v49 = vsel %vm5914_vm6, %v2230_v12, %v4521_v13  ;;  %v317_v54 = vmul.f32 %v316_v10, %v314_v45 }
  0xf7   : > { %v4578_v0 = vmul.u32.u64.low %v594_v9, %v593_v47  ;;  %v4579_v2 = vmul.u32.u64.high %v594_v9, %v593_v47, %v4578_v0  ;;  %v3781_v5 = vadd.s32 4294967294, %v2006_v41  ;;  %v585_v30 = vsel %vm579_vm10, %v582_v52, %v584_v56 }
  0xf8   : > { %v3791_v46 = vadd.s32 4294967169, %v2254_v62  ;;  %v2257_v14 = vand.u32 8388607, %v5880_v51  ;;  %3998 = vcosq.f32 %v530_v18  ;;  %vm4586_vm12 = vcmp.le.f32.partialorder %v2146_v32, 0.7853982 }
  0xf9   : > { %v5982_v7 = vmov 0  ;;  %v604_v13 = vadd.s32 1, %v4567_v38  ;;  %v4592_v12 = vmul.f32 %v174_v57, %v4285_v23  ;;  %v4597_v59 = vsel %vm4586_vm12, %v4293_v28, %v2231_v49 }
  0xfa   : > { %v5983_v7 = vsel %vm4586_vm12, 4294967295, %v5982_v7  ;;  %v1994_v10 = vadd.s32 %v4508_v48, %v4514_v60  ;;  %vm3782_vm13 = vcmp.lt.s32.totalorder %v3781_v5, 0  ;;  %v2260_v34 = vadd.s32 1, %v3791_v46 }
  0xfb   : > { %5984 = vst [vmem:[#allocation12_spill] sm:$0xff] %v5983_v7  ;;  %v318_v53 = vxor.u32 2147483648, %v317_v54  ;;  %v2009_v32 = vsel %vm3782_vm13, 0, %v3781_v5  ;;  %v601_v16 = vmul.u32 %v594_v9, %v585_v30  ;;  %vm603_vm14 = vc.u32 %v4579_v2, %v4566_v42 }
  0xfc   : > { %v2010_v17 = vsub.s32 32, %v2009_v32  ;;  %v2014_v50 = vsub.s32 4294967266, %v2009_v32  ;;  %v605_v3 = vsel %vm603_vm14, %v604_v13, %v4567_v38  ;;  %v2258_v19 = vor.u32 8388608, %v2257_v14 }
  0xfd   : > { %4000 = vsinq.f32 %v530_v18  ;;  %v606_v45 = vadd.s32 %v605_v3, %v601_v16  ;;  %vm2261_vm15 = vcmp.gt.s32.totalorder %v2260_v34, 0  ;;  %v341_v22 = vand.u32 2139095040, %v4592_v12 }
  0xfe   : > { %4002 = vcosq.f32 %v4597_v59  ;;  %v2012_v48 = vshrl.u32 %v1994_v10, %v2010_v17  ;;  %v2015_v60 = vadd.s32 127, %v2014_v50  ;;  %v2262_v35 = vsel %vm2261_vm15, %v2260_v34, 0 }
  0xff   : > { %v4608_v9 = vsel %vm5938_vm11, %v318_v53, %v317_v54  ;;  %v607_v21 = vadd.s32 536870912, %v606_v45  ;;  %v2264_v52 = vand.u32 31, %v2262_v35  ;;  %v4611_v36 = vmul.f32 %v4287_v24, %v174_v57 }
 0x100   : > { %v2011_v31 = vshll.u32 %v4559_v11, %v2009_v32  ;;  %v2016_v56 = vshll.u32 %v2015_v60, 23  ;;  %v4614_v37 = vshll.u32 %v2258_v19, 8  ;;  %v5879_v38 = vand.u32 2147483647, %v4592_v12 }
 0x101   : > { %v4617_v18 = vshrl.u32 %v607_v21, 30  ;;  %v2263_v41 = vshrl.u32 %v2262_v35, 5  ;;  %v2265_v47 = vsub.s32 32, %v2264_v52  ;;  %v342_v62 = vshrl.u32 %v341_v22, 23 }
 0x102   : > { %v2013_v49 = vor.u32 %v2012_v48, %v2011_v31  ;;  %v2017_v54 = vor.u32 4788187, %v2016_v56  ;;  %v2267_v0 = vshll.u32 %v5884_v63, %v2264_v52  ;;  %v2270_v5 = vshll.u32 %v5882_v1, %v2264_v52  ;;  %v4621_v57 = vpop.eup %3998 }
 0x103   : > { %5985 = vst [vmem:[#allocation13_spill] sm:$0xff] %v4617_v18  ;;  %5986 = vst [vmem:[#allocation14_spill] sm:$0xff] %v4621_v57  ;;  %v609_v11 = vshll.u32 %v4617_v18, 30  ;;  %v2268_v30 = vshrl.u32 %v5882_v1, %v2265_v47  ;;  %v2271_v46 = vshrl.u32 %v5886_v4, %v2265_v47  ;;  %v2273_v14 = vshll.u32 %v5886_v4, %v2264_v52 }
 0x104   : > { %v2274_v13 = vshrl.u32 %v5888_v6, %v2265_v47  ;;  %v2276_v10 = vshll.u32 %v5888_v6, %v2264_v52  ;;  %v2277_v34 = vshrl.u32 %v5902_v8, %v2265_v47  ;;  %v2279_v53 = vshll.u32 %v5902_v8, %v2264_v52 }
 0x105   : > { %v4631_v32 = vsub.s32 %v606_v45, %v609_v11  ;;  %v2269_v16 = vor.u32 %v2268_v30, %v2267_v0  ;;  %v2272_v17 = vor.u32 %v2271_v46, %v2270_v5  ;;  %v2280_v50 = vshrl.u32 %v5892_v15, %v2265_v47 }
 0x106   : > { %vm4636_vm0 = vcmp.le.f32.partialorder %v234_v40, 0.7853982  ;;  %v2275_v19 = vor.u32 %v2274_v13, %v2273_v14  ;;  %v2278_v22 = vor.u32 %v2277_v34, %v2276_v10  ;;  %v3719_v48 = vadd.s32 4294967169, %v342_v62 }
 0x107   : > { %v345_v60 = vand.u32 8388607, %v5879_v38  ;;  %v4642_v35 = vpop.eup %4000  ;;  %v2020_v45 = vcvt.s32.f32 %v2013_v49  ;;  %v612_v21 = vsub.s32 0, %v4631_v32  ;;  %v2281_v52 = vor.u32 %v2280_v50, %v2279_v53 }
 0x108   : > { %5989 = vst [vmem:[#allocation15_spill] sm:$0xff] %v4642_v35  ;;  %vm2282_vm1 = vcmp.lt.s32.totalorder %v2263_v41, 1  ;;  %v4645_v31 = vpop.eup %4002  ;;  %v2018_v56 = vand.u32 2147483647, %v2017_v54  ;;  %v2266_v40 = vshrl.u32 %v5884_v63, %v2265_v47  ;;  %vm2285_vm2 = vcmp.lt.s32.totalorder %v2263_v41, 4 }
 0x109   : > { %5990 = vst [vmem:[#allocation16_spill] sm:$0xff] %v4645_v31  ;;  %v2290_v0 = vsel %vm2282_vm1, %v2269_v16, %v2272_v17  ;;  %v3728_v5 = vmin.u32 %v612_v21, %v4631_v32  ;;  %vm2284_vm3 = vcmp.lt.s32.totalorder %v2263_v41, 3  ;;  %v2287_v62 = vsel %vm2285_vm2, %v2275_v19, 2102212464 }
 0x10a   : > { %v2291_v11 = vsel %vm2285_vm2, %v2278_v22, 920167782  ;;  %vm2283_vm7 = vcmp.lt.s32.totalorder %v2263_v41, 2  ;;  %v2294_v46 = vsel %vm2282_vm1, %v2272_v17, %v2275_v19  ;;  %v2295_v49 = vsel %vm2285_vm2, %v2281_v52, 1326507024 }
 0x10b   : > { %v2292_v30 = vsel %vm2284_vm3, %v2275_v19, %v2291_v11  ;;  %v614_v14 = vclz %v3728_v5  ;;  %v2286_v13 = vsel %vm2282_vm1, %v2266_v40, %v2269_v16  ;;  %v2288_v10 = vsel %vm2284_vm3, %v2272_v17, %v2287_v62 }
 0x10c   : > { %v2293_v34 = vsel %vm2283_vm7, %v2290_v0, %v2292_v30  ;;  %v4649_v53 = vmul.f32 %v2020_v45, %v2018_v56  ;;  %v2296_v54 = vsel %vm2284_vm3, %v2278_v22, %v2295_v49  ;;  %v346_v51 = vor.u32 8388608, %v345_v60 }
 0x10d   : > { %v4652_v47 = vmul.u32.u64.low %v4614_v37, %v2293_v34  ;;  %v4653_v50 = vmul.u32.u64.high %v4614_v37, %v2293_v34, %v4652_v47  ;;  %v3729_v21 = vadd.s32 4294967294, %v614_v14  ;;  %v2297_v38 = vsel %vm2283_vm7, %v2294_v46, %v2296_v54 }
 0x10e   : > { %v2045_v41 = vand.u32 2139095040, %v4611_v36  ;;  %v2289_v11 = vsel %vm2283_vm7, %v2286_v13, %v2288_v10  ;;  %v4658_v19 = vmul.u32.u64.low %v4614_v37, %v2297_v38  ;;  %v4659_v52 = vmul.u32.u64.high %v4614_v37, %v2297_v38, %v4658_v19 }
 0x10f   : > { %v348_v16 = vadd.s32 1, %v3719_v48  ;;  %v4665_v17 = vsel %vm4636_vm0, %v4296_v29, %v4608_v9  ;;  %v602_v22 = vadd.s32 %v4566_v42, %v4579_v2  ;;  %vm3730_vm8 = vcmp.lt.s32.totalorder %v3729_v21, 0 }
 0x110   : > { %v5881_v60 = vand.u32 2147483647, %v4611_v36  ;;  %v2022_v45 = vxor.u32 2147483648, %v4649_v53  ;;  %v617_v56 = vsel %vm3730_vm8, 0, %v3729_v21  ;;  %v2308_v40 = vadd.s32 1, %v4653_v50 }
 0x111   : > { %vm349_vm9 = vcmp.gt.s32.totalorder %v348_v16, 0  ;;  %v618_v38 = vsub.s32 32, %v617_v56  ;;  %v622_v48 = vsub.s32 4294967266, %v617_v56  ;;  %v2305_v0 = vmul.u32 %v4614_v37, %v2289_v11 }
 0x112   : > { %v350_v5 = vsel %vm349_vm9, %v348_v16, 0  ;;  %vm2307_vm10 = vc.u32 %v4659_v52, %v4652_v47  ;;  %v4675_v62 = vshll.u32 %v346_v51, 8  ;;  %v2046_v42 = vshrl.u32 %v2045_v41, 23 }
 0x113   : > { %v352_v9 = vand.u32 31, %v350_v5  ;;  %v619_v2 = vshll.u32 %v4631_v32, %v617_v56  ;;  %v620_v30 = vshrl.u32 %v602_v22, %v618_v38  ;;  %v623_v46 = vadd.s32 127, %v622_v48 }
 0x114   : > { %v2309_v49 = vsel %vm2307_vm10, %v2308_v40, %v4653_v50  ;;  %v351_v13 = vshrl.u32 %v350_v5, 5  ;;  %v4681_v37 = vand.u32 8388607, %v5881_v60  ;;  %vm5931_vm13 = vcmp.lt.s32.totalorder %v4308_v39, 0 }
 0x115   : > { %v2310_v14 = vadd.s32 %v2309_v49, %v2305_v0  ;;  %v353_v10 = vsub.s32 32, %v352_v9  ;;  %v621_v34 = vor.u32 %v620_v30, %v619_v2  ;;  %v624_v54 = vshll.u32 %v623_v46, 23 }
 0x116   : > { %v355_v21 = vshll.u32 %v5884_v63, %v352_v9  ;;  %v358_v51 = vshll.u32 %v5882_v1, %v352_v9  ;;  %v361_v50 = vshll.u32 %v5886_v4, %v352_v9  ;;  %v364_v22 = vshll.u32 %v5888_v6, %v352_v9 }
 0x117   : > { %v2311_v41 = vadd.s32 536870912, %v2310_v14  ;;  %v356_v32 = vshrl.u32 %v5882_v1, %v353_v10  ;;  %v359_v11 = vshrl.u32 %v5886_v4, %v353_v10  ;;  %v625_v19 = vor.u32 4788187, %v624_v54 }
 0x118   : > { %v362_v16 = vshrl.u32 %v5888_v6, %v353_v10  ;;  %v365_v56 = vshrl.u32 %v5902_v8, %v353_v10  ;;  %v367_v0 = vshll.u32 %v5902_v8, %v352_v9  ;;  %v368_v46 = vshrl.u32 %v5892_v15, %v353_v10 }
 0x119   : > { %v4692_v40 = vshrl.u32 %v2311_v41, 30  ;;  %v357_v38 = vor.u32 %v356_v32, %v355_v21  ;;  %v360_v48 = vor.u32 %v359_v11, %v358_v51  ;;  %v626_v5 = vand.u32 2147483647, %v625_v19 }
 0x11a   : > { %v363_v2 = vor.u32 %v362_v16, %v361_v50  ;;  %v366_v30 = vor.u32 %v365_v56, %v364_v22  ;;  %vm4698_vm14 = vcmp.le.f32.partialorder %v1938_v58, 0.7853982  ;;  %v5992_v49 = vmov 0 }
 0x11b   : > { %5991 = vst [vmem:[#allocation17_spill] sm:$0xff] %v4692_v40  ;;  %v5993_v49 = vsel %vm4698_vm14, 4294967295, %v5992_v49  ;;  %v628_v54 = vcvt.s32.f32 %v621_v34  ;;  %v2313_v60 = vshll.u32 %v4692_v40, 30  ;;  %v354_v41 = vshrl.u32 %v5884_v63, %v353_v10  ;;  %v194_v34 = vpop.permute.xlu1 %193 }
 0x11c   : > { %5994 = vst [vmem:[#allocation18_spill] sm:$0xff] %v5993_v49  ;;  %v3783_v21 = vadd.s32 4294967169, %v2046_v42  ;;  %v369_v51 = vor.u32 %v368_v46, %v367_v0  ;;  %vm370_vm15 = vcmp.lt.s32.totalorder %v351_v13, 1  ;;  %vm372_vm1 = vcmp.lt.s32.totalorder %v351_v13, 3 }
 0x11d   : > { %vm373_vm2 = vcmp.lt.s32.totalorder %v351_v13, 4  ;;  %v4704_v9 = vsub.s32 %v2310_v14, %v2313_v60  ;;  %v378_v11 = vsel %vm370_vm15, %v357_v38, %v360_v48  ;;  %v629_v19 = vmul.f32 %v628_v54, %v626_v5 }
 0x11e   : > { %v375_v32 = vsel %vm373_vm2, %v363_v2, 2102212464  ;;  %v379_v50 = vsel %vm373_vm2, %v366_v30, 920167782  ;;  %vm371_vm3 = vcmp.lt.s32.totalorder %v351_v13, 2  ;;  %v382_v16 = vsel %vm370_vm15, %v360_v48, %v363_v2 }
 0x11f   : > { %v380_v58 = vsel %vm372_vm1, %v363_v2, %v379_v50  ;;  %v2316_v22 = vsub.s32 0, %v4704_v9  ;;  %v374_v56 = vsel %vm370_vm15, %v354_v41, %v357_v38  ;;  %v383_v10 = vsel %vm373_vm2, %v369_v51, 1326507024 }
 0x120   : > { %v381_v42 = vsel %vm371_vm3, %v378_v11, %v380_v58  ;;  %v376_v0 = vsel %vm372_vm1, %v360_v48, %v375_v32  ;;  %v384_v60 = vsel %vm372_vm1, %v366_v30, %v383_v10  ;;  %v2023_v5 = vsel %vm5931_vm13, %v2022_v45, %v4649_v53 }
 0x121   : > { %v4712_v14 = vmul.u32.u64.low %v4675_v62, %v381_v42  ;;  %v4713_v46 = vmul.u32.u64.high %v4675_v62, %v381_v42, %v4712_v14  ;;  %v3792_v38 = vmin.u32 %v2316_v22, %v4704_v9  ;;  %v385_v2 = vsel %vm371_vm3, %v382_v16, %v384_v60 }
 0x122   : > { %v4724_v54 = vmul.f32 %v194_v34, %v4285_v23  ;;  %4004 = vsinq.f32 %v4597_v59  ;;  %vm5913_vm7 = vcmp.lt.s32.totalorder %v4479_v25, 0  ;;  %v377_v53 = vsel %vm371_vm3, %v374_v56, %v376_v0 }
 0x123   : > { %v4729_v48 = vmul.u32.u64.low %v4675_v62, %v385_v2  ;;  %v4730_v30 = vmul.u32.u64.high %v4675_v62, %v385_v2, %v4729_v48  ;;  %4006 = vcosq.f32 %v4665_v17  ;;  %v2318_v41 = vclz %v3792_v38 }
 0x124   : > { %5995 = vst [vmem:[#allocation19_spill] sm:$0xff] %v4724_v54  ;;  %v2052_v45 = vadd.s32 1, %v3783_v21  ;;  %v4737_v51 = vsel %vm4698_vm14, %v4308_v39, %v2023_v5  ;;  %v630_v32 = vxor.u32 2147483648, %v629_v19  ;;  %v396_v59 = vadd.s32 1, %v4713_v46 }
 0x125   : > { %v2050_v11 = vor.u32 8388608, %v4681_v37  ;;  %v3793_v50 = vadd.s32 4294967294, %v2318_v41  ;;  %v4742_v58 = vmul.f32 %v4287_v24, %v194_v34  ;;  %v757_v16 = vand.u32 2139095040, %v4724_v54 }
 0x126   : > { %vm2053_vm8 = vcmp.gt.s32.totalorder %v2052_v45, 0  ;;  %v393_v13 = vmul.u32 %v4675_v62, %v377_v53  ;;  %vm395_vm9 = vc.u32 %v4730_v30, %v4712_v14  ;;  %v2306_v56 = vadd.s32 %v4652_v47, %v4659_v52 }
 0x127   : > { %5996 = vst [vmem:[#allocation20_spill] sm:$0xff] %v4742_v58  ;;  %v2054_v21 = vsel %vm2053_vm8, %v2052_v45, 0  ;;  %vm3794_vm10 = vcmp.lt.s32.totalorder %v3793_v50, 0  ;;  %v397_v37 = vsel %vm395_vm9, %v396_v59, %v4713_v46  ;;  %v4754_v34 = vsel %vm5913_vm7, %v630_v32, %v629_v19 }
 0x128   : > { %v2056_v42 = vand.u32 31, %v2054_v21  ;;  %v2321_v10 = vsel %vm3794_vm10, 0, %v3793_v50  ;;  %v398_v0 = vadd.s32 %v397_v37, %v393_v13  ;;  %v4756_v62 = vshll.u32 %v2050_v11, 8 }
 0x129   : > { %v2322_v60 = vsub.s32 32, %v2321_v10  ;;  %v2326_v5 = vsub.s32 4294967266, %v2321_v10  ;;  %v758_v2 = vshrl.u32 %v757_v16, 23  ;;  %v2323_v48 = vshll.u32 %v4704_v9, %v2321_v10 }
 0x12a   : > { %v2057_v38 = vsub.s32 32, %v2056_v42  ;;  %v399_v41 = vadd.s32 536870912, %v398_v0  ;;  %v2055_v47 = vshrl.u32 %v2054_v21, 5  ;;  %v2059_v52 = vshll.u32 %v5884_v63, %v2056_v42 }
 0x12b   : > { %v2324_v46 = vshrl.u32 %v2306_v56, %v2322_v60  ;;  %v2327_v53 = vadd.s32 127, %v2326_v5  ;;  %v2062_v19 = vshll.u32 %v5882_v1, %v2056_v42  ;;  %v2065_v50 = vshll.u32 %v5886_v4, %v2056_v42 }
 0x12c   : > { %v2060_v45 = vshrl.u32 %v5882_v1, %v2057_v38  ;;  %v4762_v32 = vpop.eup %4004  ;;  %v4764_v59 = vshrl.u32 %v399_v41, 30  ;;  %v2063_v11 = vshrl.u32 %v5886_v4, %v2057_v38  ;;  %v2066_v9 = vshrl.u32 %v5888_v6, %v2057_v38 }
 0x12d   : > { %5997 = vst [vmem:[#allocation21_spill] sm:$0xff] %v4762_v32  ;;  %v4769_v16 = vpop.eup %4006  ;;  %v2325_v13 = vor.u32 %v2324_v46, %v2323_v48  ;;  %v2328_v21 = vshll.u32 %v2327_v53, 23  ;;  %v2068_v56 = vshll.u32 %v5888_v6, %v2056_v42  ;;  %v2069_v37 = vshrl.u32 %v5902_v8, %v2057_v38 }
 0x12e   : > { %v401_v10 = vshll.u32 %v4764_v59, 30  ;;  %v2061_v60 = vor.u32 %v2060_v45, %v2059_v52  ;;  %v2064_v5 = vor.u32 %v2063_v11, %v2062_v19  ;;  %v2067_v41 = vor.u32 %v2066_v9, %v2065_v50 }
 0x12f   : > { %v2329_v1 = vor.u32 4788187, %v2328_v21  ;;  %v2070_v22 = vor.u32 %v2069_v37, %v2068_v56  ;;  %v2071_v63 = vshll.u32 %v5902_v8, %v2056_v42  ;;  %v2072_v4 = vshrl.u32 %v5892_v15, %v2057_v38 }
 0x130   : > { %vm4778_vm15 = vcmp.le.f32.partialorder %v546_v55, 0.7853982  ;;  %v5998_v48 = vmov 0  ;;  %v2332_v46 = vcvt.s32.f32 %v2325_v13  ;;  %v4782_v53 = vsub.s32 %v398_v0, %v401_v10 }
 0x131   : > { %v5999_v48 = vsel %vm4778_vm15, 4294967295, %v5998_v48  ;;  %v6001_v6 = vmov 683565275   ;;  %v3735_v52 = vadd.s32 4294967169, %v758_v2  ;;  %v2073_v45 = vor.u32 %v2072_v4, %v2071_v63 }
 0x132   : > { %6000 = vst [vmem:[#allocation22_spill] sm:$0xff] %v5999_v48  ;;  %v2058_v40 = vshrl.u32 %v6001_v6, %v2057_v38  ;;  %vm2074_vm1 = vcmp.lt.s32.totalorder %v2055_v47, 1  ;;  %vm2076_vm2 = vcmp.lt.s32.totalorder %v2055_v47, 3  ;;  %vm2077_vm3 = vcmp.lt.s32.totalorder %v2055_v47, 4 }
 0x133   : > { %v404_v42 = vsub.s32 0, %v4782_v53  ;;  %v2079_v19 = vsel %vm2077_vm3, %v2067_v41, 2102212464  ;;  %v2082_v11 = vsel %vm2074_vm1, %v2061_v60, %v2064_v5  ;;  %v2083_v50 = vsel %vm2077_vm3, %v2070_v22, 920167782 }
 0x134   : > { %v2330_v9 = vand.u32 2147483647, %v2329_v1  ;;  %vm2075_vm8 = vcmp.lt.s32.totalorder %v2055_v47, 2  ;;  %v2084_v55 = vsel %vm2076_vm2, %v2067_v41, %v2083_v50  ;;  %v2086_v21 = vsel %vm2074_vm1, %v2064_v5, %v2067_v41 }
 0x135   : > { %v3720_v13 = vmin.u32 %v404_v42, %v4782_v53  ;;  %v2078_v0 = vsel %vm2074_vm1, %v2058_v40, %v2061_v60  ;;  %v2085_v56 = vsel %vm2075_vm8, %v2082_v11, %v2084_v55  ;;  %v2087_v38 = vsel %vm2077_vm3, %v2073_v45, 1326507024 }
 0x136   : > { %v2080_v2 = vsel %vm2076_vm2, %v2064_v5, %v2079_v19  ;;  %v2088_v63 = vsel %vm2076_vm2, %v2070_v22, %v2087_v38  ;;  %v4789_v4 = vmul.u32.u64.low %v4756_v62, %v2085_v56  ;;  %v4790_v37 = vmul.u32.u64.high %v4756_v62, %v2085_v56, %v4789_v4 }
 0x137   : > { %v406_v10 = vclz %v3720_v13  ;;  %v2089_v15 = vsel %vm2075_vm8, %v2086_v21, %v2088_v63  ;;  %v6002_v1 = vand.u32 2147483647, %v4724_v54  ;;  %v764_v41 = vadd.s32 1, %v3735_v52 }
 0x138   : > { %4008 = vsinq.f32 %v4665_v17  ;;  %v4797_v40 = vmul.f32 %v2332_v46, %v2330_v9  ;;  %v4800_v60 = vmul.u32.u64.low %v4756_v62, %v2089_v15  ;;  %v4801_v5 = vmul.u32.u64.high %v4756_v62, %v2089_v15, %v4800_v60 }
 0x139   : > { %v761_v50 = vand.u32 8388607, %v6002_v1  ;;  %4010 = vcosq.f32 %v4737_v51  ;;  %v3721_v22 = vadd.s32 4294967294, %v406_v10  ;;  %v2081_v45 = vsel %vm2075_vm8, %v2078_v0, %v2080_v2 }
 0x13a   : > { %vm765_vm9 = vcmp.gt.s32.totalorder %v764_v41, 0  ;;  %v4809_v42 = vsel %vm4778_vm15, %v4479_v25, %v4754_v34  ;;  %v2100_v17 = vadd.s32 1, %v4790_v37  ;;  %v394_v15 = vadd.s32 %v4712_v14, %v4730_v30 }
 0x13b   : > { %v766_v46 = vsel %vm765_vm9, %v764_v41, 0  ;;  %vm3722_vm10 = vcmp.lt.s32.totalorder %v3721_v22, 0  ;;  %v762_v19 = vor.u32 8388608, %v761_v50  ;;  %v2097_v55 = vmul.u32 %v4756_v62, %v2081_v45 }
 0x13c   : > { %v768_v11 = vand.u32 31, %v766_v46  ;;  %v409_v9 = vsel %vm3722_vm10, 0, %v3721_v22  ;;  %vm2099_vm1 = vc.u32 %v4801_v5, %v4789_v4  ;;  %v767_v0 = vshrl.u32 %v766_v46, 5 }
 0x13d   : > { %v410_v34 = vsub.s32 32, %v409_v9  ;;  %v414_v21 = vsub.s32 4294967266, %v409_v9  ;;  %v2101_v13 = vsel %vm2099_vm1, %v2100_v17, %v4790_v37  ;;  %v411_v56 = vshll.u32 %v4782_v53, %v409_v9 }
 0x13e   : > { %v2102_v38 = vadd.s32 %v2101_v13, %v2097_v55  ;;  %v769_v14 = vsub.s32 32, %v768_v11  ;;  %v771_v30 = vshll.u32 %v6001_v6, %v768_v11  ;;  %v6003_v10 = vmov 2475754826  }
 0x13f   : > { %v412_v2 = vshrl.u32 %v394_v15, %v410_v34  ;;  %v415_v63 = vadd.s32 127, %v414_v21  ;;  %v774_v1 = vshll.u32 %v6003_v10, %v768_v11  ;;  %v6004_v50 = vmov 2131351028  }
 0x140   : > { %v777_v62 = vshll.u32 %v6004_v50, %v768_v11  ;;  %v2103_v41 = vadd.s32 536870912, %v2102_v38  ;;  %v772_v60 = vshrl.u32 %v6003_v10, %v769_v14  ;;  %v775_v22 = vshrl.u32 %v6004_v50, %v769_v14 }
 0x141   : > { %v6005_v45 = vmov 2102212464   ;;  %v413_v17 = vor.u32 %v412_v2, %v411_v56  ;;  %v416_v46 = vshll.u32 %v415_v63, 23  ;;  %v781_v9 = vshrl.u32 %v5902_v8, %v769_v14 }
 0x142   : > { %v780_v37 = vshll.u32 %v6005_v45, %v768_v11  ;;  %v778_v53 = vshrl.u32 %v6005_v45, %v769_v14  ;;  %v4829_v55 = vpop.eup %4008  ;;  %vm5912_vm2 = vcmp.lt.s32.totalorder %v4526_v26, 0  ;;  %v4832_v15 = vshrl.u32 %v2103_v41, 30 }
 0x143   : > { %v773_v34 = vor.u32 %v772_v60, %v771_v30  ;;  %v776_v21 = vor.u32 %v775_v22, %v774_v1  ;;  %v802_v13 = vshll.u32 %v762_v19, 8  ;;  %v4834_v52 = vpop.eup %4010  ;;  %v417_v47 = vor.u32 4788187, %v416_v46 }
 0x144   : > { %6006 = vst [vmem:[#allocation23_spill] sm:$0xff] %v4834_v52  ;;  %v779_v48 = vor.u32 %v778_v53, %v777_v62  ;;  %v782_v25 = vor.u32 %v781_v9, %v780_v37  ;;  %v2461_v56 = vand.u32 2139095040, %v4742_v58  ;;  %v2105_v2 = vshll.u32 %v4832_v15, 30 }
 0x145   : > { %v770_v63 = vshrl.u32 %v6001_v6, %v769_v14  ;;  %v783_v18 = vshll.u32 %v5902_v8, %v768_v11  ;;  %v6007_v31 = vmov 1326507024   ;;  %v418_v41 = vand.u32 2147483647, %v417_v47 }
 0x146   : > { %v784_v7 = vshrl.u32 %v6007_v31, %v769_v14  ;;  %v420_v32 = vcvt.s32.f32 %v413_v17  ;;  %vm786_vm3 = vcmp.lt.s32.totalorder %v767_v0, 1  ;;  %vm789_vm8 = vcmp.lt.s32.totalorder %v767_v0, 4 }
 0x147   : > { %v4841_v19 = vsub.s32 %v2102_v38, %v2105_v2  ;;  %v791_v1 = vsel %vm789_vm8, %v779_v48, 2102212464  ;;  %v794_v62 = vsel %vm786_vm3, %v773_v34, %v776_v21  ;;  %vm787_vm9 = vcmp.lt.s32.totalorder %v767_v0, 2 }
 0x148   : > { %v785_v30 = vor.u32 %v784_v7, %v783_v18  ;;  %vm788_vm10 = vcmp.lt.s32.totalorder %v767_v0, 3  ;;  %v795_v60 = vsel %vm789_vm8, %v782_v25, 920167782  ;;  %v798_v22 = vsel %vm786_vm3, %v776_v21, %v779_v48 }
 0x149   : > { %v2108_v37 = vsub.s32 0, %v4841_v19  ;;  %v790_v46 = vsel %vm786_vm3, %v770_v63, %v773_v34  ;;  %v796_v53 = vsel %vm788_vm10, %v779_v48, %v795_v60  ;;  %v421_v9 = vmul.f32 %v420_v32, %v418_v41 }
 0x14a   : > { %v799_v11 = vsel %vm789_vm8, %v785_v30, 1326507024  ;;  %v792_v14 = vsel %vm788_vm10, %v776_v21, %v791_v1  ;;  %v797_v47 = vsel %vm787_vm9, %v794_v62, %v796_v53  ;;  %v6008_v8 = vxor.u32 2147483648, %v4797_v40  ;;  %v4863_v1 = vpop.permute.xlu0 %188 }
 0x14b   : > { %v800_v17 = vsel %vm788_vm10, %v782_v25, %v799_v11  ;;  %v3784_v38 = vmin.u32 %v2108_v37, %v4841_v19  ;;  %v4847_v18 = vmul.u32.u64.low %v802_v13, %v797_v47  ;;  %v4848_v2 = vmul.u32.u64.high %v802_v13, %v797_v47, %v4847_v18 }
 0x14c   : > { %v801_v7 = vsel %vm787_vm9, %v798_v22, %v800_v17  ;;  %v2335_v48 = vsel %vm5912_vm2, %v6008_v8, %v4797_v40  ;;  %v2462_v21 = vshrl.u32 %v2461_v56, 23  ;;  %4012 = vsinq.f32 %v4737_v51 }
 0x14d   : > { %v4856_v34 = vmul.u32.u64.low %v802_v13, %v801_v7  ;;  %v4857_v32 = vmul.u32.u64.high %v802_v13, %v801_v7, %v4856_v34  ;;  %v2110_v25 = vclz %v3784_v38  ;;  %v793_v63 = vsel %vm787_vm9, %v790_v46, %v792_v14 }
 0x14e   : > { %v6009_v41 = vand.u32 2147483647, %v4742_v58  ;;  %4014 = vcosq.f32 %v4809_v42  ;;  %v6010_v62 = vand.u32 2147483647, %v4526_v26  ;;  %v6011_v8 = vmov 0 }
 0x14f   : > { %vm340_vm3 = vcmp.lt.s32.totalorder %v4592_v12, 0  ;;  %v3799_v40 = vadd.s32 4294967169, %v2462_v21  ;;  %v422_v0 = vxor.u32 2147483648, %v421_v9  ;;  %v3785_v56 = vadd.s32 4294967294, %v2110_v25 }
 0x150   : > { %v2465_v30 = vand.u32 8388607, %v6009_v41  ;;  %vm4868_vm1 = vcmp.le.f32.partialorder %v6010_v62, 0.7853982  ;;  %v812_v60 = vadd.s32 1, %v4848_v2  ;;  %v809_v22 = vmul.u32 %v802_v13, %v793_v63 }
 0x151   : > { %v6012_v8 = vsel %vm4868_vm1, 4294967295, %v6011_v8  ;;  %v4876_v51 = vsel %vm4868_vm1, %v4526_v26, %v2335_v48  ;;  %vm811_vm8 = vc.u32 %v4857_v32, %v4847_v18  ;;  %v2468_v37 = vadd.s32 1, %v3799_v40 }
 0x152   : > { %6013 = vst [vmem:[#allocation24_spill] sm:$0xff] %v6012_v8  ;;  %v4883_v46 = vmul.f32 %v4863_v1, %v4285_v23  ;;  %4016 = vsinq.f32 %v4809_v42  ;;  %vm3786_vm9 = vcmp.lt.s32.totalorder %v3785_v56, 0  ;;  %v813_v53 = vsel %vm811_vm8, %v812_v60, %v4848_v2 }
 0x153   : > { %v2466_v11 = vor.u32 8388608, %v2465_v30  ;;  %4018 = vcosq.f32 %v4876_v51  ;;  %v2113_v14 = vsel %vm3786_vm9, 0, %v3785_v56  ;;  %v814_v47 = vadd.s32 %v813_v53, %v809_v22 }
 0x154   : > { %vm2469_vm10 = vcmp.gt.s32.totalorder %v2468_v37, 0  ;;  %v2098_v13 = vadd.s32 %v4789_v4, %v4801_v5  ;;  %v2114_v17 = vsub.s32 32, %v2113_v14  ;;  %v2118_v38 = vsub.s32 4294967266, %v2113_v14 }
 0x155   : > { %v2470_v7 = vsel %vm2469_vm10, %v2468_v37, 0  ;;  %v4892_v48 = vsel %vm340_vm3, %v422_v0, %v421_v9  ;;  %v815_v42 = vadd.s32 536870912, %v814_v47  ;;  %v2115_v21 = vshll.u32 %v4841_v19, %v2113_v14 }
 0x156   : > { %v2472_v34 = vand.u32 31, %v2470_v7  ;;  %v2116_v25 = vshrl.u32 %v2098_v13, %v2114_v17  ;;  %v2119_v63 = vadd.s32 127, %v2118_v38  ;;  %v4896_v41 = vshll.u32 %v2466_v11, 8  ;;  %v4903_v40 = vpop.eup %4012 }
 0x157   : > { %v4898_v30 = vshrl.u32 %v815_v42, 30  ;;  %v4900_v4 = vshrl.u32 %v2470_v7, 5  ;;  %6015 = vst [vmem:[#allocation26_spill] sm:$0xff] %v4903_v40  ;;  %v6017_v14 = vand.u32 2147483647, %v4592_v12  ;;  %vm5953_vm9 = vcmp.lt.s32.totalorder %v4611_v36, 0 }
 0x158   : > { %v2473_v5 = vsub.s32 32, %v2472_v34  ;;  %v2475_v62 = vshll.u32 %v6001_v6, %v2472_v34  ;;  %v2117_v9 = vor.u32 %v2116_v25, %v2115_v21  ;;  %v2120_v0 = vshll.u32 %v2119_v63, 23  ;;  %v4907_v19 = vpop.eup %4014 }
 0x159   : > { %6014 = vst [vmem:[#allocation25_spill] sm:$0xff] %v4898_v30  ;;  %v2478_v56 = vshll.u32 %v6003_v10, %v2472_v34  ;;  %v2481_v60 = vshll.u32 %v6004_v50, %v2472_v34  ;;  %6016 = vst [vmem:[#allocation27_spill] sm:$0xff] %v4907_v19  ;;  %v817_v22 = vshll.u32 %v4898_v30, 30  ;;  %v2484_v11 = vshll.u32 %v6005_v45, %v2472_v34 }
 0x15a   : > { %v2476_v37 = vshrl.u32 %v6003_v10, %v2473_v5  ;;  %v2479_v53 = vshrl.u32 %v6004_v50, %v2473_v5  ;;  %vm4915_vm8 = vcmp.le.f32.partialorder %v6017_v14, 0.7853982  ;;  %v2121_v17 = vor.u32 4788187, %v2120_v0 }
 0x15b   : > { %v2124_v38 = vcvt.s32.f32 %v2117_v9  ;;  %v2482_v7 = vshrl.u32 %v6005_v45, %v2473_v5  ;;  %v6020_v42 = vmov 920167782   ;;  %v4921_v25 = vsub.s32 %v814_v47, %v817_v22 }
 0x15c   : > { %v2485_v21 = vshrl.u32 %v6020_v42, %v2473_v5  ;;  %v2477_v63 = vor.u32 %v2476_v37, %v2475_v62  ;;  %v2480_v2 = vor.u32 %v2479_v53, %v2478_v56  ;;  %v2487_v30 = vshll.u32 %v6020_v42, %v2472_v34  ;;  %v4924_v8 = vpop.eup %4016 }
 0x15d   : > { %6021 = vst [vmem:[#allocation28_spill] sm:$0xff] %v4924_v8  ;;  %v2122_v14 = vand.u32 2147483647, %v2121_v17  ;;  %v2483_v26 = vor.u32 %v2482_v7, %v2481_v60  ;;  %v2488_v0 = vshrl.u32 %v6007_v31, %v2473_v5  ;;  %v4928_v9 = vpop.eup %4018  ;;  %v820_v28 = vsub.s32 0, %v4921_v25 }
 0x15e   : > { %v2486_v19 = vor.u32 %v2485_v21, %v2484_v11  ;;  %6022 = vst [vmem:[#allocation29_spill] sm:$0xff] %v4928_v9  ;;  %v2474_v47 = vshrl.u32 %v6001_v6, %v2473_v5  ;;  %vm2490_vm10 = vcmp.lt.s32.totalorder %v4900_v4, 1  ;;  %v653_v62 = vand.u32 2139095040, %v4883_v46 }
 0x15f   : > { %v2125_v34 = vmul.f32 %v2124_v38, %v2122_v14  ;;  %v2489_v56 = vor.u32 %v2488_v0, %v2487_v30  ;;  %vm2492_vm2 = vcmp.lt.s32.totalorder %v4900_v4, 3  ;;  %vm2493_vm7 = vcmp.lt.s32.totalorder %v4900_v4, 4 }
 0x160   : > { %v6023_v60 = vand.u32 2147483647, %v4611_v36  ;;  %v3736_v37 = vmin.u32 %v820_v28, %v4921_v25  ;;  %v2495_v53 = vsel %vm2493_vm7, %v2483_v26, 2102212464  ;;  %v2498_v5 = vsel %vm2490_vm10, %v2477_v63, %v2480_v2 }
 0x161   : > { %v2499_v11 = vsel %vm2493_vm7, %v2486_v19, 920167782  ;;  %vm2491_vm4 = vcmp.lt.s32.totalorder %v4900_v4, 2  ;;  %v2494_v17 = vsel %vm2490_vm10, %v2474_v47, %v2477_v63  ;;  %v2502_v38 = vsel %vm2490_vm10, %v2480_v2, %v2483_v26 }
 0x162   : > { %vm4938_vm6 = vcmp.le.f32.partialorder %v6023_v60, 0.7853982  ;;  %v2500_v30 = vsel %vm2492_vm2, %v2483_v26, %v2499_v11  ;;  %v2126_v7 = vxor.u32 2147483648, %v2125_v34  ;;  %v822_v21 = vclz %v3736_v37 }
 0x163   : > { %v2501_v14 = vsel %vm2491_vm4, %v2498_v5, %v2500_v30  ;;  %v2503_v0 = vsel %vm2493_vm7, %v2489_v56, 1326507024  ;;  %v2496_v60 = vsel %vm2492_vm2, %v2480_v2, %v2495_v53  ;;  %4020 = vsinq.f32 %v4876_v51 }
 0x164   : > { %v2504_v28 = vsel %vm2492_vm2, %v2486_v19, %v2503_v0  ;;  %v4953_v9 = vmul.u32.u64.low %v4896_v41, %v2501_v14  ;;  %v4954_v8 = vmul.u32.u64.high %v4896_v41, %v2501_v14, %v4953_v9  ;;  %v426_v26 = vsel %vm4915_vm8, %v4592_v12, %v4892_v48 }
 0x165   : > { %v3737_v63 = vadd.s32 4294967294, %v822_v21  ;;  %v2505_v47 = vsel %vm2491_vm4, %v2502_v38, %v2504_v28  ;;  %v4969_v19 = vmul.f32 %v4287_v24, %v4863_v1  ;;  %v654_v37 = vshrl.u32 %v653_v62, 23 }
 0x166   : > { %v4964_v2 = vmul.u32.u64.low %v4896_v41, %v2505_v47  ;;  %v4965_v56 = vmul.u32.u64.high %v4896_v41, %v2505_v47, %v4964_v2  ;;  %v2127_v51 = vsel %vm5953_vm9, %v2126_v7, %v2125_v34  ;;  %v2497_v48 = vsel %vm2491_vm4, %v2494_v17, %v2496_v60  ;;  %v204_v7 = vpop.permute.xlu1 %203 }
 0x167   : > { %vm3738_vm7 = vcmp.lt.s32.totalorder %v3737_v63, 0  ;;  %v6026_v53 = vand.u32 2147483647, %v4883_v46  ;;  %4022 = vcosq.f32 %v426_v26  ;;  %v2516_v30 = vadd.s32 1, %v4954_v8 }
 0x168   : > { %v825_v11 = vsel %vm3738_vm7, 0, %v3737_v63  ;;  %v3731_v38 = vadd.s32 4294967169, %v654_v37  ;;  %4024 = vsinq.f32 %v426_v26  ;;  %v810_v1 = vadd.s32 %v4847_v18, %v4857_v32 }
 0x169   : > { %v657_v5 = vand.u32 8388607, %v6026_v53  ;;  %v826_v62 = vsub.s32 32, %v825_v11  ;;  %v830_v21 = vsub.s32 4294967266, %v825_v11  ;;  %v2130_v34 = vsel %vm4938_vm6, %v4611_v36, %v2127_v51 }
 0x16a   : > { %v2513_v4 = vmul.u32 %v4896_v41, %v2497_v48  ;;  %vm2515_vm4 = vc.u32 %v4965_v56, %v4953_v9  ;;  %v660_v17 = vadd.s32 1, %v3731_v38  ;;  %v5918_v28 = vand.u32 2147483647, %v4969_v19 }
 0x16b   : > { %v831_v14 = vadd.s32 127, %v830_v21  ;;  %v2517_v0 = vsel %vm2515_vm4, %v2516_v30, %v4954_v8  ;;  %v658_v60 = vor.u32 8388608, %v657_v5  ;;  %v828_v26 = vshrl.u32 %v810_v1, %v826_v62 }
 0x16c   : > { %v2518_v18 = vadd.s32 %v2517_v0, %v2513_v4  ;;  %vm661_vm2 = vcmp.gt.s32.totalorder %v660_v17, 0  ;;  %v2357_v32 = vand.u32 2139095040, %v4969_v19  ;;  %4026 = vcosq.f32 %v2130_v34 }
 0x16d   : > { %v832_v63 = vshll.u32 %v831_v14, 23  ;;  %v662_v47 = vsel %vm661_vm2, %v660_v17, 0  ;;  %v4989_v41 = vmul.f32 %v204_v7, %v4285_v23  ;;  %4028 = vsinq.f32 %v2130_v34  ;;  %v4992_v8 = vpop.eup %4020 }
 0x16e   : > { %v827_v2 = vshll.u32 %v4921_v25, %v825_v11  ;;  %v2519_v37 = vadd.s32 536870912, %v2518_v18  ;;  %v664_v51 = vand.u32 31, %v662_v47  ;;  %6028 = vst [vmem:[#allocation31_spill] sm:$0xff] %v4992_v8  ;;  %v4995_v53 = vadd.s32 %v4953_v9, %v4965_v56 }
 0x16f   : > { %6027 = vst [vmem:[#allocation30_spill] sm:$0xff] %v4989_v41  ;;  %v833_v48 = vor.u32 4788187, %v832_v63  ;;  %v4997_v5 = vshll.u32 %v658_v60, 8  ;;  %v5001_v30 = vand.u32 8388607, %v5918_v28  ;;  %v5023_v57 = vmul.f32 %v4287_v24, %v204_v7 }
 0x170   : > { %v829_v38 = vor.u32 %v828_v26, %v827_v2  ;;  %v5003_v1 = vshrl.u32 %v2519_v37, 30  ;;  %v665_v62 = vsub.s32 32, %v664_v51  ;;  %v2358_v21 = vshrl.u32 %v2357_v32, 23 }
 0x171   : > { %v834_v25 = vand.u32 2147483647, %v833_v48  ;;  %v663_v11 = vshrl.u32 %v662_v47, 5  ;;  %v667_v34 = vshll.u32 %v6001_v6, %v664_v51  ;;  %v670_v4 = vshll.u32 %v6003_v10, %v664_v51  ;;  %v5007_v17 = vpop.eup %4022  ;;  %6030 = vst [vmem:[#allocation33_spill] sm:$0xff] %v5023_v57 }
 0x172   : > { %6029 = vst [vmem:[#allocation32_spill] sm:$0xff] %v5003_v1  ;;  %v2521_v9 = vshll.u32 %v5003_v1, 30  ;;  %v668_v56 = vshrl.u32 %v6003_v10, %v665_v62  ;;  %v671_v14 = vshrl.u32 %v6004_v50, %v665_v62  ;;  %v673_v0 = vshll.u32 %v6004_v50, %v664_v51  ;;  %v5013_v60 = vpop.eup %4024 }
 0x173   : > { %v674_v26 = vshrl.u32 %v6005_v45, %v665_v62  ;;  %v676_v32 = vshll.u32 %v6005_v45, %v664_v51  ;;  %v677_v63 = vshrl.u32 %v6020_v42, %v665_v62  ;;  %v680_v47 = vshrl.u32 %v6007_v31, %v665_v62 }
 0x174   : > { %v5019_v2 = vsub.s32 %v2518_v18, %v2521_v9  ;;  %v669_v37 = vor.u32 %v668_v56, %v667_v34  ;;  %v672_v48 = vor.u32 %v671_v14, %v670_v4  ;;  %v679_v28 = vshll.u32 %v6020_v42, %v664_v51 }
 0x175   : > { %v836_v1 = vcvt.s32.f32 %v829_v38  ;;  %v675_v8 = vor.u32 %v674_v26, %v673_v0  ;;  %v678_v20 = vor.u32 %v677_v63, %v676_v32  ;;  %vm682_vm10 = vcmp.lt.s32.totalorder %v663_v11, 1 }
 0x176   : > { %v2524_v35 = vsub.s32 0, %v5019_v2  ;;  %v681_v43 = vor.u32 %v680_v47, %v679_v28  ;;  %v3795_v27 = vadd.s32 4294967169, %v2358_v21  ;;  %v5026_v44 = vpop.eup %4026  ;;  %vm5937_vm7 = vcmp.lt.s32.totalorder %v4724_v54, 0 }
 0x177   : > { %v837_v18 = vmul.f32 %v836_v1, %v834_v25  ;;  %v666_v34 = vshrl.u32 %v6001_v6, %v665_v62  ;;  %vm685_vm4 = vcmp.lt.s32.totalorder %v663_v11, 4  ;;  %v690_v51 = vsel %vm682_vm10, %v669_v37, %v672_v48  ;;  %v5031_v38 = vpop.eup %4028 }
 0x178   : > { %v3800_v7 = vmin.u32 %v2524_v35, %v5019_v2  ;;  %vm684_vm2 = vcmp.lt.s32.totalorder %v663_v11, 3  ;;  %v687_v4 = vsel %vm685_vm4, %v675_v8, 2102212464  ;;  %v691_v9 = vsel %vm685_vm4, %v678_v20, 920167782 }
 0x179   : > { %vm683_vm13 = vcmp.lt.s32.totalorder %v663_v11, 2  ;;  %v692_v28 = vsel %vm684_vm2, %v675_v8, %v691_v9  ;;  %v694_v21 = vsel %vm682_vm10, %v672_v48, %v675_v8  ;;  %v2362_v56 = vor.u32 8388608, %v5001_v30 }
 0x17a   : > { %v2526_v14 = vclz %v3800_v7  ;;  %v686_v1 = vsel %vm682_vm10, %v666_v34, %v669_v37  ;;  %v693_v62 = vsel %vm683_vm13, %v690_v51, %v692_v28  ;;  %v695_v25 = vsel %vm685_vm4, %v681_v43, 1326507024 }
 0x17b   : > { %v688_v0 = vsel %vm684_vm2, %v672_v48, %v687_v4  ;;  %v696_v26 = vsel %vm684_vm2, %v678_v20, %v695_v25  ;;  %v5039_v32 = vmul.u32.u64.low %v4997_v5, %v693_v62  ;;  %v5040_v35 = vmul.u32.u64.high %v4997_v5, %v693_v62, %v5039_v32 }
 0x17c   : > { %v838_v63 = vxor.u32 2147483648, %v837_v18  ;;  %v3801_v47 = vadd.s32 4294967294, %v2526_v14  ;;  %v697_v9 = vsel %vm683_vm13, %v694_v21, %v696_v26  ;;  %v2364_v8 = vadd.s32 1, %v3795_v27 }
 0x17d   : > { %v5045_v30 = vmul.u32.u64.low %v4997_v5, %v697_v9  ;;  %v5046_v7 = vmul.u32.u64.high %v4997_v5, %v697_v9, %v5045_v30  ;;  %v5932_v37 = vand.u32 2147483647, %v4989_v41  ;;  %v965_v43 = vand.u32 2139095040, %v4989_v41 }
 0x17e   : > { %vm3802_vm10 = vcmp.lt.s32.totalorder %v3801_v47, 0  ;;  %v689_v20 = vsel %vm683_vm13, %v686_v1, %v688_v0  ;;  %vm2365_vm4 = vcmp.gt.s32.totalorder %v2364_v8, 0  ;;  %v5051_v48 = vshll.u32 %v2362_v56, 8 }
 0x17f   : > { %v2529_v34 = vsel %vm3802_vm10, 0, %v3801_v47  ;;  %v708_v51 = vadd.s32 1, %v5040_v35  ;;  %v2366_v4 = vsel %vm2365_vm4, %v2364_v8, 0  ;;  %v966_v28 = vshrl.u32 %v965_v43, 23 }
 0x180   : > { %v839_v27 = vsel %vm5937_vm7, %v838_v63, %v837_v18  ;;  %v2530_v21 = vsub.s32 32, %v2529_v34  ;;  %v2534_v14 = vsub.s32 4294967266, %v2529_v34  ;;  %v5056_v62 = vshrl.u32 %v2366_v4, 5 }
 0x181   : > { %v705_v25 = vmul.u32 %v4997_v5, %v689_v20  ;;  %vm707_vm13 = vc.u32 %v5046_v7, %v5039_v32  ;;  %v2368_v11 = vand.u32 31, %v2366_v4  ;;  %v5063_v56 = vand.u32 8388607, %v5932_v37 }
 0x182   : > { %v2531_v1 = vshll.u32 %v5019_v2, %v2529_v34  ;;  %v2532_v0 = vshrl.u32 %v4995_v53, %v2530_v21  ;;  %v2535_v26 = vadd.s32 127, %v2534_v14  ;;  %v709_v18 = vsel %vm707_vm13, %v708_v51, %v5040_v35 }
 0x183   : > { %v710_v63 = vadd.s32 %v709_v18, %v705_v25  ;;  %v2369_v47 = vsub.s32 32, %v2368_v11  ;;  %vm2386_vm2 = vcmp.lt.s32.totalorder %v5056_v62, 1  ;;  %v3743_v5 = vadd.s32 4294967169, %v966_v28 }
 0x184   : > { %v6031_v9 = vand.u32 2147483647, %v4724_v54  ;;  %v6032_v8 = vmov 0  ;;  %v2533_v30 = vor.u32 %v2532_v0, %v2531_v1  ;;  %v2536_v43 = vshll.u32 %v2535_v26, 23 }
 0x185   : > { %v2371_v2 = vshll.u32 %v6001_v6, %v2368_v11  ;;  %v2374_v53 = vshll.u32 %v6003_v10, %v2368_v11  ;;  %v711_v20 = vadd.s32 536870912, %v710_v63  ;;  %v2372_v35 = vshrl.u32 %v6003_v10, %v2369_v47 }
 0x186   : > { %vm5071_vm10 = vcmp.le.f32.partialorder %v6031_v9, 0.7853982  ;;  %v2375_v34 = vshrl.u32 %v6004_v50, %v2369_v47  ;;  %v2377_v51 = vshll.u32 %v6004_v50, %v2368_v11  ;;  %v2537_v4 = vor.u32 4788187, %v2536_v43 }
 0x187   : > { %v6033_v8 = vsel %vm5071_vm10, 4294967295, %v6032_v8  ;;  %v2378_v28 = vshrl.u32 %v6005_v45, %v2369_v47  ;;  %v2380_v21 = vshll.u32 %v6005_v45, %v2368_v11  ;;  %v2381_v14 = vshrl.u32 %v6020_v42, %v2369_v47 }
 0x188   : > { %6034 = vst [vmem:[#allocation34_spill] sm:$0xff] %v6033_v8  ;;  %v5083_v25 = vshrl.u32 %v711_v20, 30  ;;  %v2373_v1 = vor.u32 %v2372_v35, %v2371_v2  ;;  %v2376_v0 = vor.u32 %v2375_v34, %v2374_v53  ;;  %v2383_v26 = vshll.u32 %v6020_v42, %v2368_v11 }
 0x189   : > { %v2538_v18 = vand.u32 2147483647, %v2537_v4  ;;  %v2379_v9 = vor.u32 %v2378_v28, %v2377_v51  ;;  %v2382_v37 = vor.u32 %v2381_v14, %v2380_v21  ;;  %v2384_v41 = vshrl.u32 %v6007_v31, %v2369_v47 }
 0x18a   : > { %6035 = vst [vmem:[#allocation35_spill] sm:$0xff] %v5083_v25  ;;  %v2540_v52 = vcvt.s32.f32 %v2533_v30  ;;  %v713_v43 = vshll.u32 %v5083_v25, 30  ;;  %v2370_v40 = vshrl.u32 %v6001_v6, %v2369_v47  ;;  %vm2389_vm4 = vcmp.lt.s32.totalorder %v5056_v62, 4 }
 0x18b   : > { %vm5951_vm13 = vcmp.lt.s32.totalorder %v4742_v58, 0  ;;  %v2385_v20 = vor.u32 %v2384_v41, %v2383_v26  ;;  %vm2387_vm7 = vcmp.lt.s32.totalorder %v5056_v62, 2  ;;  %vm2388_vm11 = vcmp.lt.s32.totalorder %v5056_v62, 3 }
 0x18c   : > { %v2391_v11 = vsel %vm2389_vm4, %v2379_v9, 2102212464  ;;  %v2541_v2 = vmul.f32 %v2540_v52, %v2538_v18  ;;  %v5095_v53 = vsub.s32 %v710_v63, %v713_v43  ;;  %v2394_v30 = vsel %vm2386_vm2, %v2373_v1, %v2376_v0 }
 0x18d   : > { %v2395_v47 = vsel %vm2389_vm4, %v2382_v37, 920167782  ;;  %v2390_v35 = vsel %vm2386_vm2, %v2370_v40, %v2373_v1  ;;  %v2392_v41 = vsel %vm2388_vm11, %v2376_v0, %v2391_v11  ;;  %v2398_v51 = vsel %vm2386_vm2, %v2376_v0, %v2379_v9 }
 0x18e   : > { %v2396_v34 = vsel %vm2388_vm11, %v2379_v9, %v2395_v47  ;;  %v5108_v52 = vsel %vm5071_vm10, %v4724_v54, %v839_v27  ;;  %v716_v63 = vsub.s32 0, %v5095_v53  ;;  %v2399_v28 = vsel %vm2389_vm4, %v2385_v20, 1326507024 }
 0x18f   : > { %v2397_v4 = vsel %vm2387_vm7, %v2394_v30, %v2396_v34  ;;  %v2400_v21 = vsel %vm2388_vm11, %v2382_v37, %v2399_v28  ;;  %v5939_v1 = vand.u32 2147483647, %v5023_v57  ;;  %v2542_v0 = vxor.u32 2147483648, %v2541_v2  ;;  %v5135_v34 = vpop.permute.xlu0 %198 }
 0x190   : > { %v5116_v40 = vmul.u32.u64.low %v5051_v48, %v2397_v4  ;;  %v5117_v14 = vmul.u32.u64.high %v5051_v48, %v2397_v4, %v5116_v40  ;;  %v3732_v27 = vmin.u32 %v716_v63, %v5095_v53  ;;  %v2393_v26 = vsel %vm2387_vm7, %v2390_v35, %v2392_v41 }
 0x191   : > { %v2401_v18 = vsel %vm2387_vm7, %v2398_v51, %v2400_v21  ;;  %v970_v37 = vor.u32 8388608, %v5063_v56  ;;  %v972_v20 = vadd.s32 1, %v3743_v5  ;;  %4030 = vcosq.f32 %v5108_v52 }
 0x192   : > { %v5127_v9 = vmul.u32.u64.low %v5051_v48, %v2401_v18  ;;  %v5128_v43 = vmul.u32.u64.high %v5051_v48, %v2401_v18, %v5127_v9  ;;  %v706_v11 = vadd.s32 %v5039_v32, %v5046_v7  ;;  %v718_v30 = vclz %v3732_v27 }
 0x193   : > { %v2669_v47 = vand.u32 2139095040, %v5023_v57  ;;  %v2409_v62 = vmul.u32 %v5051_v48, %v2393_v26  ;;  %v2412_v35 = vadd.s32 1, %v5117_v14  ;;  %vm973_vm11 = vcmp.gt.s32.totalorder %v972_v20, 0 }
 0x194   : > { %v5141_v41 = vand.u32 8388607, %v5939_v1  ;;  %v5145_v56 = vsel %vm5951_vm13, %v2542_v0, %v2541_v2  ;;  %v3733_v5 = vadd.s32 4294967294, %v718_v30  ;;  %v974_v32 = vsel %vm973_vm11, %v972_v20, 0 }
 0x195   : > { %v2670_v7 = vshrl.u32 %v2669_v47, 23  ;;  %vm2411_vm7 = vc.u32 %v5128_v43, %v5116_v40  ;;  %v976_v51 = vand.u32 31, %v974_v32  ;;  %v5149_v63 = vshll.u32 %v970_v37, 8 }
 0x196   : > { %v5153_v48 = vmul.f32 %v5135_v34, %v4285_v23  ;;  %vm3734_vm2 = vcmp.lt.s32.totalorder %v3733_v5, 0  ;;  %v2413_v4 = vsel %vm2411_vm7, %v2412_v35, %v5117_v14  ;;  %v975_v28 = vshrl.u32 %v974_v32, 5 }
 0x197   : > { %v3807_v21 = vadd.s32 4294967169, %v2670_v7  ;;  %v721_v2 = vsel %vm3734_vm2, 0, %v3733_v5  ;;  %v2414_v0 = vadd.s32 %v2413_v4, %v2409_v62  ;;  %v977_v27 = vsub.s32 32, %v976_v51 }
 0x198   : > { %v722_v18 = vsub.s32 32, %v721_v2  ;;  %v723_v9 = vshll.u32 %v5095_v53, %v721_v2  ;;  %v726_v20 = vsub.s32 4294967266, %v721_v2  ;;  %v979_v37 = vshll.u32 %v6001_v6, %v976_v51 }
 0x199   : > { %v2415_v30 = vadd.s32 536870912, %v2414_v0  ;;  %v980_v23 = vshrl.u32 %v6003_v10, %v977_v27  ;;  %v982_v47 = vshll.u32 %v6003_v10, %v976_v51  ;;  %v983_v14 = vshrl.u32 %v6004_v50, %v977_v27 }
 0x19a   : > { %v724_v35 = vshrl.u32 %v706_v11, %v722_v18  ;;  %v727_v32 = vadd.s32 127, %v726_v20  ;;  %v985_v62 = vshll.u32 %v6004_v50, %v976_v51  ;;  %v986_v5 = vshrl.u32 %v6005_v45, %v977_v27 }
 0x19b   : > { %v5164_v7 = vshrl.u32 %v2415_v30, 30  ;;  %v981_v4 = vor.u32 %v980_v23, %v979_v37  ;;  %v984_v53 = vor.u32 %v983_v14, %v982_v47  ;;  %v988_v2 = vshll.u32 %v6005_v45, %v976_v51  ;;  %v5167_v1 = vpop.eup %4030 }
 0x19c   : > { %6037 = vst [vmem:[#allocation37_spill] sm:$0xff] %v5167_v1  ;;  %v725_v26 = vor.u32 %v724_v35, %v723_v9  ;;  %v728_v57 = vshll.u32 %v727_v32, 23  ;;  %v987_v8 = vor.u32 %v986_v5, %v985_v62  ;;  %v989_v54 = vshrl.u32 %v6020_v42, %v977_v27 }
 0x19d   : > { %6036 = vst [vmem:[#allocation36_spill] sm:$0xff] %v5164_v7  ;;  %v6038_v11 = vand.u32 2147483647, %v4742_v58  ;;  %v6039_v18 = vmov 0  ;;  %v2417_v20 = vshll.u32 %v5164_v7, 30  ;;  %v978_v37 = vshrl.u32 %v6001_v6, %v977_v27 }
 0x19e   : > { %v991_v30 = vshll.u32 %v6020_v42, %v976_v51  ;;  %v992_v23 = vshrl.u32 %v6007_v31, %v977_v27  ;;  %v729_v47 = vor.u32 4788187, %v728_v57  ;;  %v732_v9 = vcvt.s32.f32 %v725_v26 }
 0x19f   : > { %vm5172_vm4 = vcmp.le.f32.partialorder %v6038_v11, 0.7853982  ;;  %v990_v14 = vor.u32 %v989_v54, %v988_v2  ;;  %vm994_vm11 = vcmp.lt.s32.totalorder %v975_v28, 1  ;;  %v5180_v35 = vsub.s32 %v2414_v0, %v2417_v20 }
 0x1a0   : > { %v6040_v18 = vsel %vm5172_vm4, 4294967295, %v6039_v18  ;;  %v993_v32 = vor.u32 %v992_v23, %v991_v30  ;;  %vm996_vm7 = vcmp.lt.s32.totalorder %v975_v28, 3  ;;  %vm997_vm2 = vcmp.lt.s32.totalorder %v975_v28, 4 }
 0x1a1   : > { %6041 = vst [vmem:[#allocation38_spill] sm:$0xff] %v6040_v18  ;;  %v730_v62 = vand.u32 2147483647, %v729_v47  ;;  %v998_v5 = vsel %vm994_vm11, %v978_v37, %v981_v4  ;;  %v999_v11 = vsel %vm997_vm2, %v987_v8, 2102212464  ;;  %v1002_v1 = vsel %vm994_vm11, %v981_v4, %v984_v53 }
 0x1a2   : > { %v2420_v7 = vsub.s32 0, %v5180_v35  ;;  %v1000_v25 = vsel %vm996_vm7, %v984_v53, %v999_v11  ;;  %v1003_v51 = vsel %vm997_vm2, %v990_v14, 920167782  ;;  %v1006_v49 = vsel %vm994_vm11, %v984_v53, %v987_v8 }
 0x1a3   : > { %v733_v27 = vmul.f32 %v732_v9, %v730_v62  ;;  %vm995_vm13 = vcmp.lt.s32.totalorder %v975_v28, 2  ;;  %v1004_v57 = vsel %vm996_vm7, %v987_v8, %v1003_v51  ;;  %v1007_v54 = vsel %vm997_vm2, %v993_v32, 1326507024 }
 0x1a4   : > { %v3796_v0 = vmin.u32 %v2420_v7, %v5180_v35  ;;  %v1001_v26 = vsel %vm995_vm13, %v998_v5, %v1000_v25  ;;  %v1005_v2 = vsel %vm995_vm13, %v1002_v1, %v1004_v57  ;;  %v1008_v20 = vsel %vm996_vm7, %v990_v14, %v1007_v54 }
 0x1a5   : > { %v734_v37 = vxor.u32 2147483648, %v733_v27  ;;  %v1009_v30 = vsel %vm995_vm13, %v1006_v49, %v1008_v20  ;;  %v5188_v4 = vmul.u32.u64.low %v5149_v63, %v1005_v2  ;;  %v5189_v23 = vmul.u32.u64.high %v5149_v63, %v1005_v2, %v5188_v4 }
 0x1a6   : > { %v2422_v47 = vclz %v3796_v0  ;;  %v5193_v53 = vmul.u32.u64.low %v5149_v63, %v1009_v30  ;;  %v5194_v9 = vmul.u32.u64.high %v5149_v63, %v1009_v30, %v5193_v53  ;;  %v2676_v8 = vadd.s32 1, %v3807_v21 }
 0x1a7   : > { %4032 = vsinq.f32 %v5108_v52  ;;  %v5201_v25 = vsel %vm5172_vm4, %v4742_v58, %v5145_v56  ;;  %vm5952_vm13 = vcmp.lt.s32.totalorder %v4883_v46, 0  ;;  %v2410_v49 = vadd.s32 %v5116_v40, %v5128_v43 }
 0x1a8   : > { %v3797_v1 = vadd.s32 4294967294, %v2422_v47  ;;  %vm2677_vm11 = vcmp.gt.s32.totalorder %v2676_v8, 0  ;;  %v5208_v28 = vmul.f32 %v4287_v24, %v5135_v34  ;;  %v5212_v52 = vsel %vm5952_vm13, %v734_v37, %v733_v27 }
 0x1a9   : > { %v1017_v21 = vmul.u32 %v5149_v63, %v1001_v26  ;;  %v1020_v56 = vadd.s32 1, %v5189_v23  ;;  %v2678_v7 = vsel %vm2677_vm11, %v2676_v8, 0  ;;  %vm1019_vm2 = vc.u32 %v5194_v9, %v5188_v4 }
 0x1aa   : > { %6042 = vst [vmem:[#allocation39_spill] sm:$0xff] %v5208_v28  ;;  %vm3798_vm7 = vcmp.lt.s32.totalorder %v3797_v1, 0  ;;  %v6043_v40 = vor.u32 8388608, %v5141_v41  ;;  %v5956_v24 = vand.u32 2147483647, %v5153_v48  ;;  %v2680_v32 = vand.u32 31, %v2678_v7 }
 0x1ab   : > { %v2425_v34 = vsel %vm3798_vm7, 0, %v3797_v1  ;;  %v1021_v14 = vsel %vm1019_vm2, %v1020_v56, %v5189_v23  ;;  %v861_v62 = vand.u32 2139095040, %v5153_v48  ;;  %v2679_v51 = vshrl.u32 %v2678_v7, 5 }
 0x1ac   : > { %v5220_v43 = vshll.u32 %v6043_v40, 8  ;;  %v2426_v63 = vsub.s32 32, %v2425_v34  ;;  %v2430_v5 = vsub.s32 4294967266, %v2425_v34  ;;  %v1022_v11 = vadd.s32 %v1021_v14, %v1017_v21 }
 0x1ad   : > { %v2427_v27 = vshll.u32 %v5180_v35, %v2425_v34  ;;  %v2681_v57 = vsub.s32 32, %v2680_v32  ;;  %v2683_v54 = vshll.u32 %v6001_v6, %v2680_v32  ;;  %v2686_v41 = vshll.u32 %v6003_v10, %v2680_v32 }
 0x1ae   : > { %v2428_v0 = vshrl.u32 %v2410_v49, %v2426_v63  ;;  %v2431_v26 = vadd.s32 127, %v2430_v5  ;;  %v1023_v2 = vadd.s32 536870912, %v1022_v11  ;;  %v2689_v20 = vshll.u32 %v6004_v50, %v2680_v32 }
 0x1af   : > { %v2684_v37 = vshrl.u32 %v6003_v10, %v2681_v57  ;;  %v2687_v30 = vshrl.u32 %v6004_v50, %v2681_v57  ;;  %v2690_v23 = vshrl.u32 %v6005_v45, %v2681_v57  ;;  %v2692_v47 = vshll.u32 %v6005_v45, %v2680_v32 }
 0x1b0   : > { %v2429_v53 = vor.u32 %v2428_v0, %v2427_v27  ;;  %v2432_v35 = vshll.u32 %v2431_v26, 23  ;;  %v5233_v8 = vshrl.u32 %v1023_v2, 30  ;;  %v2693_v1 = vshrl.u32 %v6020_v42, %v2681_v57 }
 0x1b1   : > { %v5236_v21 = vpop.eup %4032  ;;  %v2682_v49 = vshrl.u32 %v6001_v6, %v2681_v57  ;;  %v2685_v56 = vor.u32 %v2684_v37, %v2683_v54  ;;  %v2688_v7 = vor.u32 %v2687_v30, %v2686_v41  ;;  %v2691_v40 = vor.u32 %v2690_v23, %v2689_v20 }
 0x1b2   : > { %6044 = vst [vmem:[#allocation40_spill] sm:$0xff] %v5233_v8  ;;  %v2433_v34 = vor.u32 4788187, %v2432_v35  ;;  %v1025_v14 = vshll.u32 %v5233_v8, 30  ;;  %v2694_v63 = vor.u32 %v2693_v1, %v2692_v47  ;;  %v2695_v5 = vshll.u32 %v6020_v42, %v2680_v32 }
 0x1b3   : > { %v6045_v27 = vand.u32 2147483647, %v4883_v46  ;;  %v2436_v26 = vcvt.s32.f32 %v2429_v53  ;;  %v2696_v2 = vshrl.u32 %v6007_v31, %v2681_v57  ;;  %vm2698_vm7 = vcmp.lt.s32.totalorder %v2679_v51, 1 }
 0x1b4   : > { %vm2699_vm2 = vcmp.lt.s32.totalorder %v2679_v51, 2  ;;  %v2434_v54 = vand.u32 2147483647, %v2433_v34  ;;  %v5248_v41 = vsub.s32 %v1022_v11, %v1025_v14  ;;  %vm2700_vm13 = vcmp.lt.s32.totalorder %v2679_v51, 3 }
 0x1b5   : > { %vm5243_vm11 = vcmp.le.f32.partialorder %v6045_v27, 0.7853982  ;;  %vm2701_vm9 = vcmp.lt.s32.totalorder %v2679_v51, 4  ;;  %v2697_v20 = vor.u32 %v2696_v2, %v2695_v5  ;;  %v2706_v32 = vsel %vm2698_vm7, %v2685_v56, %v2688_v7 }
 0x1b6   : > { %v2703_v37 = vsel %vm2701_vm9, %v2691_v40, 2102212464  ;;  %v2707_v30 = vsel %vm2701_vm9, %v2694_v63, 920167782  ;;  %v2437_v23 = vmul.f32 %v2436_v26, %v2434_v54  ;;  %v1028_v47 = vsub.s32 0, %v5248_v41 }
 0x1b7   : > { %v2702_v35 = vsel %vm2698_vm7, %v2682_v49, %v2685_v56  ;;  %v2708_v53 = vsel %vm2700_vm13, %v2691_v40, %v2707_v30  ;;  %v2704_v57 = vsel %vm2700_vm13, %v2688_v7, %v2703_v37  ;;  %v2710_v11 = vsel %vm2698_vm7, %v2688_v7, %v2691_v40 }
 0x1b8   : > { %v2709_v1 = vsel %vm2699_vm2, %v2706_v32, %v2708_v53  ;;  %v2711_v34 = vsel %vm2701_vm9, %v2697_v20, 1326507024  ;;  %v2438_v14 = vxor.u32 2147483648, %v2437_v23  ;;  %v3744_v5 = vmin.u32 %v1028_v47, %v5248_v41 }
 0x1b9   : > { %v2712_v27 = vsel %vm2700_vm13, %v2694_v63, %v2711_v34  ;;  %v865_v26 = vand.u32 8388607, %v5956_v24  ;;  %v5263_v49 = vmul.u32.u64.low %v5220_v43, %v2709_v1  ;;  %v5264_v56 = vmul.u32.u64.high %v5220_v43, %v2709_v1, %v5263_v49 }
 0x1ba   : > { %v2713_v2 = vsel %vm2699_vm2, %v2710_v11, %v2712_v27  ;;  %v862_v54 = vshrl.u32 %v861_v62, 23  ;;  %v1030_v37 = vclz %v3744_v5  ;;  %v2705_v7 = vsel %vm2699_vm2, %v2702_v35, %v2704_v57 }
 0x1bb   : > { %v5269_v40 = vmul.u32.u64.low %v5220_v43, %v2713_v2  ;;  %v5270_v20 = vmul.u32.u64.high %v5220_v43, %v2713_v2, %v5269_v40  ;;  %4034 = vcosq.f32 %v5201_v25  ;;  %vm5954_vm9 = vcmp.lt.s32.totalorder %v4969_v19, 0 }
 0x1bc   : > { %v3739_v63 = vadd.s32 4294967169, %v862_v54  ;;  %v5955_v32 = vand.u32 2147483647, %v5208_v28  ;;  %4036 = vsinq.f32 %v5201_v25  ;;  %v5280_v62 = vsel %vm5243_vm11, %v4883_v46, %v5212_v52 }
 0x1bd   : > { %v3745_v51 = vadd.s32 4294967294, %v1030_v37  ;;  %v2565_v30 = vand.u32 2139095040, %v5208_v28  ;;  %v2439_v47 = vsel %vm5954_vm9, %v2438_v14, %v2437_v23  ;;  %v2721_v35 = vmul.u32 %v5220_v43, %v2705_v7 }
 0x1be   : > { %v2724_v53 = vadd.s32 1, %v5264_v56  ;;  %v868_v57 = vadd.s32 1, %v3739_v63  ;;  %vm2723_vm7 = vc.u32 %v5270_v20, %v5263_v49  ;;  %v866_v25 = vor.u32 8388608, %v865_v26 }
 0x1bf   : > { %vm3746_vm13 = vcmp.lt.s32.totalorder %v3745_v51, 0  ;;  %v2566_v1 = vshrl.u32 %v2565_v30, 23  ;;  %v5292_v34 = vand.u32 8388607, %v5955_v32  ;;  %v1018_v43 = vadd.s32 %v5188_v4, %v5194_v9 }
 0x1c0   : > { %v1033_v11 = vsel %vm3746_vm13, 0, %v3745_v51  ;;  %v2725_v52 = vsel %vm2723_vm7, %v2724_v53, %v5264_v56  ;;  %vm869_vm2 = vcmp.gt.s32.totalorder %v868_v57, 0  ;;  %4038 = vcosq.f32 %v5280_v62 }
 0x1c1   : > { %v1034_v23 = vsub.s32 32, %v1033_v11  ;;  %v1038_v14 = vsub.s32 4294967266, %v1033_v11  ;;  %v2726_v5 = vadd.s32 %v2725_v52, %v2721_v35  ;;  %v6048_v27 = vand.u32 2147483647, %v4969_v19 }
 0x1c2   : > { %v6049_v26 = vmov 0  ;;  %v870_v2 = vsel %vm869_vm2, %v868_v57, 0  ;;  %v3803_v56 = vadd.s32 4294967169, %v2566_v1  ;;  %v1035_v7 = vshll.u32 %v5248_v41, %v1033_v11 }
 0x1c3   : > { %vm5299_vm9 = vcmp.le.f32.partialorder %v6048_v27, 0.7853982  ;;  %v1036_v37 = vshrl.u32 %v1018_v43, %v1034_v23  ;;  %v1039_v4 = vadd.s32 127, %v1038_v14  ;;  %v2727_v9 = vadd.s32 536870912, %v2726_v5 }
 0x1c4   : > { %v6050_v26 = vsel %vm5299_vm9, 4294967295, %v6049_v26  ;;  %v5306_v54 = vsel %vm5299_vm9, %v4969_v19, %v2439_v47  ;;  %v872_v40 = vand.u32 31, %v870_v2  ;;  %v5309_v63 = vshll.u32 %v866_v25, 8 }
 0x1c5   : > { %v1040_v30 = vshll.u32 %v1039_v4, 23  ;;  %v5312_v35 = vshrl.u32 %v2727_v9, 30  ;;  %v871_v53 = vshrl.u32 %v870_v2, 5  ;;  %v424_v57 = vsub.s32 4, %v4764_v59  ;;  %v5315_v1 = vpop.eup %4034 }
 0x1c6   : > { %6052 = vst [vmem:[#allocation42_spill] sm:$0xff] %v5315_v1  ;;  %v1037_v47 = vor.u32 %v1036_v37, %v1035_v7  ;;  %v873_v52 = vsub.s32 32, %v872_v40  ;;  %v875_v43 = vshll.u32 %v6001_v6, %v872_v40  ;;  %v2572_v23 = vadd.s32 1, %v3803_v56  ;;  %v5318_v14 = vpop.eup %4036 }
 0x1c7   : > { %6051 = vst [vmem:[#allocation41_spill] sm:$0xff] %v5312_v35  ;;  %v1041_v41 = vor.u32 4788187, %v1040_v30  ;;  %v2729_v25 = vshll.u32 %v5312_v35, 30  ;;  %v878_v11 = vshll.u32 %v6003_v10, %v872_v40  ;;  %v881_v27 = vshll.u32 %v6004_v50, %v872_v40 }
 0x1c8   : > { %v876_v2 = vshrl.u32 %v6003_v10, %v873_v52  ;;  %v879_v4 = vshrl.u32 %v6004_v50, %v873_v52  ;;  %v882_v9 = vshrl.u32 %v6005_v45, %v873_v52  ;;  %v884_v37 = vshll.u32 %v6005_v45, %v872_v40 }
 0x1c9   : > { %v1042_v7 = vand.u32 2147483647, %v1041_v41  ;;  %v5327_v32 = vsub.s32 %v2726_v5, %v2729_v25  ;;  %v885_v56 = vshrl.u32 %v6020_v42, %v873_v52  ;;  %v887_v30 = vshll.u32 %v6020_v42, %v872_v40 }
 0x1ca   : > { %v877_v24 = vor.u32 %v876_v2, %v875_v43  ;;  %v880_v51 = vor.u32 %v879_v4, %v878_v11  ;;  %v883_v35 = vor.u32 %v882_v9, %v881_v27  ;;  %v888_v8 = vshrl.u32 %v6007_v31, %v873_v52  ;;  %v5336_v41 = vpop.eup %4038 }
 0x1cb   : > { %v1044_v18 = vcvt.s32.f32 %v1037_v47  ;;  %v2732_v1 = vsub.s32 0, %v5327_v32  ;;  %v886_v58 = vor.u32 %v885_v56, %v884_v37  ;;  %v425_v28 = vsel %vm340_vm3, %v424_v57, %v4764_v59 }
 0x1cc   : > { %v874_v5 = vshrl.u32 %v6001_v6, %v873_v52  ;;  %v889_v25 = vor.u32 %v888_v8, %v887_v30  ;;  %vm890_vm13 = vcmp.lt.s32.totalorder %v871_v53, 1  ;;  %vm893_vm7 = vcmp.lt.s32.totalorder %v871_v53, 4 }
 0x1cd   : > { %v5339_v40 = vmul.f32 %v1044_v18, %v1042_v7  ;;  %v3808_v43 = vmin.u32 %v2732_v1, %v5327_v32  ;;  %v895_v11 = vsel %vm893_vm7, %v883_v35, 2102212464  ;;  %v898_v47 = vsel %vm890_vm13, %v877_v24, %v880_v51 }
 0x1ce   : > { %vm892_vm2 = vcmp.lt.s32.totalorder %v871_v53, 3  ;;  %v899_v27 = vsel %vm893_vm7, %v886_v58, 920167782  ;;  %v902_v2 = vsel %vm890_vm13, %v880_v51, %v883_v35  ;;  %v903_v4 = vsel %vm893_vm7, %v889_v25, 1326507024 }
 0x1cf   : > { %v2734_v9 = vclz %v3808_v43  ;;  %vm891_vm4 = vcmp.lt.s32.totalorder %v871_v53, 2  ;;  %v894_v59 = vsel %vm890_vm13, %v874_v5, %v877_v24  ;;  %v900_v57 = vsel %vm892_vm2, %v883_v35, %v899_v27 }
 0x1d0   : > { %v896_v37 = vsel %vm892_vm2, %v880_v51, %v895_v11  ;;  %v901_v56 = vsel %vm891_vm4, %v898_v47, %v900_v57  ;;  %v904_v52 = vsel %vm892_vm2, %v886_v58, %v903_v4  ;;  %vm2573_vm3 = vcmp.gt.s32.totalorder %v2572_v23, 0 }
 0x1d1   : > { %v3809_v8 = vadd.s32 4294967294, %v2734_v9  ;;  %v905_v30 = vsel %vm891_vm4, %v902_v2, %v904_v52  ;;  %v5343_v18 = vmul.u32.u64.low %v5309_v63, %v901_v56  ;;  %v5344_v7 = vmul.u32.u64.high %v5309_v63, %v901_v56, %v5343_v18 }
 0x1d2   : > { %4040 = vsinq.f32 %v5280_v62  ;;  %v5349_v1 = vmul.u32.u64.low %v5309_v63, %v905_v30  ;;  %v5350_v25 = vmul.u32.u64.high %v5309_v63, %v905_v30, %v5349_v1  ;;  %v2574_v53 = vsel %vm2573_vm3, %v2572_v23, 0 }
 0x1d3   : > { %4042 = vcosq.f32 %v5306_v54  ;;  %vm3810_vm13 = vcmp.lt.s32.totalorder %v3809_v8, 0  ;;  %v897_v24 = vsel %vm891_vm4, %v894_v59, %v896_v37  ;;  %v2576_v58 = vand.u32 31, %v2574_v53 }
 0x1d4   : > { %4044 = vsinq.f32 %v5306_v54  ;;  %v5354_v51 = vsel %vm3810_vm13, 0, %v3809_v8  ;;  %v5358_v35 = vsel %vm4915_vm8, 0, %v425_v28  ;;  %v1046_v62 = vxor.u32 2147483648, %v5339_v40 }
 0x1d5   : > { %v2722_v5 = vadd.s32 %v5263_v49, %v5270_v20  ;;  %v916_v23 = vadd.s32 1, %v5344_v7  ;;  %v6053_v43 = vor.u32 8388608, %v5292_v34  ;;  %v913_v47 = vmul.u32 %v5309_v63, %v897_v24 }
 0x1d6   : > { %vm915_vm4 = vc.u32 %v5350_v25, %v5343_v18  ;;  %v2575_v54 = vshrl.u32 %v2574_v53, 5  ;;  %v2577_v13 = vsub.s32 32, %v2576_v58  ;;  %v2742_v28 = vsub.s32 4294967266, %v5354_v51 }
 0x1d7   : > { %v5366_v11 = vshll.u32 %v6053_v43, 8  ;;  %v917_v27 = vsel %vm915_vm4, %v916_v23, %v5344_v7  ;;  %v431_v2 = vadd.s32 3, %v5358_v35  ;;  %v435_v49 = vxor.u32 2147483648, %v5013_v60 }
 0x1d8   : > { %v918_v20 = vadd.s32 %v917_v27, %v913_v47  ;;  %v2579_v34 = vshll.u32 %v6001_v6, %v2576_v58  ;;  %v2580_v4 = vshrl.u32 %v6003_v10, %v2577_v13  ;;  %v2583_v63 = vshrl.u32 %v6004_v50, %v2577_v13 }
 0x1d9   : > { %v2582_v9 = vshll.u32 %v6003_v10, %v2576_v58  ;;  %v2585_v59 = vshll.u32 %v6004_v50, %v2576_v58  ;;  %v2586_v57 = vshrl.u32 %v6005_v45, %v2577_v13  ;;  %v438_v37 = vxor.u32 2147483648, %v5007_v17 }
 0x1da   : > { %v2738_v56 = vsub.s32 32, %v5354_v51  ;;  %v2739_v52 = vshll.u32 %v5327_v32, %v5354_v51  ;;  %v919_v8 = vadd.s32 536870912, %v918_v20  ;;  %v2581_v30 = vor.u32 %v2580_v4, %v2579_v34 }
 0x1db   : > { %v2584_v7 = vor.u32 %v2583_v63, %v2582_v9  ;;  %v2587_v1 = vor.u32 %v2586_v57, %v2585_v59  ;;  %v2588_v53 = vshll.u32 %v6005_v45, %v2576_v58  ;;  %v2589_v24 = vshrl.u32 %v6020_v42, %v2577_v13 }
 0x1dc   : > { %v5387_v10 = vpop.eup %4040  ;;  %v2743_v50 = vadd.s32 127, %v2742_v28  ;;  %v5389_v23 = vshrl.u32 %v919_v8, 30  ;;  %v2591_v43 = vshll.u32 %v6020_v42, %v2576_v58  ;;  %v2592_v47 = vshrl.u32 %v6007_v31, %v2577_v13 }
 0x1dd   : > { %v5393_v27 = vpop.eup %4042  ;;  %v2578_v32 = vshrl.u32 %v6001_v6, %v2577_v13  ;;  %v2590_v51 = vor.u32 %v2589_v24, %v2588_v53  ;;  %vm2594_vm8 = vcmp.lt.s32.totalorder %v2575_v54, 1  ;;  %vm2595_vm7 = vcmp.lt.s32.totalorder %v2575_v54, 2 }
 0x1de   : > { %v5396_v34 = vpop.eup %4044  ;;  %v921_v45 = vshll.u32 %v5389_v23, 30  ;;  %v2593_v4 = vor.u32 %v2592_v47, %v2591_v43  ;;  %vm2596_vm2 = vcmp.lt.s32.totalorder %v2575_v54, 3  ;;  %vm2597_vm3 = vcmp.lt.s32.totalorder %v2575_v54, 4 }
 0x1df   : > { %v2598_v28 = vsel %vm2594_vm8, %v2578_v32, %v2581_v30  ;;  %v2599_v63 = vsel %vm2597_vm3, %v2587_v1, 2102212464  ;;  %v2602_v9 = vsel %vm2594_vm8, %v2581_v30, %v2584_v7  ;;  %v2603_v42 = vsel %vm2597_vm3, %v2590_v51, 920167782 }
 0x1e0   : > { %v5399_v58 = vsub.s32 %v918_v20, %v921_v45  ;;  %v2600_v31 = vsel %vm2596_vm2, %v2584_v7, %v2599_v63  ;;  %v2604_v6 = vsel %vm2596_vm2, %v2587_v1, %v2603_v42  ;;  %v2606_v13 = vsel %vm2594_vm8, %v2584_v7, %v2587_v1 }
 0x1e1   : > { %v2740_v59 = vshrl.u32 %v2722_v5, %v2738_v56  ;;  %v914_v57 = vadd.s32 %v5343_v18, %v5350_v25  ;;  %v2605_v8 = vsel %vm2595_vm7, %v2602_v9, %v2604_v6  ;;  %v2607_v53 = vsel %vm2597_vm3, %v2593_v4, 1326507024 }
 0x1e2   : > { %v924_v24 = vsub.s32 0, %v5399_v58  ;;  %v2608_v30 = vsel %vm2596_vm2, %v2590_v51, %v2607_v53  ;;  %v5410_v20 = vmul.u32.u64.low %v5366_v11, %v2605_v8  ;;  %v5411_v43 = vmul.u32.u64.high %v5366_v11, %v2605_v8, %v5410_v20  ;;  %v1903_v53 = vpop.permute.xlu1 %1902 }
 0x1e3   : > { %v2744_v47 = vshll.u32 %v2743_v50, 23  ;;  %v2601_v5 = vsel %vm2595_vm7, %v2598_v28, %v2600_v31  ;;  %v2609_v18 = vsel %vm2595_vm7, %v2606_v13, %v2608_v30  ;;  %v432_v25 = vand.u32 3, %v431_v2 }
 0x1e4   : > { %v3740_v56 = vmin.u32 %v924_v24, %v5399_v58  ;;  %v5418_v7 = vmul.u32.u64.low %v5366_v11, %v2609_v18  ;;  %v5419_v1 = vmul.u32.u64.high %v5366_v11, %v2609_v18, %v5418_v7  ;;  %v1262_v32 = vand.u32 3, %v5358_v35 }
 0x1e5   : > { %v5422_v51 = vor.u32 %v2740_v59, %v2739_v52  ;;  %vm433_vm4 = vcmp.lt.s32.totalorder %v432_v25, 2  ;;  %vm434_vm8 = vcmp.eq.s32.totalorder %v432_v25, 0  ;;  %vm437_vm2 = vcmp.eq.s32.totalorder %v432_v25, 2 }
 0x1e6   : > { %v926_v50 = vclz %v3740_v56  ;;  %v2620_v45 = vadd.s32 1, %v5411_v43  ;;  %v436_v54 = vsel %vm434_vm8, %v5007_v17, %v435_v49  ;;  %v439_v2 = vsel %vm437_vm2, %v438_v37, %v5013_v60 }
 0x1e7   : > { %v5431_v4 = vor.u32 4788187, %v2744_v47  ;;  %v2617_v35 = vmul.u32 %v5366_v11, %v2601_v5  ;;  %v440_v52 = vsel %vm433_vm4, %v436_v54, %v439_v2  ;;  %vm1263_vm7 = vcmp.lt.s32.totalorder %v1262_v32, 2 }
 0x1e8   : > { %v3741_v28 = vadd.s32 4294967294, %v926_v50  ;;  %vm2619_vm3 = vc.u32 %v5419_v1, %v5410_v20  ;;  %vm1264_vm13 = vcmp.eq.s32.totalorder %v1262_v32, 0  ;;  %vm1267_vm10 = vcmp.eq.s32.totalorder %v1262_v32, 2 }
 0x1e9   : > { %v2621_v63 = vsel %vm2619_vm3, %v2620_v45, %v5411_v43  ;;  %v1266_v9 = vsel %vm1264_vm13, %v5007_v17, %v435_v49  ;;  %v1269_v42 = vsel %vm1267_vm10, %v438_v37, %v5013_v60  ;;  %v2128_v11 = vsub.s32 4, %v4832_v15 }
 0x1ea   : > { %vm3742_vm4 = vcmp.lt.s32.totalorder %v3741_v28, 0  ;;  %v2622_v31 = vadd.s32 %v2621_v63, %v2617_v35  ;;  %vm6054_vm8 = vweird.f32 %v4592_v12  ;;  %v1270_v13 = vsel %vm1263_vm7, %v1266_v9, %v1269_v42 }
 0x1eb   : > { %v441_v6 = vsel %vm6054_vm8, nan, %v440_v52  ;;  %v2748_v59 = vcvt.s32.f32 %v5422_v51  ;;  %v929_v8 = vsel %vm3742_vm4, 0, %v3741_v28  ;;  %vm6055_vm13 = vmmov %vm6054_vm8  ;;  %vm6056_vm10 = vcmp.lt.s32.totalorder %v4611_v36, 0 }
 0x1ec   : > { %v1271_v49 = vsel %vm6055_vm13, nan, %v1270_v13  ;;  %v2129_v17 = vsel %vm6056_vm10, %v2128_v11, %v4832_v15  ;;  %v930_v60 = vsub.s32 32, %v929_v8  ;;  %v934_v37 = vsub.s32 4294967266, %v929_v8 }
 0x1ed   : > { %v2623_v24 = vadd.s32 536870912, %v2622_v31  ;;  %vm5969_vm2 = vcmp.eq.s32.totalorder %v1903_v53, 1  ;;  %v2131_v43 = vsel %vm4938_vm6, 0, %v2129_v17  ;;  %vm2134_vm7 = vweird.f32 %v4611_v36 }
 0x1ee   : > { %v1931_v30 = vsel %vm5969_vm2, %v441_v6, %v1271_v49  ;;  %v2139_v47 = vxor.u32 2147483648, %v5031_v38  ;;  %v320_v12 = vsub.s32 4, %v4482_v33  ;;  %v932_v5 = vshrl.u32 %v914_v57, %v930_v60 }
 0x1ef   : > { %v935_v18 = vadd.s32 127, %v934_v37  ;;  %v5461_v25 = vshrl.u32 %v2623_v24, 30  ;;  %v2135_v15 = vadd.s32 3, %v2131_v43  ;;  %3603 = vst [vmem:[%s5463_s8 + $0x8] sm:$0xff] %v1931_v30  ;;  %v931_v56 = vshll.u32 %v5399_v58, %v929_v8 }
 0x1f0   : > { %v2142_v22 = vxor.u32 2147483648, %v5026_v44  ;;  %v2966_v7 = vand.u32 3, %v2131_v43  ;;  %vm6057_vm6 = vcmp.lt.s32.totalorder %v4296_v29, 0  ;;  %v331_v54 = vxor.u32 2147483648, %v4829_v55 }
 0x1f1   : > { %v321_v32 = vsel %vm6057_vm6, %v320_v12, %v4482_v33  ;;  %v936_v50 = vshll.u32 %v935_v18, 23  ;;  %v2625_v57 = vshll.u32 %v5461_v25, 30  ;;  %v2136_v45 = vand.u32 3, %v2135_v15 }
 0x1f2   : > { %v933_v2 = vor.u32 %v932_v5, %v931_v56  ;;  %vm2967_vm3 = vcmp.lt.s32.totalorder %v2966_v7, 2  ;;  %vm2968_vm4 = vcmp.eq.s32.totalorder %v2966_v7, 0  ;;  %vm2971_vm8 = vcmp.eq.s32.totalorder %v2966_v7, 2 }
 0x1f3   : > { %v937_v35 = vor.u32 4788187, %v936_v50  ;;  %v5473_v52 = vsub.s32 %v2622_v31, %v2625_v57  ;;  %vm2137_vm13 = vcmp.lt.s32.totalorder %v2136_v45, 2  ;;  %v323_v58 = vsel %vm4636_vm0, 0, %v321_v32 }
 0x1f4   : > { %vm2138_vm10 = vcmp.eq.s32.totalorder %v2136_v45, 0  ;;  %vm2141_vm2 = vcmp.eq.s32.totalorder %v2136_v45, 2  ;;  %v2970_v33 = vsel %vm2968_vm4, %v5026_v44, %v2139_v47  ;;  %v2973_v28 = vsel %vm2971_vm8, %v2142_v22, %v5031_v38 }
 0x1f5   : > { %v938_v63 = vand.u32 2147483647, %v937_v35  ;;  %v2628_v9 = vsub.s32 0, %v5473_v52  ;;  %v2140_v42 = vsel %vm2138_vm10, %v5026_v44, %v2139_v47  ;;  %v2143_v11 = vsel %vm2141_vm2, %v2142_v22, %v5031_v38  ;;  %v5494_v47 = vpop.permute.xlu0 %1899 }
 0x1f6   : > { %v940_v31 = vcvt.s32.f32 %v933_v2  ;;  %v2144_v6 = vsel %vm2137_vm13, %v2140_v42, %v2143_v11  ;;  %v2974_v13 = vsel %vm2967_vm3, %v2970_v33, %v2973_v28  ;;  %v327_v3 = vadd.s32 3, %v323_v58 }
 0x1f7   : > { %v3804_v8 = vmin.u32 %v2628_v9, %v5473_v52  ;;  %v2145_v49 = vsel %vm2134_vm7, nan, %v2144_v6  ;;  %v2975_v17 = vsel %vm2134_vm7, nan, %v2974_v13  ;;  %v334_v60 = vxor.u32 2147483648, %v4769_v16 }
 0x1f8   : > { %v2746_v44 = vand.u32 2147483647, %v5431_v4  ;;  %vm6058_vm0 = vcmp.eq.s32.totalorder %v1903_v53, 1  ;;  %v328_v38 = vand.u32 3, %v327_v3  ;;  %v1159_v24 = vand.u32 3, %v323_v58  ;;  %v6063_v58 = vld [vmem:[#allocation26_spill] sm:$0xff] }
 0x1f9   : > { %v3595_v37 = vsel %vm6058_vm0, %v2145_v49, %v2975_v17  ;;  %v5491_v30 = vmul.f32 %v940_v31, %v938_v63  ;;  %v2630_v43 = vclz %v3804_v8  ;;  %v2024_v12 = vsub.s32 4, %v4541_v61 }
 0x1fa   : > { %3611 = vst [vmem:[%s5463_s8 + $0x48] sm:$0xff] %v3595_v37  ;;  %vm329_vm6 = vcmp.lt.s32.totalorder %v328_v38, 2  ;;  %vm330_vm7 = vcmp.eq.s32.totalorder %v328_v38, 0  ;;  %vm333_vm3 = vcmp.eq.s32.totalorder %v328_v38, 2  ;;  %vm1922_vm4 = vcmp.eq.s32.totalorder %v5494_v47, 1 }
 0x1fb   : > { %v3805_v36 = vadd.s32 4294967294, %v2630_v43  ;;  %v332_v4 = vsel %vm330_vm7, %v4769_v16, %v331_v54  ;;  %v335_v53 = vsel %vm333_vm3, %v334_v60, %v4829_v55  ;;  %vm1160_vm8 = vcmp.lt.s32.totalorder %v1159_v24, 2 }
 0x1fc   : > { %v336_v5 = vsel %vm329_vm6, %v332_v4, %v335_v53  ;;  %vm1161_vm13 = vcmp.eq.s32.totalorder %v1159_v24, 0  ;;  %vm1164_vm10 = vcmp.eq.s32.totalorder %v1159_v24, 2  ;;  %vm6059_vm0 = vcmp.lt.s32.totalorder %v4308_v39, 0  ;;  %v6066_v24 = vld [vmem:[#allocation5_spill] sm:$0xff]  ;;  %v6069_v53 = vld [vmem:[#allocation15_spill] sm:$0xff] }
 0x1fd   : > { %v2025_v18 = vsel %vm6059_vm0, %v2024_v12, %v4541_v61  ;;  %vm3806_vm2 = vcmp.lt.s32.totalorder %v3805_v36, 0  ;;  %vm6060_vm9 = vweird.f32 %v4296_v29  ;;  %v1163_v56 = vsel %vm1161_vm13, %v4769_v16, %v331_v54  ;;  %v6065_v29 = vld [vmem:[#allocation7_spill] sm:$0xff] }
 0x1fe   : > { %v337_v15 = vsel %vm6060_vm9, nan, %v336_v5  ;;  %v1166_v22 = vsel %vm1164_vm10, %v334_v60, %v4829_v55  ;;  %v2618_v7 = vadd.s32 %v5410_v20, %v5419_v1  ;;  %v2633_v32 = vsel %vm3806_vm2, 0, %v3805_v36  ;;  %vm6062_vm7 = vmmov %vm6060_vm9  ;;  %v6064_v20 = vld [vmem:[#allocation23_spill] sm:$0xff] }
 0x1ff   : > { %v1167_v50 = vsel %vm1160_vm8, %v1163_v56, %v1166_v22  ;;  %v2027_v45 = vsel %vm4698_vm14, 0, %v2025_v18  ;;  %vm860_vm6 = vcmp.lt.s32.totalorder %v5153_v48, 0  ;;  %v2634_v61 = vsub.s32 32, %v2633_v32  ;;  %v6070_v18 = vld [vmem:[#allocation14_spill] sm:$0xff] }
 0x200   : > { %v2638_v2 = vsub.s32 4294967266, %v2633_v32  ;;  %v1168_v35 = vsel %vm6062_vm7, nan, %v1167_v50  ;;  %v2035_v16 = vxor.u32 2147483648, %v6063_v58  ;;  %v2031_v54 = vadd.s32 3, %v2027_v45 }
 0x201   : > { %v1930_v55 = vsel %vm1922_vm4, %v337_v15, %v1168_v35  ;;  %v2038_v1 = vxor.u32 2147483648, %v6064_v20  ;;  %v2863_v33 = vand.u32 3, %v2027_v45  ;;  %v942_v28 = vxor.u32 2147483648, %v5491_v30  ;;  %v6072_v45 = vld [vmem:[#allocation6_spill] sm:$0xff]  ;;  %v6074_v35 = vld [vmem:[#allocation21_spill] sm:$0xff] }
 0x202   : > { %v2635_v63 = vshll.u32 %v5473_v52, %v2633_v32  ;;  %v2636_v9 = vshrl.u32 %v2618_v7, %v2634_v61  ;;  %v2639_v42 = vadd.s32 127, %v2638_v2  ;;  %3602 = vst [vmem:[%s5463_s8] sm:$0xff] %v1930_v55  ;;  %v2032_v11 = vand.u32 3, %v2031_v54  ;;  %v1906_v7 = vpop.permute.xlu1 %1905  ;;  %v6071_v32 = vld [vmem:[#allocation8_spill] sm:$0xff] }
 0x203   : > { %vm2865_vm14 = vcmp.eq.s32.totalorder %v2863_v33, 0  ;;  %vm2868_vm9 = vcmp.eq.s32.totalorder %v2863_v33, 2  ;;  %v528_v31 = vsub.s32 4, %v6065_v29  ;;  %vm2030_vm2 = vweird.f32 %v4308_v39 }
 0x204   : > { %vm2864_vm3 = vcmp.lt.s32.totalorder %v2863_v33, 2  ;;  %v2867_v6 = vsel %vm2865_vm14, %v6064_v20, %v2035_v16  ;;  %v2870_v13 = vsel %vm2868_vm9, %v2038_v1, %v6063_v58  ;;  %v5526_v3 = vor.u32 %v2636_v9, %v2635_v63  ;;  %v6077_v9 = vld [vmem:[#allocation13_spill] sm:$0xff] }
 0x205   : > { %vm2034_vm8 = vcmp.eq.s32.totalorder %v2032_v11, 0  ;;  %vm2037_vm13 = vcmp.eq.s32.totalorder %v2032_v11, 2  ;;  %v2871_v52 = vsel %vm2864_vm3, %v2867_v6, %v2870_v13  ;;  %v2640_v8 = vshll.u32 %v2639_v42, 23 }
 0x206   : > { %vm2033_vm10 = vcmp.lt.s32.totalorder %v2032_v11, 2  ;;  %v2036_v49 = vsel %vm2034_vm8, %v6064_v20, %v2035_v16  ;;  %v2039_v17 = vsel %vm2037_vm13, %v2038_v1, %v6063_v58  ;;  %v5532_v60 = vmul.f32 %v2748_v59, %v2746_v44 }
 0x207   : > { %v2040_v37 = vsel %vm2033_vm10, %v2036_v49, %v2039_v17  ;;  %v2872_v38 = vsel %vm2030_vm2, nan, %v2871_v52  ;;  %vm6067_vm0 = vcmp.lt.s32.totalorder %v6066_v24, 0  ;;  %v539_v5 = vxor.u32 2147483648, %v6069_v53  ;;  %v6078_v52 = vld [vmem:[#allocation9_spill] sm:$0xff]  ;;  %v6080_v49 = vld [vmem:[#allocation28_spill] sm:$0xff] }
 0x208   : > { %v529_v43 = vsel %vm6067_vm0, %v528_v31, %v6065_v29  ;;  %v2041_v12 = vsel %vm2030_vm2, nan, %v2040_v37  ;;  %v542_v51 = vxor.u32 2147483648, %v6070_v18  ;;  %v5548_v59 = vsel %vm860_vm6, %v942_v28, %v5491_v30  ;;  %v6076_v28 = vld [vmem:[#allocation16_spill] sm:$0xff] }
 0x209   : > { %v531_v4 = vsel %vm4548_vm5, 0, %v529_v43  ;;  %v3594_v44 = vsel %vm1922_vm4, %v2041_v12, %v2872_v38  ;;  %v5552_v22 = vor.u32 4788187, %v2640_v8  ;;  %v2644_v39 = vcvt.s32.f32 %v5526_v3  ;;  %v6081_v38 = vld [vmem:[#allocation27_spill] sm:$0xff] }
 0x20a   : > { %v535_v15 = vadd.s32 3, %v531_v4  ;;  %v1365_v56 = vand.u32 3, %v531_v4  ;;  %3610 = vst [vmem:[%s5463_s8 + $0x40] sm:$0xff] %v3594_v44  ;;  %vm534_vm5 = vweird.f32 %v6066_v24  ;;  %v2232_v50 = vsub.s32 4, %v6071_v32  ;;  %v5592_v44 = vpop.permute.xlu0 %1908 }
 0x20b   : > { %vm1924_vm9 = vcmp.eq.s32.totalorder %v1906_v7, 1  ;;  %vm6073_vm4 = vcmp.lt.s32.totalorder %v6072_v45, 0  ;;  %v2243_v58 = vxor.u32 2147483648, %v6074_v35  ;;  %v2246_v63 = vxor.u32 2147483648, %v6076_v28 }
 0x20c   : > { %v536_v57 = vand.u32 3, %v535_v15  ;;  %vm1367_vm7 = vcmp.eq.s32.totalorder %v1365_v56, 0  ;;  %vm1370_vm14 = vcmp.eq.s32.totalorder %v1365_v56, 2  ;;  %vm1366_vm2 = vcmp.lt.s32.totalorder %v1365_v56, 2 }
 0x20d   : > { %v1369_v30 = vsel %vm1367_vm7, %v6070_v18, %v539_v5  ;;  %v1372_v47 = vsel %vm1370_vm14, %v542_v51, %v6069_v53  ;;  %v2233_v61 = vsel %vm6073_vm4, %v2232_v50, %v6071_v32  ;;  %v632_v42 = vsub.s32 4, %v6077_v9  ;;  %v6083_v32 = vld [vmem:[#allocation17_spill] sm:$0xff] }
 0x20e   : > { %vm538_vm3 = vcmp.eq.s32.totalorder %v536_v57, 0  ;;  %vm541_vm8 = vcmp.eq.s32.totalorder %v536_v57, 2  ;;  %v1373_v2 = vsel %vm1366_vm2, %v1369_v30, %v1372_v47  ;;  %vm537_vm13 = vcmp.lt.s32.totalorder %v536_v57, 2  ;;  %v6084_v47 = vld [vmem:[#allocation31_spill] sm:$0xff] }
 0x20f   : > { %v540_v16 = vsel %vm538_vm3, %v6070_v18, %v539_v5  ;;  %v543_v55 = vsel %vm541_vm8, %v542_v51, %v6069_v53  ;;  %v1374_v54 = vsel %vm534_vm5, nan, %v1373_v2  ;;  %v2235_v33 = vsel %vm4586_vm12, 0, %v2233_v61  ;;  %v6085_v2 = vld [vmem:[#allocation29_spill] sm:$0xff] }
 0x210   : > { %v544_v20 = vsel %vm537_vm13, %v540_v16, %v543_v55  ;;  %v2642_v11 = vand.u32 2147483647, %v5552_v22  ;;  %v2239_v31 = vadd.s32 3, %v2235_v33  ;;  %v3069_v6 = vand.u32 3, %v2235_v33 }
 0x211   : > { %v545_v29 = vsel %vm534_vm5, nan, %v544_v20  ;;  %vm2238_vm10 = vweird.f32 %v6072_v45  ;;  %vm6079_vm0 = vcmp.lt.s32.totalorder %v6078_v52, 0  ;;  %v643_v17 = vxor.u32 2147483648, %v6080_v49  ;;  %v6086_v20 = vld [vmem:[#allocation10_spill] sm:$0xff] }
 0x212   : > { %v1932_v13 = vsel %vm1924_vm9, %v545_v29, %v1374_v54  ;;  %v633_v8 = vsel %vm6079_vm0, %v632_v42, %v6077_v9  ;;  %v2240_v37 = vand.u32 3, %v2239_v31  ;;  %vm3071_vm12 = vcmp.eq.s32.totalorder %v3069_v6, 0  ;;  %v6089_v9 = vld [vmem:[#allocation35_spill] sm:$0xff] }
 0x213   : > { %vm3074_vm7 = vcmp.eq.s32.totalorder %v3069_v6, 2  ;;  %3604 = vst [vmem:[%s5463_s8 + $0x10] sm:$0xff] %v1932_v13  ;;  %v646_v43 = vxor.u32 2147483648, %v6081_v38  ;;  %vm3070_vm14 = vcmp.lt.s32.totalorder %v3069_v6, 2  ;;  %v3073_v24 = vsel %vm3071_vm12, %v6076_v28, %v2243_v58 }
 0x214   : > { %v3076_v12 = vsel %vm3074_vm7, %v2246_v63, %v6074_v35  ;;  %v635_v4 = vsel %vm4778_vm15, 0, %v633_v8  ;;  %vm638_vm5 = vweird.f32 %v6078_v52  ;;  %vm2241_vm2 = vcmp.lt.s32.totalorder %v2240_v37, 2 }
 0x215   : > { %vm2242_vm4 = vcmp.eq.s32.totalorder %v2240_v37, 0  ;;  %vm2245_vm3 = vcmp.eq.s32.totalorder %v2240_v37, 2  ;;  %v3077_v53 = vsel %vm3070_vm14, %v3073_v24, %v3076_v12  ;;  %v639_v15 = vadd.s32 3, %v635_v4 }
 0x216   : > { %v2244_v5 = vsel %vm2242_vm4, %v6076_v28, %v2243_v58  ;;  %v2247_v18 = vsel %vm2245_vm3, %v2246_v63, %v6074_v35  ;;  %v3078_v51 = vsel %vm2238_vm10, nan, %v3077_v53  ;;  %v1468_v22 = vand.u32 3, %v635_v4  ;;  %v1912_v53 = vpop.permute.xlu1 %1911  ;;  %v6095_v28 = vld [vmem:[#allocation19_spill] sm:$0xff] }
 0x217   : > { %v2248_v56 = vsel %vm2241_vm2, %v2244_v5, %v2247_v18  ;;  %vm1925_vm15 = vcmp.eq.s32.totalorder %v5592_v44, 1  ;;  %v2336_v50 = vsub.s32 4, %v6083_v32  ;;  %v640_v30 = vand.u32 3, %v639_v15  ;;  %v6091_v18 = vld [vmem:[#allocation36_spill] sm:$0xff] }
 0x218   : > { %v2249_v57 = vsel %vm2238_vm10, nan, %v2248_v56  ;;  %v2347_v61 = vxor.u32 2147483648, %v6084_v47  ;;  %v2350_v35 = vxor.u32 2147483648, %v6085_v2  ;;  %vm1469_vm8 = vcmp.lt.s32.totalorder %v1468_v22, 2 }
 0x219   : > { %v3596_v58 = vsel %vm1924_vm9, %v2249_v57, %v3078_v51  ;;  %vm1470_vm13 = vcmp.eq.s32.totalorder %v1468_v22, 0  ;;  %vm1473_vm0 = vcmp.eq.s32.totalorder %v1468_v22, 2  ;;  %vm641_vm12 = vcmp.lt.s32.totalorder %v640_v30, 2 }
 0x21a   : > { %3612 = vst [vmem:[%s5463_s8 + $0x50] sm:$0xff] %v3596_v58  ;;  %vm642_vm7 = vcmp.eq.s32.totalorder %v640_v30, 0  ;;  %vm645_vm14 = vcmp.eq.s32.totalorder %v640_v30, 2  ;;  %v1472_v16 = vsel %vm1470_vm13, %v6081_v38, %v643_v17  ;;  %v1475_v54 = vsel %vm1473_vm0, %v646_v43, %v6080_v49 }
 0x21b   : > { %v644_v55 = vsel %vm642_vm7, %v6081_v38, %v643_v17  ;;  %v647_v45 = vsel %vm645_vm14, %v646_v43, %v6080_v49  ;;  %vm6087_vm10 = vcmp.lt.s32.totalorder %v6086_v20, 0  ;;  %v1476_v33 = vsel %vm1469_vm8, %v1472_v16, %v1475_v54 }
 0x21c   : > { %v2337_v7 = vsel %vm6087_vm10, %v2336_v50, %v6083_v32  ;;  %v648_v1 = vsel %vm641_vm12, %v644_v55, %v647_v45  ;;  %v736_v42 = vsub.s32 4, %v6089_v9  ;;  %v1477_v31 = vsel %vm638_vm5, nan, %v1476_v33 }
 0x21d   : > { %v2339_v63 = vsel %vm4868_vm1, 0, %v2337_v7  ;;  %v649_v29 = vsel %vm638_vm5, nan, %v648_v1  ;;  %v5618_v8 = vmul.f32 %v2644_v39, %v2642_v11  ;;  %vm2342_vm9 = vweird.f32 %v6086_v20  ;;  %v6094_v20 = vld [vmem:[#allocation25_spill] sm:$0xff] }
 0x21e   : > { %v2343_v6 = vadd.s32 3, %v2339_v63  ;;  %v3172_v13 = vand.u32 3, %v2339_v63  ;;  %v1933_v49 = vsel %vm1925_vm15, %v649_v29, %v1477_v31  ;;  %vm6090_vm1 = vcmp.lt.s32.totalorder %v4883_v46, 0 }
 0x21f   : > { %v737_v17 = vsel %vm6090_vm1, %v736_v42, %v6089_v9  ;;  %3605 = vst [vmem:[%s5463_s8 + $0x18] sm:$0xff] %v1933_v49  ;;  %v747_v52 = vxor.u32 2147483648, %v5387_v10  ;;  %vm742_vm3 = vweird.f32 %v4883_v46  ;;  %v750_v0 = vxor.u32 2147483648, %v5336_v41 }
 0x220   : > { %v2344_v37 = vand.u32 3, %v2343_v6  ;;  %vm3174_vm2 = vcmp.eq.s32.totalorder %v3172_v13, 0  ;;  %vm3177_vm4 = vcmp.eq.s32.totalorder %v3172_v13, 2  ;;  %vm3173_vm5 = vcmp.lt.s32.totalorder %v3172_v13, 2  ;;  %v6097_v6 = vld [vmem:[#allocation34_spill] sm:$0xff] }
 0x221   : > { %v3176_v3 = vsel %vm3174_vm2, %v6085_v2, %v2347_v61  ;;  %v3179_v39 = vsel %vm3177_vm4, %v2350_v35, %v6084_v47  ;;  %v739_v11 = vsel %vm5243_vm11, 0, %v737_v17  ;;  %v2440_v51 = vsub.s32 4, %v6091_v18  ;;  %v1915_v17 = vpop.permute.xlu0 %1914 }
 0x222   : > { %vm2345_vm8 = vcmp.lt.s32.totalorder %v2344_v37, 2  ;;  %vm2346_vm13 = vcmp.eq.s32.totalorder %v2344_v37, 0  ;;  %vm2349_vm0 = vcmp.eq.s32.totalorder %v2344_v37, 2  ;;  %v3180_v38 = vsel %vm3173_vm5, %v3176_v3, %v3179_v39 }
 0x223   : > { %v2348_v43 = vsel %vm2346_vm13, %v6085_v2, %v2347_v61  ;;  %v2351_v24 = vsel %vm2349_vm0, %v2350_v35, %v6084_v47  ;;  %v3181_v12 = vsel %vm2342_vm9, nan, %v3180_v38  ;;  %v743_v36 = vadd.s32 3, %v739_v11 }
 0x224   : > { %v2352_v4 = vsel %vm2345_vm8, %v2348_v43, %v2351_v24  ;;  %v1571_v5 = vand.u32 3, %v739_v11  ;;  %vm1926_vm11 = vcmp.eq.s32.totalorder %v1912_v53, 1  ;;  %v2451_v22 = vxor.u32 2147483648, %v5396_v34 }
 0x225   : > { %v2353_v15 = vsel %vm2342_vm9, nan, %v2352_v4  ;;  %v744_v56 = vand.u32 3, %v743_v36  ;;  %vm6092_vm9 = vcmp.lt.s32.totalorder %v4969_v19, 0  ;;  %v2454_v58 = vxor.u32 2147483648, %v5393_v27  ;;  %v6102_v4 = vld [vmem:[#allocation20_spill] sm:$0xff] }
 0x226   : > { %v3597_v32 = vsel %vm1925_vm15, %v2353_v15, %v3181_v12  ;;  %vm1572_vm12 = vcmp.lt.s32.totalorder %v1571_v5, 2  ;;  %vm1573_vm7 = vcmp.eq.s32.totalorder %v1571_v5, 0  ;;  %vm1576_vm14 = vcmp.eq.s32.totalorder %v1571_v5, 2  ;;  %v6101_v12 = vld [vmem:[#allocation39_spill] sm:$0xff] }
 0x227   : > { %3613 = vst [vmem:[%s5463_s8 + $0x58] sm:$0xff] %v3597_v32  ;;  %vm745_vm10 = vcmp.lt.s32.totalorder %v744_v56, 2  ;;  %vm746_vm1 = vcmp.eq.s32.totalorder %v744_v56, 0  ;;  %vm749_vm2 = vcmp.eq.s32.totalorder %v744_v56, 2  ;;  %v1575_v50 = vsel %vm1573_vm7, %v5336_v41, %v747_v52  ;;  %v6105_v56 = vld [vmem:[#allocation38_spill] sm:$0xff] }
 0x228   : > { %v748_v57 = vsel %vm746_vm1, %v5336_v41, %v747_v52  ;;  %v751_v30 = vsel %vm749_vm2, %v750_v0, %v5387_v10  ;;  %v1578_v47 = vsel %vm1576_vm14, %v750_v0, %v5387_v10  ;;  %v2441_v44 = vsel %vm6092_vm9, %v2440_v51, %v6091_v18  ;;  %v6099_v52 = vld [vmem:[#allocation37_spill] sm:$0xff]  ;;  %v6104_v0 = vld [vmem:[#allocation42_spill] sm:$0xff] }
 0x229   : > { %v752_v61 = vsel %vm745_vm10, %v748_v57, %v751_v30  ;;  %v1579_v2 = vsel %vm1572_vm12, %v1575_v50, %v1578_v47  ;;  %vm6093_vm15 = vnez %v6050_v26  ;;  %v2646_v45 = vxor.u32 2147483648, %v5618_v8 }
 0x22a   : > { %v2443_v35 = vsel %vm6093_vm15, 0, %v2441_v44  ;;  %v753_v16 = vsel %vm742_vm3, nan, %v752_v61  ;;  %v1580_v41 = vsel %vm742_vm3, nan, %v1579_v2  ;;  %vm2446_vm4 = vweird.f32 %v4969_v19 }
 0x22b   : > { %v2447_v55 = vadd.s32 3, %v2443_v35  ;;  %v3275_v10 = vand.u32 3, %v2443_v35  ;;  %v1934_v54 = vsel %vm1926_vm11, %v753_v16, %v1580_v41  ;;  %v840_v7 = vsub.s32 4, %v6094_v20 }
 0x22c   : > { %3606 = vst [vmem:[%s5463_s8 + $0x20] sm:$0xff] %v1934_v54  ;;  %v851_v1 = vxor.u32 2147483648, %v5236_v21  ;;  %vm6096_vm3 = vcmp.lt.s32.totalorder %v6095_v28, 0  ;;  %vm846_vm0 = vweird.f32 %v6095_v28  ;;  %vm6098_vm10 = vnez %v6097_v6 }
 0x22d   : > { %v2448_v26 = vand.u32 3, %v2447_v55  ;;  %vm3277_vm5 = vcmp.eq.s32.totalorder %v3275_v10, 0  ;;  %vm3280_vm8 = vcmp.eq.s32.totalorder %v3275_v10, 2  ;;  %vm3276_vm13 = vcmp.lt.s32.totalorder %v3275_v10, 2 }
 0x22e   : > { %v3279_v46 = vsel %vm3277_vm5, %v5393_v27, %v2451_v22  ;;  %v3282_v33 = vsel %vm3280_vm8, %v2454_v58, %v5396_v34  ;;  %v841_v63 = vsel %vm6096_vm3, %v840_v7, %v6094_v20  ;;  %v854_v3 = vxor.u32 2147483648, %v6099_v52 }
 0x22f   : > { %vm2449_vm12 = vcmp.lt.s32.totalorder %v2448_v26, 2  ;;  %vm2450_vm7 = vcmp.eq.s32.totalorder %v2448_v26, 0  ;;  %vm2453_vm14 = vcmp.eq.s32.totalorder %v2448_v26, 2  ;;  %v3283_v9 = vsel %vm3276_vm13, %v3279_v46, %v3282_v33 }
 0x230   : > { %v2452_v42 = vsel %vm2450_vm7, %v5393_v27, %v2451_v22  ;;  %v2455_v29 = vsel %vm2453_vm14, %v2454_v58, %v5396_v34  ;;  %v3284_v31 = vsel %vm2446_vm4, nan, %v3283_v9  ;;  %v843_v13 = vsel %vm6098_vm10, 0, %v841_v63  ;;  %v6100_v27 = vld [vmem:[#allocation32_spill] sm:$0xff] }
 0x231   : > { %v2456_v49 = vsel %vm2449_vm12, %v2452_v42, %v2455_v29  ;;  %v847_v37 = vadd.s32 3, %v843_v13  ;;  %v1674_v39 = vand.u32 3, %v843_v13  ;;  %vm1927_vm1 = vcmp.eq.s32.totalorder %v1915_v17, 1  ;;  %v6112_v42 = vld [vmem:[#allocation33_spill] sm:$0xff]  ;;  %v5751_v13 = vpop.permute.xlu1 %1917 }
 0x232   : > { %v2457_v11 = vsel %vm2446_vm4, nan, %v2456_v49  ;;  %v2544_v38 = vsub.s32 4, %v6100_v27  ;;  %v2555_v34 = vxor.u32 2147483648, %v5318_v14  ;;  %vm2564_vm15 = vcmp.lt.s32.totalorder %v6101_v12, 0 }
 0x233   : > { %v3598_v43 = vsel %vm1926_vm11, %v2457_v11, %v3284_v31  ;;  %v848_v24 = vand.u32 3, %v847_v37  ;;  %vm1675_vm2 = vcmp.lt.s32.totalorder %v1674_v39, 2  ;;  %vm1676_vm9 = vcmp.eq.s32.totalorder %v1674_v39, 0 }
 0x234   : > { %3614 = vst [vmem:[%s5463_s8 + $0x60] sm:$0xff] %v3598_v43  ;;  %v1678_v36 = vsel %vm1676_vm9, %v6099_v52, %v851_v1  ;;  %vm1679_vm5 = vcmp.eq.s32.totalorder %v1674_v39, 2  ;;  %vm6103_vm8 = vcmp.lt.s32.totalorder %v6102_v4, 0  ;;  %v2558_v5 = vxor.u32 2147483648, %v6104_v0 }
 0x235   : > { %v2545_v19 = vsel %vm6103_vm8, %v2544_v38, %v6100_v27  ;;  %vm849_vm4 = vcmp.lt.s32.totalorder %v848_v24, 2  ;;  %vm850_vm13 = vcmp.eq.s32.totalorder %v848_v24, 0  ;;  %vm853_vm3 = vcmp.eq.s32.totalorder %v848_v24, 2  ;;  %v6120_v24 = vld [vmem:[#allocation41_spill] sm:$0xff] }
 0x236   : > { %v1681_v53 = vsel %vm1679_vm5, %v854_v3, %v5236_v21  ;;  %v852_v18 = vsel %vm850_vm13, %v6099_v52, %v851_v1  ;;  %v855_v51 = vsel %vm853_vm3, %v854_v3, %v5236_v21  ;;  %vm6106_vm11 = vnez %v6105_v56 }
 0x237   : > { %v1682_v15 = vsel %vm1675_vm2, %v1678_v36, %v1681_v53  ;;  %v2547_v22 = vsel %vm6106_vm11, 0, %v2545_v19  ;;  %v856_v32 = vsel %vm849_vm4, %v852_v18, %v855_v51  ;;  %vm2550_vm12 = vweird.f32 %v6102_v4 }
 0x238   : > { %v1683_v50 = vsel %vm846_vm0, nan, %v1682_v15  ;;  %v2551_v57 = vadd.s32 3, %v2547_v22  ;;  %v3378_v30 = vand.u32 3, %v2547_v22  ;;  %v857_v47 = vsel %vm846_vm0, nan, %v856_v32 }
 0x239   : > { %v6107_v44 = vand.u32 2147483647, %v5153_v48  ;;  %v944_v61 = vsub.s32 4, %v5389_v23  ;;  %v1935_v2 = vsel %vm1927_vm1, %v857_v47, %v1683_v50  ;;  %v2750_v1 = vxor.u32 2147483648, %v5532_v60 }
 0x23a   : > { %v2552_v35 = vand.u32 3, %v2551_v57  ;;  %vm3379_vm14 = vcmp.lt.s32.totalorder %v3378_v30, 2  ;;  %vm3380_vm10 = vcmp.eq.s32.totalorder %v3378_v30, 0  ;;  %vm3383_vm2 = vcmp.eq.s32.totalorder %v3378_v30, 2  ;;  %3607 = vst [vmem:[%s5463_s8 + $0x28] sm:$0xff] %v1935_v2 }
 0x23b   : > { %vm5702_vm7 = vcmp.le.f32.partialorder %v6107_v44, 0.7853982  ;;  %v3382_v58 = vsel %vm3380_vm10, %v6104_v0, %v2555_v34  ;;  %v945_v16 = vsel %vm860_vm6, %v944_v61, %v5389_v23  ;;  %v3385_v55 = vsel %vm3383_vm2, %v2558_v5, %v5318_v14 }
 0x23c   : > { %v946_v41 = vsel %vm5702_vm7, %v5153_v48, %v5548_v59  ;;  %vm2553_vm0 = vcmp.lt.s32.totalorder %v2552_v35, 2  ;;  %vm2554_vm9 = vcmp.eq.s32.totalorder %v2552_v35, 0  ;;  %vm2557_vm5 = vcmp.eq.s32.totalorder %v2552_v35, 2 }
 0x23d   : > { %v2556_v10 = vsel %vm2554_vm9, %v6104_v0, %v2555_v34  ;;  %v2559_v54 = vsel %vm2557_vm5, %v2558_v5, %v5318_v14  ;;  %v3386_v20 = vsel %vm3379_vm14, %v3382_v58, %v3385_v55  ;;  %v947_v7 = vsel %vm5702_vm7, 0, %v945_v16 }
 0x23e   : > { %v2647_v23 = vsel %vm2564_vm15, %v2646_v45, %v5618_v8  ;;  %v2560_v59 = vsel %vm2553_vm0, %v2556_v10, %v2559_v54  ;;  %v3387_v26 = vsel %vm2550_vm12, nan, %v3386_v20  ;;  %4046 = vcosq.f32 %v946_v41  ;;  %v6111_v8 = vld [vmem:[#allocation30_spill] sm:$0xff] }
 0x23f   : > { %v2561_v14 = vsel %vm2550_vm12, nan, %v2560_v59  ;;  %4048 = vsinq.f32 %v946_v41  ;;  %v951_v33 = vadd.s32 3, %v947_v7  ;;  %v6110_v28 = vand.u32 2147483647, %v6101_v12 }
 0x240   : > { %v3599_v46 = vsel %vm1927_vm1, %v2561_v14, %v3387_v26  ;;  %v2648_v63 = vsub.s32 4, %v5461_v25  ;;  %vm964_vm8 = vcmp.lt.s32.totalorder %v6111_v8, 0  ;;  %vm2668_vm4 = vcmp.lt.s32.totalorder %v6112_v42, 0 }
 0x241   : > { %vm2563_vm6 = vcmp.le.f32.partialorder %v6110_v28, 0.7853982  ;;  %3615 = vst [vmem:[%s5463_s8 + $0x68] sm:$0xff] %v3599_v46  ;;  %v1047_v9 = vsel %vm964_vm8, %v1046_v62, %v5339_v40  ;;  %v1777_v29 = vand.u32 3, %v947_v7  ;;  %v2751_v6 = vsel %vm2668_vm4, %v2750_v1, %v5532_v60  ;;  %v6116_v62 = vld [vmem:[#allocation40_spill] sm:$0xff] }
 0x242   : > { %v2650_v45 = vsel %vm2563_vm6, %v6101_v12, %v2647_v23  ;;  %v2649_v31 = vsel %vm2564_vm15, %v2648_v63, %v5461_v25  ;;  %v952_v17 = vand.u32 3, %v951_v33  ;;  %v6113_v37 = vand.u32 2147483647, %v6111_v8 }
 0x243   : > { %v2651_v49 = vsel %vm2563_vm6, 0, %v2649_v31  ;;  %4050 = vcosq.f32 %v2650_v45  ;;  %v1048_v52 = vsub.s32 4, %v6116_v62  ;;  %vm950_vm15 = vweird.f32 %v5153_v48 }
 0x244   : > { %4052 = vsinq.f32 %v2650_v45  ;;  %vm5755_vm1 = vcmp.le.f32.partialorder %v6113_v37, 0.7853982  ;;  %v2655_v25 = vadd.s32 3, %v2651_v49  ;;  %vm1778_vm13 = vcmp.lt.s32.totalorder %v1777_v29, 2 }
 0x245   : > { %v1050_v60 = vsel %vm5755_vm1, %v6111_v8, %v1047_v9  ;;  %vm1779_vm3 = vcmp.eq.s32.totalorder %v1777_v29, 0  ;;  %vm1928_vm11 = vcmp.eq.s32.totalorder %v5751_v13, 1  ;;  %v6117_v3 = vand.u32 2147483647, %v6112_v42  ;;  %v1921_v9 = vpop.permute.xlu0 %1920 }
 0x246   : > { %v3481_v11 = vand.u32 3, %v2651_v49  ;;  %v1049_v27 = vsel %vm964_vm8, %v1048_v52, %v6116_v62  ;;  %4054 = vcosq.f32 %v1050_v60  ;;  %vm953_vm7 = vcmp.lt.s32.totalorder %v952_v17, 2 }
 0x247   : > { %vm5767_vm12 = vcmp.le.f32.partialorder %v6117_v3, 0.7853982  ;;  %vm1782_vm14 = vcmp.eq.s32.totalorder %v1777_v29, 2  ;;  %v1051_v43 = vsel %vm5755_vm1, 0, %v1049_v27  ;;  %v2752_v36 = vsub.s32 4, %v6120_v24 }
 0x248   : > { %v2754_v38 = vsel %vm5767_vm12, %v6112_v42, %v2751_v6  ;;  %v4047_v34 = vpop.eup %4046  ;;  %vm954_vm10 = vcmp.eq.s32.totalorder %v952_v17, 0  ;;  %v2656_v0 = vand.u32 3, %v2655_v25  ;;  %4056 = vsinq.f32 %v1050_v60 }
 0x249   : > { %v4049_v4 = vpop.eup %4048  ;;  %v958_v19 = vxor.u32 2147483648, %v4047_v34  ;;  %vm957_vm2 = vcmp.eq.s32.totalorder %v952_v17, 2  ;;  %v1055_v53 = vadd.s32 3, %v1051_v43  ;;  %4058 = vcosq.f32 %v2754_v38 }
 0x24a   : > { %v955_v5 = vxor.u32 2147483648, %v4049_v4  ;;  %vm2654_vm0 = vweird.f32 %v6101_v12  ;;  %vm3482_vm9 = vcmp.lt.s32.totalorder %v3481_v11, 2  ;;  %vm3486_vm5 = vcmp.eq.s32.totalorder %v3481_v11, 2 }
 0x24b   : > { %v959_v18 = vsel %vm957_vm2, %v958_v19, %v4049_v4  ;;  %v1784_v51 = vsel %vm1782_vm14, %v958_v19, %v4049_v4  ;;  %v2753_v22 = vsel %vm2668_vm4, %v2752_v36, %v6120_v24  ;;  %vm2661_vm6 = vcmp.eq.s32.totalorder %v2656_v0, 2 }
 0x24c   : > { %v956_v15 = vsel %vm954_vm10, %v4047_v34, %v955_v5  ;;  %v1781_v56 = vsel %vm1779_vm3, %v4047_v34, %v955_v5  ;;  %v1880_v30 = vand.u32 3, %v1051_v43  ;;  %v1056_v2 = vand.u32 3, %v1055_v53 }
 0x24d   : > { %v4051_v32 = vpop.eup %4050  ;;  %v960_v50 = vsel %vm953_vm7, %v956_v15, %v959_v18  ;;  %v1785_v57 = vsel %vm1778_vm13, %v1781_v56, %v1784_v51  ;;  %v2755_v16 = vsel %vm5767_vm12, 0, %v2753_v22  ;;  %4060 = vsinq.f32 %v2754_v38 }
 0x24e   : > { %v4053_v47 = vpop.eup %4052  ;;  %v961_v44 = vsel %vm950_vm15, nan, %v960_v50  ;;  %v1786_v21 = vsel %vm950_vm15, nan, %v1785_v57  ;;  %v2662_v61 = vxor.u32 2147483648, %v4051_v32  ;;  %vm2658_vm8 = vcmp.eq.s32.totalorder %v2656_v0, 0 }
 0x24f   : > { %v1936_v35 = vsel %vm1928_vm11, %v961_v44, %v1786_v21  ;;  %v2659_v58 = vxor.u32 2147483648, %v4053_v47  ;;  %vm3483_vm4 = vcmp.eq.s32.totalorder %v3481_v11, 0  ;;  %vm2657_vm1 = vcmp.lt.s32.totalorder %v2656_v0, 2 }
 0x250   : > { %v2663_v41 = vsel %vm2661_vm6, %v2662_v61, %v4053_v47  ;;  %v3488_v55 = vsel %vm3486_vm5, %v2662_v61, %v4053_v47  ;;  %3608 = vst [vmem:[%s5463_s8 + $0x30] sm:$0xff] %v1936_v35  ;;  %v4055_v10 = vpop.eup %4054  ;;  %v2759_v20 = vadd.s32 3, %v2755_v16  ;;  %vm1881_vm15 = vcmp.lt.s32.totalorder %v1880_v30, 2 }
 0x251   : > { %v2660_v48 = vsel %vm2658_vm8, %v4051_v32, %v2659_v58  ;;  %v3485_v54 = vsel %vm3483_vm4, %v4051_v32, %v2659_v58  ;;  %v1062_v59 = vxor.u32 2147483648, %v4055_v10  ;;  %vm1061_vm13 = vcmp.eq.s32.totalorder %v1056_v2, 2 }
 0x252   : > { %v2664_v7 = vsel %vm2657_vm1, %v2660_v48, %v2663_v41  ;;  %v3489_v23 = vsel %vm3482_vm9, %v3485_v54, %v3488_v55  ;;  %v4057_v26 = vpop.eup %4056  ;;  %vm1885_vm3 = vcmp.eq.s32.totalorder %v1880_v30, 2  ;;  %vm1058_vm12 = vcmp.eq.s32.totalorder %v1056_v2, 0 }
 0x253   : > { %v2665_v1 = vsel %vm2654_vm0, nan, %v2664_v7  ;;  %v3490_v14 = vsel %vm2654_vm0, nan, %v3489_v23  ;;  %v4059_v46 = vpop.eup %4058  ;;  %v1059_v28 = vxor.u32 2147483648, %v4057_v26  ;;  %v1063_v63 = vsel %vm1061_vm13, %v1062_v59, %v4057_v26 }
 0x254   : > { %v3600_v33 = vsel %vm1928_vm11, %v2665_v1, %v3490_v14  ;;  %v1887_v45 = vsel %vm1885_vm3, %v1062_v59, %v4057_v26  ;;  %vm1882_vm7 = vcmp.eq.s32.totalorder %v1880_v30, 0  ;;  %v2760_v29 = vand.u32 3, %v2759_v20 }
 0x255   : > { %3616 = vst [vmem:[%s5463_s8 + $0x70] sm:$0xff] %v3600_v33  ;;  %v3584_v31 = vand.u32 3, %v2755_v16  ;;  %vm1057_vm14 = vcmp.lt.s32.totalorder %v1056_v2, 2  ;;  %v1060_v12 = vsel %vm1058_vm12, %v4055_v10, %v1059_v28  ;;  %v1884_v6 = vsel %vm1882_vm7, %v4055_v10, %v1059_v28 }
 0x256   : > { %v2766_v49 = vxor.u32 2147483648, %v4059_v46  ;;  %vm1054_vm10 = vweird.f32 %v6111_v8  ;;  %v1064_v13 = vsel %vm1057_vm14, %v1060_v12, %v1063_v63  ;;  %v1888_v17 = vsel %vm1881_vm15, %v1884_v6, %v1887_v45 }
 0x257   : > { %v1065_v37 = vsel %vm1054_vm10, nan, %v1064_v13  ;;  %v1889_v40 = vsel %vm1054_vm10, nan, %v1888_v17  ;;  %vm1929_vm11 = vcmp.eq.s32.totalorder %v1921_v9, 1  ;;  %v4061_v62 = vpop.eup %4060  ;;  %vm2765_vm2 = vcmp.eq.s32.totalorder %v2760_v29, 2 }
 0x258   : > { %v1937_v52 = vsel %vm1929_vm11, %v1065_v37, %v1889_v40  ;;  %vm3589_vm0 = vcmp.eq.s32.totalorder %v3584_v31, 2  ;;  %v2763_v25 = vxor.u32 2147483648, %v4061_v62  ;;  %v2767_v60 = vsel %vm2765_vm2, %v2766_v49, %v4061_v62 }
 0x259   : > { %v3591_v3 = vsel %vm3589_vm0, %v2766_v49, %v4061_v62  ;;  %3609 = vst [vmem:[%s5463_s8 + $0x38] sm:$0xff] %v1937_v52  ;;  %vm2762_vm9 = vcmp.eq.s32.totalorder %v2760_v29, 0  ;;  %vm3586_vm5 = vcmp.eq.s32.totalorder %v3584_v31, 0  ;;  %vm2761_vm6 = vcmp.lt.s32.totalorder %v2760_v29, 2 }
 0x25a   : > { %v2764_v8 = vsel %vm2762_vm9, %v4059_v46, %v2763_v25  ;;  %vm3585_vm8 = vcmp.lt.s32.totalorder %v3584_v31, 2  ;;  %v3588_v39 = vsel %vm3586_vm5, %v4059_v46, %v2763_v25  ;;  %vm2758_vm4 = vweird.f32 %v6112_v42 }
 0x25b   : > { %v2768_v11 = vsel %vm2761_vm6, %v2764_v8, %v2767_v60  ;;  %v3592_v27 = vsel %vm3585_vm8, %v3588_v39, %v3591_v3 }
 0x25c   : > { %v2769_v38 = vsel %vm2758_vm4, nan, %v2768_v11  ;;  %v3593_v34 = vsel %vm2758_vm4, nan, %v3592_v27 }
 0x25d   : > { %v3601_v43 = vsel %vm1929_vm11, %v2769_v38, %v3593_v34 }
 0x25e   : > { %3617 = vst [vmem:[%s5463_s8 + $0x78] sm:$0xff] %v3601_v43 }
 0x25f   : > { %4075 = shalt.err (!%p4072_p6)
}
 0x260   : > { %s4076_s4 = scalar_lea.hbm %s5818_s25, 2048  ;;  %s4080_s7 = scalar_lea.hbm %s5878_s2, 8192 }
 0x261   : > { %p4077_p7 = scmp.ne.s32.totalorder %s5818_s25, %s4076_s4  ;;  %p4081_p11 = scmp.lt.u32.totalorder %s5818_s25, %s5878_s2 }
 0x262   : > { %p4082_p12 = scmp.lt.u32.totalorder %s4080_s7, %s4076_s4  ;;  %p4084_p0 = scmp.lt.u32.totalorder %s4076_s4, %s5818_s25 }
 0x263   : > { %p4078_p9 = pnand %p4077_p7, %p4236_p3 }
 0x264   : > { %p4083_p13 = por %p4082_p12, %p4081_p11 }
 0x265   : > { %p4079_p10 = pneg %p4078_p9 }
 0x266   : > { %p4085_p1 = por %p4084_p0, %p4083_p13 }
 0x268   : > { %p4086_p2 = pnand %p4085_p1, %p4079_p10 }
 0x26a   : > { %4089 = shalt.err (!%p4086_p2)
}
 0x26b   : > { %s4167_s18 = smov 128   ;;  %s4168_s21 = smov 256  }
 0x26c   : > { %s4169_s12 = smov 8  }
 0x26d   : > { %3912 = dma.vmem_to_hbm [thread:$0]  (%p4236_p3), %s5812_s13, 2048, %s5818_s25, %s5824_s26, %s4167_s18, %s4168_s21, %s4169_s12  }
 0x26e PF: > { %p3918_p4 = scmp.ge.s32.totalorder %s4156_s16, 2  ;;  %s3648_s24 = sand.u32 1, %s4128_s9  }
 0x26f   : > { %s3649_s28 = scalar_lea.sflag [#allocation3], %s3648_s24 }
 0x270   : > { %p3915_p5 = pnand %p3918_p4, %p4245_p8 }
 0x272   : > { %4123 = dma.done.wait (!%p3915_p5), %s3649_s28, 2048  }
 0x273   : > { %4125 = vsyncadd (!%p3915_p5), %s3649_s28, 4294965248  ;;  %s15_s16 = sadd.s32 1, %s4156_s16   ;;  %s6121_s9 = smov %s4132_s10 }
 0x274   : > { %p12_p6 = scmp.ge.s32.totalorder %s15_s16, 6   ;;  %s6122_s10 = smov %s4136_s11 }
 0x275   : > { %s6123_s11 = smov %s4254_s27  ;;  %s6124_s12 = smov %s4148_s14 }
 0x276   : > { %s6125_s13 = smov %s4152_s15  ;;  %s6126_s14 = smov %s6129_s19 }
 0x277   : > { %s6127_s15 = smov %s6133_s20  ;;  %14 = sbr.rel (!%p12_p6) target bundleno = 5 (0x5), region = 63 }
 0x27e   :  { %3654 = vsyncpa [#allocation3], 1 }
 0x27f   :  { %3656 = vsyncpa [#allocation3 + $0x1], 1 }

</bundles_post_ra>
